<compile_context>
chip_gen: v7x
topology: tpu7x:2x2x1
jax: 0.10.0
libtpu: 0.0.40
codegen_flags: <defaults>
</compile_context>

<pallas_src>
import functools
import math

import jax
import jax.numpy as jnp
from jax.experimental import pallas as pl
from jax.experimental.pallas import tpu as pltpu


LANE = 128


def _round_up(x, m):
    return (x + m - 1) // m * m


# ----------------------------------------------------------------------------
# VMEM budgeting / tile-row selection
# ----------------------------------------------------------------------------
def _vmem_budget_and_limit():
    """(per-kernel working-set budget, scoped vmem_limit_bytes) per generation."""
    cap = 64 * 1024 * 1024                       # assume v7x-sized VMEM if query fails
    try:
        cap = int(getattr(pltpu.get_tpu_info(), "vmem_capacity_bytes", cap))
    except Exception:
        pass
    budget = min(int(cap * 0.55), 48 * 1024 * 1024)   # v7x: ~35 MiB, v5e/v6e: 48 MiB
    limit = max(32 * 1024 * 1024, min(int(cap * 0.75), 96 * 1024 * 1024))
    return budget, limit


def _pick_tile_rows(H, W, Cp, *, live_elem_bytes, budget_bytes):
    """Largest row-tile TH whose full working set fits the VMEM budget.

    live_elem_bytes: bytes per output element that scale with TH beyond the
    shared halo/weight buffers (tap patches, f32 acc, pipelined output and
    extra tiled inputs, f32 epilogue temporaries).
    """
    def usage(th):
        halo = 2 * (th + 2) * W * Cp * 2          # double-buffered bf16 DMA buffer
        padv = (th + 2) * (W + 2) * Cp * 2        # column-padded tile value
        wgt = 2 * (9 * Cp * Cp * 2) + 2 * Cp * 4  # weights (x2 bufs) + bias
        return halo + padv + wgt + th * W * Cp * live_elem_bytes

    best = 1
    for th in [1, 2, 4] + list(range(8, H + 1, 8)) + [H]:
        if th <= H and usage(th) <= budget_bytes:
            best = max(best, th)
    return best


# ----------------------------------------------------------------------------
# Manual halo DMA (no HBM-side spatial padding)
# ----------------------------------------------------------------------------
def _make_halo_cases(TH, T, H):
    """Statically-sized DMA windows per tile position.

    Each case: (pred(t), src_row_fn(t), n_rows, dst_row).  Exactly one case
    fires per tile; sizes are Python ints so start/wait descriptors match.
    """
    if T == 1:
        return [(lambda t: t == 0, lambda t: 0, H, 1)]
    th_last = H - (T - 1) * TH
    cases = [
        # first tile: rows [0, TH+1) -> buffer rows [1, TH+2)
        (lambda t: t == 0, lambda t: 0, TH + 1, 1),
        # last tile: rows [r0-1, H) -> buffer rows [0, th_last+1)
        (lambda t: t == T - 1, lambda t: (T - 1) * TH - 1, th_last + 1, 0),
    ]
    if T > 2:
        # interior tiles: rows [r0-1, r0+TH+1) -> buffer rows [0, TH+2)
        cases.append((lambda t: jnp.logical_and(t > 0, t < T - 1),
                      lambda t: t * TH - 1, TH + 2, 0))
    return cases


def _halo_dma(x_hbm, xbuf, sem, n, t, slot, cases, *, start):
    """Start (or wait for) the halo-row DMA of tile index t into xbuf[slot]."""
    for pred, src_fn, nrows, dst_row in cases:
        @pl.when(pred(t))
        def _(src_fn=src_fn, nrows=nrows, dst_row=dst_row):
            cp = pltpu.make_async_copy(
                x_hbm.at[n, pl.ds(src_fn(t), nrows)],
                xbuf.at[slot, pl.ds(dst_row, nrows)],
                sem.at[slot])
            if start:
                cp.start()
            else:
                cp.wait()


def _load_halo_tile(xbuf, slot, t, *, TH, T, H):
    """Load xbuf[slot] and zero the halo rows not covered by any DMA
    (above-image row on the first tile, below-image / partial tail rows on
    the last tile)."""
    xb = xbuf[slot]                                            # (TH+2, W, Cp) bf16
    th_last = H - (T - 1) * TH
    row = jax.lax.broadcasted_iota(jnp.int32, (TH + 2, 1, 1), 0)
    bad = jnp.logical_and(t == 0, row == 0)
    bad = jnp.logical_or(bad, jnp.logical_and(t == T - 1, row >= th_last + 1))
    return jnp.where(bad, jnp.zeros_like(xb), xb)


# ----------------------------------------------------------------------------
# Shared in-kernel 3x3 conv: 9 accumulating MXU dots (no im2col concat)
# ----------------------------------------------------------------------------
def _conv3x3_acc(xb, w_ref, b_ref, *, TH, W, Cp):
    """xb: (TH+2, W, Cp) bf16 tile (zeroed top/bottom halo rows).
    Returns the 3x3 'same' conv output (TH*W, Cp) f32, bias added.

    NOTE: N = Cp = 128 fills only half of v6e/v7x's 256-wide MXU; M = TH*W is
    maximized via the VMEM-driven tile picker to compensate.
    """
    zcol = jnp.zeros((TH + 2, 1, Cp), xb.dtype)
    xbp = jnp.concatenate([zcol, xb, zcol], axis=1)            # (TH+2, W+2, Cp)
    acc = jnp.zeros((TH * W, Cp), jnp.float32)
    for ky in range(3):
        for kx in range(3):
            patch = xbp[ky:ky + TH, kx:kx + W, :].reshape(TH * W, Cp)
            tap = ky * 3 + kx
            acc = acc + jnp.dot(patch, w_ref[tap * Cp:(tap + 1) * Cp, :],
                                preferred_element_type=jnp.float32)
    return acc + b_ref[...].astype(jnp.float32)                # (TH*W, Cp) f32


# ----------------------------------------------------------------------------
# 3x3 conv (padding=1, stride=1) + optional fused LeakyReLU(0.01)
# ----------------------------------------------------------------------------
def _conv3x3_kernel(x_hbm, w_ref, b_ref, o_ref, xbuf, sem,
                    *, TH, T, H, W, Cp, cases, leaky):
    n = pl.program_id(0)
    t = pl.program_id(1)
    slot = t % 2

    @pl.when(t == 0)                       # prime the pipeline for this batch element
    def _():
        _halo_dma(x_hbm, xbuf, sem, n, t, slot, cases, start=True)

    if T > 1:                              # prefetch the next row tile
        @pl.when(t + 1 < T)
        def _():
            _halo_dma(x_hbm, xbuf, sem, n, t + 1, 1 - slot, cases, start=True)

    _halo_dma(x_hbm, xbuf, sem, n, t, slot, cases, start=False)

    xb = _load_halo_tile(xbuf, slot, t, TH=TH, T=T, H=H)
    acc = _conv3x3_acc(xb, w_ref, b_ref, TH=TH, W=W, Cp=Cp)
    if leaky:
        acc = jnp.where(acc >= 0, acc, jnp.float32(0.01) * acc)   # nn.LeakyReLU default
    o_ref[0] = acc.reshape(TH, W, Cp).astype(o_ref.dtype)


def conv3x3(x_nhwc, w_flat, b, *, leaky, out_dtype=jnp.bfloat16):
    N, H, W, Cp = x_nhwc.shape
    assert Cp % LANE == 0 and w_flat.shape == (9 * Cp, Cp)
    x_bf = x_nhwc.astype(jnp.bfloat16)                     # no-op when already bf16
    budget, vmem_limit = _vmem_budget_and_limit()
    TH = _pick_tile_rows(H, W, Cp, live_elem_bytes=14, budget_bytes=budget)
    T = -(-H // TH)                                        # cdiv; last tile may be partial
    cases = _make_halo_cases(TH, T, H)
    kernel = functools.partial(_conv3x3_kernel, TH=TH, T=T, H=H, W=W, Cp=Cp,
                               cases=cases, leaky=leaky)
    return pl.pallas_call(
        kernel,
        out_shape=jax.ShapeDtypeStruct((N, H, W, Cp), out_dtype),
        grid=(N, T),
        in_specs=[
            pl.BlockSpec(memory_space=pl.ANY),                 # input stays in HBM
            pl.BlockSpec((9 * Cp, Cp), lambda n, t: (0, 0)),   # tap-major weights
            pl.BlockSpec((1, Cp), lambda n, t: (0, 0)),        # bias (f32)
        ],
        out_specs=pl.BlockSpec((1, TH, W, Cp), lambda n, t: (n, t, 0, 0)),
        scratch_shapes=[
            pltpu.VMEM((2, TH + 2, W, Cp), jnp.bfloat16),      # double-buffered halo tile
            pltpu.SemaphoreType.DMA((2,)),
        ],
        compiler_params=pltpu.CompilerParams(
            dimension_semantics=("parallel", "arbitrary"),
            vmem_limit_bytes=vmem_limit),
    )(x_bf, w_flat, b)


# ----------------------------------------------------------------------------
# Fused: p2 = conv3x3(x, w3, b3);  out = x * (1 + sigmoid(p1 * p2))
# (residual x is read from the bf16 halo buffer — no extra f32 HBM read)
# ----------------------------------------------------------------------------
def _conv3x3_gate_kernel(x_hbm, w_ref, b_ref, p1_ref, o_ref, xbuf, sem,
                         *, TH, T, H, W, Cp, cases):
    n = pl.program_id(0)
    t = pl.program_id(1)
    slot = t % 2

    @pl.when(t == 0)
    def _():
        _halo_dma(x_hbm, xbuf, sem, n, t, slot, cases, start=True)

    if T > 1:
        @pl.when(t + 1 < T)
        def _():
            _halo_dma(x_hbm, xbuf, sem, n, t + 1, 1 - slot, cases, start=True)

    _halo_dma(x_hbm, xbuf, sem, n, t, slot, cases, start=False)

    xb = _load_halo_tile(xbuf, slot, t, TH=TH, T=T, H=H)          # (TH+2, W, Cp) bf16
    p2 = _conv3x3_acc(xb, w_ref, b_ref, TH=TH, W=W, Cp=Cp)        # (TH*W, Cp) f32
    p1 = p1_ref[0].reshape(TH * W, Cp).astype(jnp.float32)
    xres = xb[1:TH + 1].reshape(TH * W, Cp).astype(jnp.float32)   # residual from halo buf
    corr = jax.nn.sigmoid(p1 * p2)
    out = xres * (1.0 + corr)                                     # == x + sigmoid(p1*p2)*x
    o_ref[0] = out.reshape(TH, W, Cp).astype(o_ref.dtype)


def conv3x3_gate(x_nhwc, p1, w_flat, b, out_dtype=jnp.float32):
    N, H, W, Cp = x_nhwc.shape
    assert Cp % LANE == 0 and p1.shape == x_nhwc.shape
    x_bf = x_nhwc.astype(jnp.bfloat16)
    p1_bf = p1.astype(jnp.bfloat16)
    budget, vmem_limit = _vmem_budget_and_limit()
    TH = _pick_tile_rows(H, W, Cp, live_elem_bytes=30, budget_bytes=budget)
    T = -(-H // TH)
    cases = _make_halo_cases(TH, T, H)
    kernel = functools.partial(_conv3x3_gate_kernel, TH=TH, T=T, H=H, W=W, Cp=Cp,
                               cases=cases)
    tile_spec = pl.BlockSpec((1, TH, W, Cp), lambda n, t: (n, t, 0, 0))
    return pl.pallas_call(
        kernel,
        out_shape=jax.ShapeDtypeStruct((N, H, W, Cp), out_dtype),
        grid=(N, T),
        in_specs=[
            pl.BlockSpec(memory_space=pl.ANY),                 # x (bf16) stays in HBM
            pl.BlockSpec((9 * Cp, Cp), lambda n, t: (0, 0)),   # w3
            pl.BlockSpec((1, Cp), lambda n, t: (0, 0)),        # b3
            tile_spec,                                         # p1 tile (bf16)
        ],
        out_specs=tile_spec,
        scratch_shapes=[
            pltpu.VMEM((2, TH + 2, W, Cp), jnp.bfloat16),
            pltpu.SemaphoreType.DMA((2,)),
        ],
        compiler_params=pltpu.CompilerParams(
            dimension_semantics=("parallel", "arbitrary"),
            vmem_limit_bytes=vmem_limit),
    )(x_bf, w_flat, b, p1_bf)


# ----------------------------------------------------------------------------
# core.imresize replacement (plain-JAX glue)
# ----------------------------------------------------------------------------
def imresize(x_nhwc, out_h, out_w):
    # TODO(synk): core.imresize (bicubic_pytorch) uses a Keys cubic kernel with
    # antialiasing and reflect border handling; jax.image.resize matches the
    # kernel/antialias but renormalizes border weights, so edge pixels may
    # differ slightly.
    N, H, W, C = x_nhwc.shape
    return jax.image.resize(x_nhwc, (N, out_h, out_w, C),
                            method="bicubic", antialias=True)


# ----------------------------------------------------------------------------
# Parameters
# ----------------------------------------------------------------------------
def init_params(key, embed_dim):
    ks = jax.random.split(key, 6)

    def conv_w(k):
        return 0.05 * jax.random.normal(k, (3, 3, embed_dim, embed_dim), jnp.float32)

    def conv_b(k):
        return 0.05 * jax.random.normal(k, (embed_dim,), jnp.float32)

    return {
        "w1": conv_w(ks[0]), "b1": conv_b(ks[1]),   # path1 conv #1 (+LeakyReLU)
        "w2": conv_w(ks[2]), "b2": conv_b(ks[3]),   # path1 conv #2
        "w3": conv_w(ks[4]), "b3": conv_b(ks[5]),   # path2 conv (fused into gate)
    }


def _prepare_conv_params(w, b, Cp):
    """Zero-pad channels to Cp and flatten to the tap-major layout (9*Cp, Cp), bf16."""
    kh, kw, cin, cout = w.shape
    w_p = jnp.zeros((kh, kw, Cp, Cp), jnp.float32).at[:, :, :cin, :cout].set(w)
    w_flat = w_p.reshape(kh * kw * Cp, Cp).astype(jnp.bfloat16)
    b_p = jnp.zeros((1, Cp), jnp.float32).at[0, :cout].set(b.reshape(-1))
    return w_flat, b_p


# ----------------------------------------------------------------------------
# ScaleModule forward
# ----------------------------------------------------------------------------
@functools.partial(jax.jit, static_argnames=("scale_factor",))
def scale_module_forward(params, x_nchw, scale_factor):
    N, C, H, W = x_nchw.shape
    Cp = _round_up(C, LANE)

    # NCHW -> NHWC, lane-dense channel pad, bf16: one fused HBM pass; this is
    # the only activation copy outside the conv kernels.
    x = jnp.transpose(x_nchw, (0, 2, 3, 1)).astype(jnp.bfloat16)
    x = jnp.pad(x, ((0, 0), (0, 0), (0, 0), (0, Cp - C)))

    wf1, bp1 = _prepare_conv_params(params["w1"], params["b1"], Cp)
    wf2, bp2 = _prepare_conv_params(params["w2"], params["b2"], Cp)
    wf3, bp3 = _prepare_conv_params(params["w3"], params["b3"], Cp)

    h_dn = int(math.ceil(H / scale_factor))
    w_dn = int(math.ceil(W / scale_factor))
    up_x = imresize(x, h_dn, w_dn)                               # imresize(scale=1/s), bf16

    p1 = conv3x3(up_x, wf1, bp1, leaky=True)                     # Conv + LeakyReLU (bf16)
    p1 = conv3x3(p1, wf2, bp2, leaky=False)                      # Conv (bf16)
    p1 = imresize(p1, H, W)                                      # imresize(sizes=(h, w))

    out = conv3x3_gate(x, p1, wf3, bp3)                          # p2 conv + gate, f32 out
    return jnp.transpose(out[..., :C], (0, 3, 1, 2)).astype(x_nchw.dtype)


# ----------------------------------------------------------------------------
# Pure-JAX reference (for a loose numerical sanity check)
# ----------------------------------------------------------------------------
def _reference_forward(params, x_nchw, scale_factor):
    N, C, H, W = x_nchw.shape
    x = jnp.transpose(x_nchw, (0, 2, 3, 1))

    def conv(y, w, b, leaky):
        out = jax.lax.conv_general_dilated(
            y, w, window_strides=(1, 1), padding="SAME",
            dimension_numbers=("NHWC", "HWIO", "NHWC"))
        out = out + b.reshape(1, 1, 1, -1)
        return jnp.where(out >= 0, out, 0.01 * out) if leaky else out

    h_dn = int(math.ceil(H / scale_factor))
    w_dn = int(math.ceil(W / scale_factor))
    up_x = imresize(x, h_dn, w_dn)
    p1 = conv(up_x, params["w1"], params["b1"], True)
    p1 = conv(p1, params["w2"], params["b2"], False)
    p1 = imresize(p1, H, W)
    p2 = conv(x, params["w3"], params["b3"], False)
    out = x + jax.nn.sigmoid(p1 * p2) * x
    return jnp.transpose(out, (0, 3, 1, 2))


if __name__ == "__main__":
    key = jax.random.PRNGKey(0)
    kx, kp = jax.random.split(key)

    embed_dim = 32            # small stand-in for the default 96
    x = jax.random.normal(kx, (2, embed_dim, 16, 16), jnp.float32)  # NCHW
    params = init_params(kp, embed_dim)

    out = scale_module_forward(params, x, scale_factor=2.0)
    jax.block_until_ready(out)
    assert out.shape == x.shape and out.dtype == x.dtype

    # Loose check vs. f32 JAX reference: the kernel path keeps activations,
    # resizes and the conv matmuls in bf16 (f32 accumulation), so allow a few
    # bf16 ulps at the output magnitude.
    ref = _reference_forward(params, x, 2.0)
    err = float(jnp.max(jnp.abs(out - ref)))
    assert err < 0.12, f"max abs err {err}"

    print("KERNEL_OK")
</pallas_src>

<mosaic_0001>
module attributes {stable_mosaic.version = 11 : i64} {
  func.func @_conv3x3_kernel(%arg0: i32, %arg1: i32, %arg2: memref<2x8x8x128xbf16, #tpu.memory_space<any>>, %arg3: memref<1152x128xbf16, #tpu.memory_space<vmem>>, %arg4: memref<1x128xf32, #tpu.memory_space<vmem>>, %arg5: memref<1x8x8x128xbf16, #tpu.memory_space<vmem>>, %arg6: memref<2x10x8x128xbf16, #tpu.memory_space<vmem>>, %arg7: memref<2x!tpu.dma_semaphore, #tpu.memory_space<semaphore_mem>>) attributes {dimension_semantics = [#tpu.dimension_semantics<parallel>, #tpu.dimension_semantics<arbitrary>], iteration_bounds = array<i64: 2, 1>, scalar_prefetch = 0 : i64, scratch_operands = 2 : i64, tpu.core_type = #tpu.core_type<tc>, window_params = [{}, {pipeline_mode = #tpu.pipeline_mode<synchronous>, transform_indices = @transform_1, window_bounds = array<i64: 1152, 128>}, {pipeline_mode = #tpu.pipeline_mode<synchronous>, transform_indices = @transform_2, window_bounds = array<i64: 1, 128>}, {transform_indices = @transform_3, window_bounds = array<i64: 1, 8, 8, 128>}]} {
    %c2_i32 = arith.constant 2 : i32
    %c0_i32 = arith.constant 0 : i32
    %0 = arith.cmpi eq, %c2_i32, %c0_i32 : i32
    %c1_i32 = arith.constant 1 : i32
    %1 = arith.select %0, %c1_i32, %c2_i32 : i32
    %2 = arith.remsi %arg1, %1 : i32
    %c0_i32_0 = arith.constant 0 : i32
    %3 = arith.cmpi ne, %2, %c0_i32_0 : i32
    %c0_i32_1 = arith.constant 0 : i32
    %4 = arith.cmpi slt, %2, %c0_i32_1 : i32
    %c0_i32_2 = arith.constant 0 : i32
    %5 = arith.cmpi slt, %1, %c0_i32_2 : i32
    %6 = arith.xori %4, %5 : i1
    %7 = arith.andi %6, %3 : i1
    %8 = arith.addi %2, %1 : i32
    %9 = arith.select %7, %8, %2 : i32
    %c0_i32_3 = arith.constant 0 : i32
    %10 = arith.cmpi eq, %arg1, %c0_i32_3 : i32
    %11 = arith.extui %10 : i1 to i32
    %c0_i32_4 = arith.constant 0 : i32
    %12 = arith.cmpi ne, %11, %c0_i32_4 : i32
    scf.if %12 {
      %c0_i32_41 = arith.constant 0 : i32
      %96 = arith.cmpi eq, %arg1, %c0_i32_41 : i32
      %97 = arith.extui %96 : i1 to i32
      %c0_i32_42 = arith.constant 0 : i32
      %98 = arith.cmpi ne, %97, %c0_i32_42 : i32
      scf.if %98 {
        %c0_i32_43 = arith.constant 0 : i32
        %c0_i32_44 = arith.constant 0 : i32
        %c0_i32_45 = arith.constant 0 : i32
        %99 = tpu.memref_slice %arg2[%arg0, %c0_i32_43, %c0_i32_44, %c0_i32_45] : memref<2x8x8x128xbf16, #tpu.memory_space<any>> -> memref<1x8x8x128xbf16, #tpu.memory_space<any>>
        %100 = tpu.memref_squeeze %99 : memref<1x8x8x128xbf16, #tpu.memory_space<any>> -> memref<8x8x128xbf16, #tpu.memory_space<any>>
        %c1_i32_46 = arith.constant 1 : i32
        %c0_i32_47 = arith.constant 0 : i32
        %c0_i32_48 = arith.constant 0 : i32
        %101 = tpu.memref_slice %arg6[%9, %c1_i32_46, %c0_i32_47, %c0_i32_48] : memref<2x10x8x128xbf16, #tpu.memory_space<vmem>> -> memref<1x8x8x128xbf16, #tpu.memory_space<vmem>>
        %102 = tpu.memref_squeeze %101 : memref<1x8x8x128xbf16, #tpu.memory_space<vmem>> -> memref<8x8x128xbf16, #tpu.memory_space<vmem>>
        %103 = tpu.memref_slice %arg7[%9] : memref<2x!tpu.dma_semaphore, #tpu.memory_space<semaphore_mem>> -> memref<1x!tpu.dma_semaphore, #tpu.memory_space<semaphore_mem>>
        %104 = tpu.memref_squeeze %103 : memref<1x!tpu.dma_semaphore, #tpu.memory_space<semaphore_mem>> -> memref<!tpu.dma_semaphore, #tpu.memory_space<semaphore_mem>>
        tpu.enqueue_dma source(%100 : memref<8x8x128xbf16, #tpu.memory_space<any>>) target(%102 : memref<8x8x128xbf16, #tpu.memory_space<vmem>>) target_semaphore(%104 : memref<!tpu.dma_semaphore, #tpu.memory_space<semaphore_mem>>)
      } else {
      }
    } else {
    }
    %c0_i32_5 = arith.constant 0 : i32
    %13 = arith.cmpi eq, %arg1, %c0_i32_5 : i32
    %14 = arith.extui %13 : i1 to i32
    %c0_i32_6 = arith.constant 0 : i32
    %15 = arith.cmpi ne, %14, %c0_i32_6 : i32
    scf.if %15 {
      %c0_i32_41 = arith.constant 0 : i32
      %c0_i32_42 = arith.constant 0 : i32
      %c0_i32_43 = arith.constant 0 : i32
      %96 = tpu.memref_slice %arg2[%arg0, %c0_i32_41, %c0_i32_42, %c0_i32_43] : memref<2x8x8x128xbf16, #tpu.memory_space<any>> -> memref<1x8x8x128xbf16, #tpu.memory_space<any>>
      %97 = tpu.memref_squeeze %96 : memref<1x8x8x128xbf16, #tpu.memory_space<any>> -> memref<8x8x128xbf16, #tpu.memory_space<any>>
      %c1_i32_44 = arith.constant 1 : i32
      %c0_i32_45 = arith.constant 0 : i32
      %c0_i32_46 = arith.constant 0 : i32
      %98 = tpu.memref_slice %arg6[%9, %c1_i32_44, %c0_i32_45, %c0_i32_46] : memref<2x10x8x128xbf16, #tpu.memory_space<vmem>> -> memref<1x8x8x128xbf16, #tpu.memory_space<vmem>>
      %99 = tpu.memref_squeeze %98 : memref<1x8x8x128xbf16, #tpu.memory_space<vmem>> -> memref<8x8x128xbf16, #tpu.memory_space<vmem>>
      %100 = tpu.memref_slice %arg7[%9] : memref<2x!tpu.dma_semaphore, #tpu.memory_space<semaphore_mem>> -> memref<1x!tpu.dma_semaphore, #tpu.memory_space<semaphore_mem>>
      %101 = tpu.memref_squeeze %100 : memref<1x!tpu.dma_semaphore, #tpu.memory_space<semaphore_mem>> -> memref<!tpu.dma_semaphore, #tpu.memory_space<semaphore_mem>>
      tpu.wait_dma2 semaphore(%101 : memref<!tpu.dma_semaphore, #tpu.memory_space<semaphore_mem>>) src(%97 : memref<8x8x128xbf16, #tpu.memory_space<any>>) dst(%99 : memref<8x8x128xbf16, #tpu.memory_space<vmem>>)
    } else {
    }
    %16 = arith.index_cast %9 : i32 to index
    %c0 = arith.constant 0 : index
    %c0_7 = arith.constant 0 : index
    %c0_8 = arith.constant 0 : index
    %17 = vector.load %arg6[%16, %c0, %c0_7, %c0_8] : memref<2x10x8x128xbf16, #tpu.memory_space<vmem>>, vector<1x10x8x128xbf16>
    %18 = vector.shape_cast %17 : vector<1x10x8x128xbf16> to vector<10x8x128xbf16>
    %19 = tpu.iota {dimensions = array<i32: 0>} : vector<10x1x1xi32>
    %c0_i32_9 = arith.constant 0 : i32
    %20 = arith.cmpi eq, %arg1, %c0_i32_9 : i32
    %c0_i32_10 = arith.constant 0 : i32
    %21 = vector.broadcast %c0_i32_10 : i32 to vector<10x1x1xi32>
    %22 = arith.cmpi eq, %19, %21 : vector<10x1x1xi32>
    %23 = vector.broadcast %20 : i1 to vector<10x1x1xi1>
    %24 = arith.andi %23, %22 : vector<10x1x1xi1>
    %c0_i32_11 = arith.constant 0 : i32
    %25 = arith.cmpi eq, %arg1, %c0_i32_11 : i32
    %c9_i32 = arith.constant 9 : i32
    %26 = vector.broadcast %c9_i32 : i32 to vector<10x1x1xi32>
    %27 = arith.cmpi sge, %19, %26 : vector<10x1x1xi32>
    %28 = vector.broadcast %25 : i1 to vector<10x1x1xi1>
    %29 = arith.andi %28, %27 : vector<10x1x1xi1>
    %30 = arith.ori %24, %29 : vector<10x1x1xi1>
    %cst = arith.constant 0.000000e+00 : bf16
    %31 = vector.broadcast %cst : bf16 to vector<10x8x128xbf16>
    %32 = vector.shape_cast %30 : vector<10x1x1xi1> to vector<10x1x1xi1>
    %33 = vector.broadcast %32 : vector<10x1x1xi1> to vector<10x8x128xi1>
    %34 = arith.select %33, %31, %18 : vector<10x8x128xi1>, vector<10x8x128xbf16>
    %cst_12 = arith.constant 0.000000e+00 : bf16
    %35 = vector.broadcast %cst_12 : bf16 to vector<10x1x128xbf16>
    %36 = tpu.concatenate %35, %34, %35 in 1 : vector<10x1x128xbf16>, vector<10x8x128xbf16>, vector<10x1x128xbf16> -> vector<10x10x128xbf16>
    %cst_13 = arith.constant 0.000000e+00 : f32
    %37 = vector.broadcast %cst_13 : f32 to vector<64x128xf32>
    %38 = vector.extract_strided_slice %36 {offsets = [0, 0, 0], sizes = [8, 8, 128], strides = [1, 1, 1]} : vector<10x10x128xbf16> to vector<8x8x128xbf16>
    %39 = vector.shape_cast %38 : vector<8x8x128xbf16> to vector<64x128xbf16>
    %c0_14 = arith.constant 0 : index
    %c0_15 = arith.constant 0 : index
    %40 = vector.load %arg3[%c0_14, %c0_15] : memref<1152x128xbf16, #tpu.memory_space<vmem>>, vector<128x128xbf16>
    %cst_16 = arith.constant dense<0.000000e+00> : vector<64x128xf32>
    %41 = tpu.matmul %39, %40, %cst_16 {dimension_numbers = #tpu.dot_dimension_numbers<[1], [0], [0], [1], [0, 0, 1, 1], [], []>} : vector<64x128xbf16>, vector<128x128xbf16>, vector<64x128xf32> -> vector<64x128xf32>
    %42 = arith.addf %37, %41 : vector<64x128xf32>
    %43 = vector.extract_strided_slice %36 {offsets = [0, 1, 0], sizes = [8, 8, 128], strides = [1, 1, 1]} : vector<10x10x128xbf16> to vector<8x8x128xbf16>
    %44 = vector.shape_cast %43 : vector<8x8x128xbf16> to vector<64x128xbf16>
    %c128 = arith.constant 128 : index
    %c0_17 = arith.constant 0 : index
    %45 = vector.load %arg3[%c128, %c0_17] : memref<1152x128xbf16, #tpu.memory_space<vmem>>, vector<128x128xbf16>
    %cst_18 = arith.constant dense<0.000000e+00> : vector<64x128xf32>
    %46 = tpu.matmul %44, %45, %cst_18 {dimension_numbers = #tpu.dot_dimension_numbers<[1], [0], [0], [1], [0, 0, 1, 1], [], []>} : vector<64x128xbf16>, vector<128x128xbf16>, vector<64x128xf32> -> vector<64x128xf32>
    %47 = arith.addf %42, %46 : vector<64x128xf32>
    %48 = vector.extract_strided_slice %36 {offsets = [0, 2, 0], sizes = [8, 8, 128], strides = [1, 1, 1]} : vector<10x10x128xbf16> to vector<8x8x128xbf16>
    %49 = vector.shape_cast %48 : vector<8x8x128xbf16> to vector<64x128xbf16>
    %c256 = arith.constant 256 : index
    %c0_19 = arith.constant 0 : index
    %50 = vector.load %arg3[%c256, %c0_19] : memref<1152x128xbf16, #tpu.memory_space<vmem>>, vector<128x128xbf16>
    %cst_20 = arith.constant dense<0.000000e+00> : vector<64x128xf32>
    %51 = tpu.matmul %49, %50, %cst_20 {dimension_numbers = #tpu.dot_dimension_numbers<[1], [0], [0], [1], [0, 0, 1, 1], [], []>} : vector<64x128xbf16>, vector<128x128xbf16>, vector<64x128xf32> -> vector<64x128xf32>
    %52 = arith.addf %47, %51 : vector<64x128xf32>
    %53 = vector.extract_strided_slice %36 {offsets = [1, 0, 0], sizes = [8, 8, 128], strides = [1, 1, 1]} : vector<10x10x128xbf16> to vector<8x8x128xbf16>
    %54 = vector.shape_cast %53 : vector<8x8x128xbf16> to vector<64x128xbf16>
    %c384 = arith.constant 384 : index
    %c0_21 = arith.constant 0 : index
    %55 = vector.load %arg3[%c384, %c0_21] : memref<1152x128xbf16, #tpu.memory_space<vmem>>, vector<128x128xbf16>
    %cst_22 = arith.constant dense<0.000000e+00> : vector<64x128xf32>
    %56 = tpu.matmul %54, %55, %cst_22 {dimension_numbers = #tpu.dot_dimension_numbers<[1], [0], [0], [1], [0, 0, 1, 1], [], []>} : vector<64x128xbf16>, vector<128x128xbf16>, vector<64x128xf32> -> vector<64x128xf32>
    %57 = arith.addf %52, %56 : vector<64x128xf32>
    %58 = vector.extract_strided_slice %36 {offsets = [1, 1, 0], sizes = [8, 8, 128], strides = [1, 1, 1]} : vector<10x10x128xbf16> to vector<8x8x128xbf16>
    %59 = vector.shape_cast %58 : vector<8x8x128xbf16> to vector<64x128xbf16>
    %c512 = arith.constant 512 : index
    %c0_23 = arith.constant 0 : index
    %60 = vector.load %arg3[%c512, %c0_23] : memref<1152x128xbf16, #tpu.memory_space<vmem>>, vector<128x128xbf16>
    %cst_24 = arith.constant dense<0.000000e+00> : vector<64x128xf32>
    %61 = tpu.matmul %59, %60, %cst_24 {dimension_numbers = #tpu.dot_dimension_numbers<[1], [0], [0], [1], [0, 0, 1, 1], [], []>} : vector<64x128xbf16>, vector<128x128xbf16>, vector<64x128xf32> -> vector<64x128xf32>
    %62 = arith.addf %57, %61 : vector<64x128xf32>
    %63 = vector.extract_strided_slice %36 {offsets = [1, 2, 0], sizes = [8, 8, 128], strides = [1, 1, 1]} : vector<10x10x128xbf16> to vector<8x8x128xbf16>
    %64 = vector.shape_cast %63 : vector<8x8x128xbf16> to vector<64x128xbf16>
    %c640 = arith.constant 640 : index
    %c0_25 = arith.constant 0 : index
    %65 = vector.load %arg3[%c640, %c0_25] : memref<1152x128xbf16, #tpu.memory_space<vmem>>, vector<128x128xbf16>
    %cst_26 = arith.constant dense<0.000000e+00> : vector<64x128xf32>
    %66 = tpu.matmul %64, %65, %cst_26 {dimension_numbers = #tpu.dot_dimension_numbers<[1], [0], [0], [1], [0, 0, 1, 1], [], []>} : vector<64x128xbf16>, vector<128x128xbf16>, vector<64x128xf32> -> vector<64x128xf32>
    %67 = arith.addf %62, %66 : vector<64x128xf32>
    %68 = vector.extract_strided_slice %36 {offsets = [2, 0, 0], sizes = [8, 8, 128], strides = [1, 1, 1]} : vector<10x10x128xbf16> to vector<8x8x128xbf16>
    %69 = vector.shape_cast %68 : vector<8x8x128xbf16> to vector<64x128xbf16>
    %c768 = arith.constant 768 : index
    %c0_27 = arith.constant 0 : index
    %70 = vector.load %arg3[%c768, %c0_27] : memref<1152x128xbf16, #tpu.memory_space<vmem>>, vector<128x128xbf16>
    %cst_28 = arith.constant dense<0.000000e+00> : vector<64x128xf32>
    %71 = tpu.matmul %69, %70, %cst_28 {dimension_numbers = #tpu.dot_dimension_numbers<[1], [0], [0], [1], [0, 0, 1, 1], [], []>} : vector<64x128xbf16>, vector<128x128xbf16>, vector<64x128xf32> -> vector<64x128xf32>
    %72 = arith.addf %67, %71 : vector<64x128xf32>
    %73 = vector.extract_strided_slice %36 {offsets = [2, 1, 0], sizes = [8, 8, 128], strides = [1, 1, 1]} : vector<10x10x128xbf16> to vector<8x8x128xbf16>
    %74 = vector.shape_cast %73 : vector<8x8x128xbf16> to vector<64x128xbf16>
    %c896 = arith.constant 896 : index
    %c0_29 = arith.constant 0 : index
    %75 = vector.load %arg3[%c896, %c0_29] : memref<1152x128xbf16, #tpu.memory_space<vmem>>, vector<128x128xbf16>
    %cst_30 = arith.constant dense<0.000000e+00> : vector<64x128xf32>
    %76 = tpu.matmul %74, %75, %cst_30 {dimension_numbers = #tpu.dot_dimension_numbers<[1], [0], [0], [1], [0, 0, 1, 1], [], []>} : vector<64x128xbf16>, vector<128x128xbf16>, vector<64x128xf32> -> vector<64x128xf32>
    %77 = arith.addf %72, %76 : vector<64x128xf32>
    %78 = vector.extract_strided_slice %36 {offsets = [2, 2, 0], sizes = [8, 8, 128], strides = [1, 1, 1]} : vector<10x10x128xbf16> to vector<8x8x128xbf16>
    %79 = vector.shape_cast %78 : vector<8x8x128xbf16> to vector<64x128xbf16>
    %c1024 = arith.constant 1024 : index
    %c0_31 = arith.constant 0 : index
    %80 = vector.load %arg3[%c1024, %c0_31] : memref<1152x128xbf16, #tpu.memory_space<vmem>>, vector<128x128xbf16>
    %cst_32 = arith.constant dense<0.000000e+00> : vector<64x128xf32>
    %81 = tpu.matmul %79, %80, %cst_32 {dimension_numbers = #tpu.dot_dimension_numbers<[1], [0], [0], [1], [0, 0, 1, 1], [], []>} : vector<64x128xbf16>, vector<128x128xbf16>, vector<64x128xf32> -> vector<64x128xf32>
    %82 = arith.addf %77, %81 : vector<64x128xf32>
    %c0_33 = arith.constant 0 : index
    %c0_34 = arith.constant 0 : index
    %83 = vector.load %arg4[%c0_33, %c0_34] : memref<1x128xf32, #tpu.memory_space<vmem>>, vector<1x128xf32>
    %84 = vector.broadcast %83 : vector<1x128xf32> to vector<64x128xf32>
    %85 = arith.addf %82, %84 : vector<64x128xf32>
    %cst_35 = arith.constant 0.000000e+00 : f32
    %86 = vector.broadcast %cst_35 : f32 to vector<64x128xf32>
    %87 = arith.cmpf oge, %85, %86 : vector<64x128xf32>
    %cst_36 = arith.constant 0.00999999977 : f32
    %88 = vector.broadcast %cst_36 : f32 to vector<64x128xf32>
    %89 = arith.mulf %88, %85 : vector<64x128xf32>
    %90 = arith.select %87, %85, %89 : vector<64x128xi1>, vector<64x128xf32>
    %91 = vector.shape_cast %90 : vector<64x128xf32> to vector<8x8x128xf32>
    %92 = arith.truncf %91 : vector<8x8x128xf32> to vector<8x8x128xbf16>
    %c0_37 = arith.constant 0 : index
    %c0_38 = arith.constant 0 : index
    %c0_39 = arith.constant 0 : index
    %c0_40 = arith.constant 0 : index
    %93 = vector.load %arg5[%c0_37, %c0_38, %c0_39, %c0_40] : memref<1x8x8x128xbf16, #tpu.memory_space<vmem>>, vector<1x8x8x128xbf16>
    %94 = vector.shape_cast %93 : vector<1x8x8x128xbf16> to vector<8x8x128xbf16>
    %95 = vector.shape_cast %92 : vector<8x8x128xbf16> to vector<1x8x8x128xbf16>
    tpu.vector_store %arg5[%c0_37, %c0_38, %c0_39, %c0_40], %95 {strides = array<i32>} : memref<1x8x8x128xbf16, #tpu.memory_space<vmem>>, vector<1x8x8x128xbf16>,
    return
  }
  func.func @transform_1(%arg0: i32, %arg1: i32) -> (i32, i32) {
    %c0_i32 = arith.constant 0 : i32
    %c0_i32_0 = arith.constant 0 : i32
    %c0_i32_1 = arith.constant 0 : i32
    return %c0_i32, %c0_i32_0 : i32, i32
  }
  func.func @transform_2(%arg0: i32, %arg1: i32) -> (i32, i32) {
    %c0_i32 = arith.constant 0 : i32
    %c0_i32_0 = arith.constant 0 : i32
    %c0_i32_1 = arith.constant 0 : i32
    return %c0_i32, %c0_i32_0 : i32, i32
  }
  func.func @transform_3(%arg0: i32, %arg1: i32) -> (i32, i32, i32, i32) {
    %c0_i32 = arith.constant 0 : i32
    %c0_i32_0 = arith.constant 0 : i32
    %c0_i32_1 = arith.constant 0 : i32
    return %arg0, %arg1, %c0_i32, %c0_i32_0 : i32, i32, i32, i32
  }
}

module attributes {stable_mosaic.version = 11 : i64} {
  func.func @_conv3x3_kernel(%arg0: i32, %arg1: i32, %arg2: memref<2x8x8x128xbf16, #tpu.memory_space<any>>, %arg3: memref<1152x128xbf16, #tpu.memory_space<vmem>>, %arg4: memref<1x128xf32, #tpu.memory_space<vmem>>, %arg5: memref<1x8x8x128xbf16, #tpu.memory_space<vmem>>, %arg6: memref<2x10x8x128xbf16, #tpu.memory_space<vmem>>, %arg7: memref<2x!tpu.dma_semaphore, #tpu.memory_space<semaphore_mem>>) attributes {dimension_semantics = [#tpu.dimension_semantics<parallel>, #tpu.dimension_semantics<arbitrary>], iteration_bounds = array<i64: 2, 1>, scalar_prefetch = 0 : i64, scratch_operands = 2 : i64, tpu.core_type = #tpu.core_type<tc>, window_params = [{}, {pipeline_mode = #tpu.pipeline_mode<synchronous>, transform_indices = @transform_1, window_bounds = array<i64: 1152, 128>}, {pipeline_mode = #tpu.pipeline_mode<synchronous>, transform_indices = @transform_2, window_bounds = array<i64: 1, 128>}, {transform_indices = @transform_3, window_bounds = array<i64: 1, 8, 8, 128>}]} {
    %c2_i32 = arith.constant 2 : i32
    %c0_i32 = arith.constant 0 : i32
    %0 = arith.cmpi eq, %c2_i32, %c0_i32 : i32
    %c1_i32 = arith.constant 1 : i32
    %1 = arith.select %0, %c1_i32, %c2_i32 : i32
    %2 = arith.remsi %arg1, %1 : i32
    %c0_i32_0 = arith.constant 0 : i32
    %3 = arith.cmpi ne, %2, %c0_i32_0 : i32
    %c0_i32_1 = arith.constant 0 : i32
    %4 = arith.cmpi slt, %2, %c0_i32_1 : i32
    %c0_i32_2 = arith.constant 0 : i32
    %5 = arith.cmpi slt, %1, %c0_i32_2 : i32
    %6 = arith.xori %4, %5 : i1
    %7 = arith.andi %6, %3 : i1
    %8 = arith.addi %2, %1 : i32
    %9 = arith.select %7, %8, %2 : i32
    %c0_i32_3 = arith.constant 0 : i32
    %10 = arith.cmpi eq, %arg1, %c0_i32_3 : i32
    %11 = arith.extui %10 : i1 to i32
    %c0_i32_4 = arith.constant 0 : i32
    %12 = arith.cmpi ne, %11, %c0_i32_4 : i32
    scf.if %12 {
      %c0_i32_39 = arith.constant 0 : i32
      %91 = arith.cmpi eq, %arg1, %c0_i32_39 : i32
      %92 = arith.extui %91 : i1 to i32
      %c0_i32_40 = arith.constant 0 : i32
      %93 = arith.cmpi ne, %92, %c0_i32_40 : i32
      scf.if %93 {
        %c0_i32_41 = arith.constant 0 : i32
        %c0_i32_42 = arith.constant 0 : i32
        %c0_i32_43 = arith.constant 0 : i32
        %94 = tpu.memref_slice %arg2[%arg0, %c0_i32_41, %c0_i32_42, %c0_i32_43] : memref<2x8x8x128xbf16, #tpu.memory_space<any>> -> memref<1x8x8x128xbf16, #tpu.memory_space<any>>
        %95 = tpu.memref_squeeze %94 : memref<1x8x8x128xbf16, #tpu.memory_space<any>> -> memref<8x8x128xbf16, #tpu.memory_space<any>>
        %c1_i32_44 = arith.constant 1 : i32
        %c0_i32_45 = arith.constant 0 : i32
        %c0_i32_46 = arith.constant 0 : i32
        %96 = tpu.memref_slice %arg6[%9, %c1_i32_44, %c0_i32_45, %c0_i32_46] : memref<2x10x8x128xbf16, #tpu.memory_space<vmem>> -> memref<1x8x8x128xbf16, #tpu.memory_space<vmem>>
        %97 = tpu.memref_squeeze %96 : memref<1x8x8x128xbf16, #tpu.memory_space<vmem>> -> memref<8x8x128xbf16, #tpu.memory_space<vmem>>
        %98 = tpu.memref_slice %arg7[%9] : memref<2x!tpu.dma_semaphore, #tpu.memory_space<semaphore_mem>> -> memref<1x!tpu.dma_semaphore, #tpu.memory_space<semaphore_mem>>
        %99 = tpu.memref_squeeze %98 : memref<1x!tpu.dma_semaphore, #tpu.memory_space<semaphore_mem>> -> memref<!tpu.dma_semaphore, #tpu.memory_space<semaphore_mem>>
        tpu.enqueue_dma source(%95 : memref<8x8x128xbf16, #tpu.memory_space<any>>) target(%97 : memref<8x8x128xbf16, #tpu.memory_space<vmem>>) target_semaphore(%99 : memref<!tpu.dma_semaphore, #tpu.memory_space<semaphore_mem>>)
      } else {
      }
    } else {
    }
    %c0_i32_5 = arith.constant 0 : i32
    %13 = arith.cmpi eq, %arg1, %c0_i32_5 : i32
    %14 = arith.extui %13 : i1 to i32
    %c0_i32_6 = arith.constant 0 : i32
    %15 = arith.cmpi ne, %14, %c0_i32_6 : i32
    scf.if %15 {
      %c0_i32_39 = arith.constant 0 : i32
      %c0_i32_40 = arith.constant 0 : i32
      %c0_i32_41 = arith.constant 0 : i32
      %91 = tpu.memref_slice %arg2[%arg0, %c0_i32_39, %c0_i32_40, %c0_i32_41] : memref<2x8x8x128xbf16, #tpu.memory_space<any>> -> memref<1x8x8x128xbf16, #tpu.memory_space<any>>
      %92 = tpu.memref_squeeze %91 : memref<1x8x8x128xbf16, #tpu.memory_space<any>> -> memref<8x8x128xbf16, #tpu.memory_space<any>>
      %c1_i32_42 = arith.constant 1 : i32
      %c0_i32_43 = arith.constant 0 : i32
      %c0_i32_44 = arith.constant 0 : i32
      %93 = tpu.memref_slice %arg6[%9, %c1_i32_42, %c0_i32_43, %c0_i32_44] : memref<2x10x8x128xbf16, #tpu.memory_space<vmem>> -> memref<1x8x8x128xbf16, #tpu.memory_space<vmem>>
      %94 = tpu.memref_squeeze %93 : memref<1x8x8x128xbf16, #tpu.memory_space<vmem>> -> memref<8x8x128xbf16, #tpu.memory_space<vmem>>
      %95 = tpu.memref_slice %arg7[%9] : memref<2x!tpu.dma_semaphore, #tpu.memory_space<semaphore_mem>> -> memref<1x!tpu.dma_semaphore, #tpu.memory_space<semaphore_mem>>
      %96 = tpu.memref_squeeze %95 : memref<1x!tpu.dma_semaphore, #tpu.memory_space<semaphore_mem>> -> memref<!tpu.dma_semaphore, #tpu.memory_space<semaphore_mem>>
      tpu.wait_dma2 semaphore(%96 : memref<!tpu.dma_semaphore, #tpu.memory_space<semaphore_mem>>) src(%92 : memref<8x8x128xbf16, #tpu.memory_space<any>>) dst(%94 : memref<8x8x128xbf16, #tpu.memory_space<vmem>>)
    } else {
    }
    %16 = arith.index_cast %9 : i32 to index
    %c0 = arith.constant 0 : index
    %c0_7 = arith.constant 0 : index
    %c0_8 = arith.constant 0 : index
    %17 = vector.load %arg6[%16, %c0, %c0_7, %c0_8] : memref<2x10x8x128xbf16, #tpu.memory_space<vmem>>, vector<1x10x8x128xbf16>
    %18 = vector.shape_cast %17 : vector<1x10x8x128xbf16> to vector<10x8x128xbf16>
    %19 = tpu.iota {dimensions = array<i32: 0>} : vector<10x1x1xi32>
    %c0_i32_9 = arith.constant 0 : i32
    %20 = arith.cmpi eq, %arg1, %c0_i32_9 : i32
    %c0_i32_10 = arith.constant 0 : i32
    %21 = vector.broadcast %c0_i32_10 : i32 to vector<10x1x1xi32>
    %22 = arith.cmpi eq, %19, %21 : vector<10x1x1xi32>
    %23 = vector.broadcast %20 : i1 to vector<10x1x1xi1>
    %24 = arith.andi %23, %22 : vector<10x1x1xi1>
    %c0_i32_11 = arith.constant 0 : i32
    %25 = arith.cmpi eq, %arg1, %c0_i32_11 : i32
    %c9_i32 = arith.constant 9 : i32
    %26 = vector.broadcast %c9_i32 : i32 to vector<10x1x1xi32>
    %27 = arith.cmpi sge, %19, %26 : vector<10x1x1xi32>
    %28 = vector.broadcast %25 : i1 to vector<10x1x1xi1>
    %29 = arith.andi %28, %27 : vector<10x1x1xi1>
    %30 = arith.ori %24, %29 : vector<10x1x1xi1>
    %cst = arith.constant 0.000000e+00 : bf16
    %31 = vector.broadcast %cst : bf16 to vector<10x8x128xbf16>
    %32 = vector.shape_cast %30 : vector<10x1x1xi1> to vector<10x1x1xi1>
    %33 = vector.broadcast %32 : vector<10x1x1xi1> to vector<10x8x128xi1>
    %34 = arith.select %33, %31, %18 : vector<10x8x128xi1>, vector<10x8x128xbf16>
    %cst_12 = arith.constant 0.000000e+00 : bf16
    %35 = vector.broadcast %cst_12 : bf16 to vector<10x1x128xbf16>
    %36 = tpu.concatenate %35, %34, %35 in 1 : vector<10x1x128xbf16>, vector<10x8x128xbf16>, vector<10x1x128xbf16> -> vector<10x10x128xbf16>
    %cst_13 = arith.constant 0.000000e+00 : f32
    %37 = vector.broadcast %cst_13 : f32 to vector<64x128xf32>
    %38 = vector.extract_strided_slice %36 {offsets = [0, 0, 0], sizes = [8, 8, 128], strides = [1, 1, 1]} : vector<10x10x128xbf16> to vector<8x8x128xbf16>
    %39 = vector.shape_cast %38 : vector<8x8x128xbf16> to vector<64x128xbf16>
    %c0_14 = arith.constant 0 : index
    %c0_15 = arith.constant 0 : index
    %40 = vector.load %arg3[%c0_14, %c0_15] : memref<1152x128xbf16, #tpu.memory_space<vmem>>, vector<128x128xbf16>
    %cst_16 = arith.constant dense<0.000000e+00> : vector<64x128xf32>
    %41 = tpu.matmul %39, %40, %cst_16 {dimension_numbers = #tpu.dot_dimension_numbers<[1], [0], [0], [1], [0, 0, 1, 1], [], []>} : vector<64x128xbf16>, vector<128x128xbf16>, vector<64x128xf32> -> vector<64x128xf32>
    %42 = arith.addf %37, %41 : vector<64x128xf32>
    %43 = vector.extract_strided_slice %36 {offsets = [0, 1, 0], sizes = [8, 8, 128], strides = [1, 1, 1]} : vector<10x10x128xbf16> to vector<8x8x128xbf16>
    %44 = vector.shape_cast %43 : vector<8x8x128xbf16> to vector<64x128xbf16>
    %c128 = arith.constant 128 : index
    %c0_17 = arith.constant 0 : index
    %45 = vector.load %arg3[%c128, %c0_17] : memref<1152x128xbf16, #tpu.memory_space<vmem>>, vector<128x128xbf16>
    %cst_18 = arith.constant dense<0.000000e+00> : vector<64x128xf32>
    %46 = tpu.matmul %44, %45, %cst_18 {dimension_numbers = #tpu.dot_dimension_numbers<[1], [0], [0], [1], [0, 0, 1, 1], [], []>} : vector<64x128xbf16>, vector<128x128xbf16>, vector<64x128xf32> -> vector<64x128xf32>
    %47 = arith.addf %42, %46 : vector<64x128xf32>
    %48 = vector.extract_strided_slice %36 {offsets = [0, 2, 0], sizes = [8, 8, 128], strides = [1, 1, 1]} : vector<10x10x128xbf16> to vector<8x8x128xbf16>
    %49 = vector.shape_cast %48 : vector<8x8x128xbf16> to vector<64x128xbf16>
    %c256 = arith.constant 256 : index
    %c0_19 = arith.constant 0 : index
    %50 = vector.load %arg3[%c256, %c0_19] : memref<1152x128xbf16, #tpu.memory_space<vmem>>, vector<128x128xbf16>
    %cst_20 = arith.constant dense<0.000000e+00> : vector<64x128xf32>
    %51 = tpu.matmul %49, %50, %cst_20 {dimension_numbers = #tpu.dot_dimension_numbers<[1], [0], [0], [1], [0, 0, 1, 1], [], []>} : vector<64x128xbf16>, vector<128x128xbf16>, vector<64x128xf32> -> vector<64x128xf32>
    %52 = arith.addf %47, %51 : vector<64x128xf32>
    %53 = vector.extract_strided_slice %36 {offsets = [1, 0, 0], sizes = [8, 8, 128], strides = [1, 1, 1]} : vector<10x10x128xbf16> to vector<8x8x128xbf16>
    %54 = vector.shape_cast %53 : vector<8x8x128xbf16> to vector<64x128xbf16>
    %c384 = arith.constant 384 : index
    %c0_21 = arith.constant 0 : index
    %55 = vector.load %arg3[%c384, %c0_21] : memref<1152x128xbf16, #tpu.memory_space<vmem>>, vector<128x128xbf16>
    %cst_22 = arith.constant dense<0.000000e+00> : vector<64x128xf32>
    %56 = tpu.matmul %54, %55, %cst_22 {dimension_numbers = #tpu.dot_dimension_numbers<[1], [0], [0], [1], [0, 0, 1, 1], [], []>} : vector<64x128xbf16>, vector<128x128xbf16>, vector<64x128xf32> -> vector<64x128xf32>
    %57 = arith.addf %52, %56 : vector<64x128xf32>
    %58 = vector.extract_strided_slice %36 {offsets = [1, 1, 0], sizes = [8, 8, 128], strides = [1, 1, 1]} : vector<10x10x128xbf16> to vector<8x8x128xbf16>
    %59 = vector.shape_cast %58 : vector<8x8x128xbf16> to vector<64x128xbf16>
    %c512 = arith.constant 512 : index
    %c0_23 = arith.constant 0 : index
    %60 = vector.load %arg3[%c512, %c0_23] : memref<1152x128xbf16, #tpu.memory_space<vmem>>, vector<128x128xbf16>
    %cst_24 = arith.constant dense<0.000000e+00> : vector<64x128xf32>
    %61 = tpu.matmul %59, %60, %cst_24 {dimension_numbers = #tpu.dot_dimension_numbers<[1], [0], [0], [1], [0, 0, 1, 1], [], []>} : vector<64x128xbf16>, vector<128x128xbf16>, vector<64x128xf32> -> vector<64x128xf32>
    %62 = arith.addf %57, %61 : vector<64x128xf32>
    %63 = vector.extract_strided_slice %36 {offsets = [1, 2, 0], sizes = [8, 8, 128], strides = [1, 1, 1]} : vector<10x10x128xbf16> to vector<8x8x128xbf16>
    %64 = vector.shape_cast %63 : vector<8x8x128xbf16> to vector<64x128xbf16>
    %c640 = arith.constant 640 : index
    %c0_25 = arith.constant 0 : index
    %65 = vector.load %arg3[%c640, %c0_25] : memref<1152x128xbf16, #tpu.memory_space<vmem>>, vector<128x128xbf16>
    %cst_26 = arith.constant dense<0.000000e+00> : vector<64x128xf32>
    %66 = tpu.matmul %64, %65, %cst_26 {dimension_numbers = #tpu.dot_dimension_numbers<[1], [0], [0], [1], [0, 0, 1, 1], [], []>} : vector<64x128xbf16>, vector<128x128xbf16>, vector<64x128xf32> -> vector<64x128xf32>
    %67 = arith.addf %62, %66 : vector<64x128xf32>
    %68 = vector.extract_strided_slice %36 {offsets = [2, 0, 0], sizes = [8, 8, 128], strides = [1, 1, 1]} : vector<10x10x128xbf16> to vector<8x8x128xbf16>
    %69 = vector.shape_cast %68 : vector<8x8x128xbf16> to vector<64x128xbf16>
    %c768 = arith.constant 768 : index
    %c0_27 = arith.constant 0 : index
    %70 = vector.load %arg3[%c768, %c0_27] : memref<1152x128xbf16, #tpu.memory_space<vmem>>, vector<128x128xbf16>
    %cst_28 = arith.constant dense<0.000000e+00> : vector<64x128xf32>
    %71 = tpu.matmul %69, %70, %cst_28 {dimension_numbers = #tpu.dot_dimension_numbers<[1], [0], [0], [1], [0, 0, 1, 1], [], []>} : vector<64x128xbf16>, vector<128x128xbf16>, vector<64x128xf32> -> vector<64x128xf32>
    %72 = arith.addf %67, %71 : vector<64x128xf32>
    %73 = vector.extract_strided_slice %36 {offsets = [2, 1, 0], sizes = [8, 8, 128], strides = [1, 1, 1]} : vector<10x10x128xbf16> to vector<8x8x128xbf16>
    %74 = vector.shape_cast %73 : vector<8x8x128xbf16> to vector<64x128xbf16>
    %c896 = arith.constant 896 : index
    %c0_29 = arith.constant 0 : index
    %75 = vector.load %arg3[%c896, %c0_29] : memref<1152x128xbf16, #tpu.memory_space<vmem>>, vector<128x128xbf16>
    %cst_30 = arith.constant dense<0.000000e+00> : vector<64x128xf32>
    %76 = tpu.matmul %74, %75, %cst_30 {dimension_numbers = #tpu.dot_dimension_numbers<[1], [0], [0], [1], [0, 0, 1, 1], [], []>} : vector<64x128xbf16>, vector<128x128xbf16>, vector<64x128xf32> -> vector<64x128xf32>
    %77 = arith.addf %72, %76 : vector<64x128xf32>
    %78 = vector.extract_strided_slice %36 {offsets = [2, 2, 0], sizes = [8, 8, 128], strides = [1, 1, 1]} : vector<10x10x128xbf16> to vector<8x8x128xbf16>
    %79 = vector.shape_cast %78 : vector<8x8x128xbf16> to vector<64x128xbf16>
    %c1024 = arith.constant 1024 : index
    %c0_31 = arith.constant 0 : index
    %80 = vector.load %arg3[%c1024, %c0_31] : memref<1152x128xbf16, #tpu.memory_space<vmem>>, vector<128x128xbf16>
    %cst_32 = arith.constant dense<0.000000e+00> : vector<64x128xf32>
    %81 = tpu.matmul %79, %80, %cst_32 {dimension_numbers = #tpu.dot_dimension_numbers<[1], [0], [0], [1], [0, 0, 1, 1], [], []>} : vector<64x128xbf16>, vector<128x128xbf16>, vector<64x128xf32> -> vector<64x128xf32>
    %82 = arith.addf %77, %81 : vector<64x128xf32>
    %c0_33 = arith.constant 0 : index
    %c0_34 = arith.constant 0 : index
    %83 = vector.load %arg4[%c0_33, %c0_34] : memref<1x128xf32, #tpu.memory_space<vmem>>, vector<1x128xf32>
    %84 = vector.broadcast %83 : vector<1x128xf32> to vector<64x128xf32>
    %85 = arith.addf %82, %84 : vector<64x128xf32>
    %86 = vector.shape_cast %85 : vector<64x128xf32> to vector<8x8x128xf32>
    %87 = arith.truncf %86 : vector<8x8x128xf32> to vector<8x8x128xbf16>
    %c0_35 = arith.constant 0 : index
    %c0_36 = arith.constant 0 : index
    %c0_37 = arith.constant 0 : index
    %c0_38 = arith.constant 0 : index
    %88 = vector.load %arg5[%c0_35, %c0_36, %c0_37, %c0_38] : memref<1x8x8x128xbf16, #tpu.memory_space<vmem>>, vector<1x8x8x128xbf16>
    %89 = vector.shape_cast %88 : vector<1x8x8x128xbf16> to vector<8x8x128xbf16>
    %90 = vector.shape_cast %87 : vector<8x8x128xbf16> to vector<1x8x8x128xbf16>
    tpu.vector_store %arg5[%c0_35, %c0_36, %c0_37, %c0_38], %90 {strides = array<i32>} : memref<1x8x8x128xbf16, #tpu.memory_space<vmem>>, vector<1x8x8x128xbf16>,
    return
  }
  func.func @transform_1(%arg0: i32, %arg1: i32) -> (i32, i32) {
    %c0_i32 = arith.constant 0 : i32
    %c0_i32_0 = arith.constant 0 : i32
    %c0_i32_1 = arith.constant 0 : i32
    return %c0_i32, %c0_i32_0 : i32, i32
  }
  func.func @transform_2(%arg0: i32, %arg1: i32) -> (i32, i32) {
    %c0_i32 = arith.constant 0 : i32
    %c0_i32_0 = arith.constant 0 : i32
    %c0_i32_1 = arith.constant 0 : i32
    return %c0_i32, %c0_i32_0 : i32, i32
  }
  func.func @transform_3(%arg0: i32, %arg1: i32) -> (i32, i32, i32, i32) {
    %c0_i32 = arith.constant 0 : i32
    %c0_i32_0 = arith.constant 0 : i32
    %c0_i32_1 = arith.constant 0 : i32
    return %arg0, %arg1, %c0_i32, %c0_i32_0 : i32, i32, i32, i32
  }
}

module attributes {stable_mosaic.version = 11 : i64} {
  func.func @_conv3x3_gate_kernel(%arg0: i32, %arg1: i32, %arg2: memref<2x16x16x128xbf16, #tpu.memory_space<any>>, %arg3: memref<1152x128xbf16, #tpu.memory_space<vmem>>, %arg4: memref<1x128xf32, #tpu.memory_space<vmem>>, %arg5: memref<1x16x16x128xbf16, #tpu.memory_space<vmem>>, %arg6: memref<1x16x16x128xf32, #tpu.memory_space<vmem>>, %arg7: memref<2x18x16x128xbf16, #tpu.memory_space<vmem>>, %arg8: memref<2x!tpu.dma_semaphore, #tpu.memory_space<semaphore_mem>>) attributes {dimension_semantics = [#tpu.dimension_semantics<parallel>, #tpu.dimension_semantics<arbitrary>], iteration_bounds = array<i64: 2, 1>, scalar_prefetch = 0 : i64, scratch_operands = 2 : i64, tpu.core_type = #tpu.core_type<tc>, window_params = [{}, {pipeline_mode = #tpu.pipeline_mode<synchronous>, transform_indices = @transform_1, window_bounds = array<i64: 1152, 128>}, {pipeline_mode = #tpu.pipeline_mode<synchronous>, transform_indices = @transform_2, window_bounds = array<i64: 1, 128>}, {transform_indices = @transform_3, window_bounds = array<i64: 1, 16, 16, 128>}, {transform_indices = @transform_4, window_bounds = array<i64: 1, 16, 16, 128>}]} {
    %c2_i32 = arith.constant 2 : i32
    %c0_i32 = arith.constant 0 : i32
    %0 = arith.cmpi eq, %c2_i32, %c0_i32 : i32
    %c1_i32 = arith.constant 1 : i32
    %1 = arith.select %0, %c1_i32, %c2_i32 : i32
    %2 = arith.remsi %arg1, %1 : i32
    %c0_i32_0 = arith.constant 0 : i32
    %3 = arith.cmpi ne, %2, %c0_i32_0 : i32
    %c0_i32_1 = arith.constant 0 : i32
    %4 = arith.cmpi slt, %2, %c0_i32_1 : i32
    %c0_i32_2 = arith.constant 0 : i32
    %5 = arith.cmpi slt, %1, %c0_i32_2 : i32
    %6 = arith.xori %4, %5 : i1
    %7 = arith.andi %6, %3 : i1
    %8 = arith.addi %2, %1 : i32
    %9 = arith.select %7, %8, %2 : i32
    %c0_i32_3 = arith.constant 0 : i32
    %10 = arith.cmpi eq, %arg1, %c0_i32_3 : i32
    %11 = arith.extui %10 : i1 to i32
    %c0_i32_4 = arith.constant 0 : i32
    %12 = arith.cmpi ne, %11, %c0_i32_4 : i32
    scf.if %12 {
      %c0_i32_45 = arith.constant 0 : i32
      %106 = arith.cmpi eq, %arg1, %c0_i32_45 : i32
      %107 = arith.extui %106 : i1 to i32
      %c0_i32_46 = arith.constant 0 : i32
      %108 = arith.cmpi ne, %107, %c0_i32_46 : i32
      scf.if %108 {
        %c0_i32_47 = arith.constant 0 : i32
        %c0_i32_48 = arith.constant 0 : i32
        %c0_i32_49 = arith.constant 0 : i32
        %109 = tpu.memref_slice %arg2[%arg0, %c0_i32_47, %c0_i32_48, %c0_i32_49] : memref<2x16x16x128xbf16, #tpu.memory_space<any>> -> memref<1x16x16x128xbf16, #tpu.memory_space<any>>
        %110 = tpu.memref_squeeze %109 : memref<1x16x16x128xbf16, #tpu.memory_space<any>> -> memref<16x16x128xbf16, #tpu.memory_space<any>>
        %c1_i32_50 = arith.constant 1 : i32
        %c0_i32_51 = arith.constant 0 : i32
        %c0_i32_52 = arith.constant 0 : i32
        %111 = tpu.memref_slice %arg7[%9, %c1_i32_50, %c0_i32_51, %c0_i32_52] : memref<2x18x16x128xbf16, #tpu.memory_space<vmem>> -> memref<1x16x16x128xbf16, #tpu.memory_space<vmem>>
        %112 = tpu.memref_squeeze %111 : memref<1x16x16x128xbf16, #tpu.memory_space<vmem>> -> memref<16x16x128xbf16, #tpu.memory_space<vmem>>
        %113 = tpu.memref_slice %arg8[%9] : memref<2x!tpu.dma_semaphore, #tpu.memory_space<semaphore_mem>> -> memref<1x!tpu.dma_semaphore, #tpu.memory_space<semaphore_mem>>
        %114 = tpu.memref_squeeze %113 : memref<1x!tpu.dma_semaphore, #tpu.memory_space<semaphore_mem>> -> memref<!tpu.dma_semaphore, #tpu.memory_space<semaphore_mem>>
        tpu.enqueue_dma source(%110 : memref<16x16x128xbf16, #tpu.memory_space<any>>) target(%112 : memref<16x16x128xbf16, #tpu.memory_space<vmem>>) target_semaphore(%114 : memref<!tpu.dma_semaphore, #tpu.memory_space<semaphore_mem>>)
      } else {
      }
    } else {
    }
    %c0_i32_5 = arith.constant 0 : i32
    %13 = arith.cmpi eq, %arg1, %c0_i32_5 : i32
    %14 = arith.extui %13 : i1 to i32
    %c0_i32_6 = arith.constant 0 : i32
    %15 = arith.cmpi ne, %14, %c0_i32_6 : i32
    scf.if %15 {
      %c0_i32_45 = arith.constant 0 : i32
      %c0_i32_46 = arith.constant 0 : i32
      %c0_i32_47 = arith.constant 0 : i32
      %106 = tpu.memref_slice %arg2[%arg0, %c0_i32_45, %c0_i32_46, %c0_i32_47] : memref<2x16x16x128xbf16, #tpu.memory_space<any>> -> memref<1x16x16x128xbf16, #tpu.memory_space<any>>
      %107 = tpu.memref_squeeze %106 : memref<1x16x16x128xbf16, #tpu.memory_space<any>> -> memref<16x16x128xbf16, #tpu.memory_space<any>>
      %c1_i32_48 = arith.constant 1 : i32
      %c0_i32_49 = arith.constant 0 : i32
      %c0_i32_50 = arith.constant 0 : i32
      %108 = tpu.memref_slice %arg7[%9, %c1_i32_48, %c0_i32_49, %c0_i32_50] : memref<2x18x16x128xbf16, #tpu.memory_space<vmem>> -> memref<1x16x16x128xbf16, #tpu.memory_space<vmem>>
      %109 = tpu.memref_squeeze %108 : memref<1x16x16x128xbf16, #tpu.memory_space<vmem>> -> memref<16x16x128xbf16, #tpu.memory_space<vmem>>
      %110 = tpu.memref_slice %arg8[%9] : memref<2x!tpu.dma_semaphore, #tpu.memory_space<semaphore_mem>> -> memref<1x!tpu.dma_semaphore, #tpu.memory_space<semaphore_mem>>
      %111 = tpu.memref_squeeze %110 : memref<1x!tpu.dma_semaphore, #tpu.memory_space<semaphore_mem>> -> memref<!tpu.dma_semaphore, #tpu.memory_space<semaphore_mem>>
      tpu.wait_dma2 semaphore(%111 : memref<!tpu.dma_semaphore, #tpu.memory_space<semaphore_mem>>) src(%107 : memref<16x16x128xbf16, #tpu.memory_space<any>>) dst(%109 : memref<16x16x128xbf16, #tpu.memory_space<vmem>>)
    } else {
    }
    %16 = arith.index_cast %9 : i32 to index
    %c0 = arith.constant 0 : index
    %c0_7 = arith.constant 0 : index
    %c0_8 = arith.constant 0 : index
    %17 = vector.load %arg7[%16, %c0, %c0_7, %c0_8] : memref<2x18x16x128xbf16, #tpu.memory_space<vmem>>, vector<1x18x16x128xbf16>
    %18 = vector.shape_cast %17 : vector<1x18x16x128xbf16> to vector<18x16x128xbf16>
    %19 = tpu.iota {dimensions = array<i32: 0>} : vector<18x1x1xi32>
    %c0_i32_9 = arith.constant 0 : i32
    %20 = arith.cmpi eq, %arg1, %c0_i32_9 : i32
    %c0_i32_10 = arith.constant 0 : i32
    %21 = vector.broadcast %c0_i32_10 : i32 to vector<18x1x1xi32>
    %22 = arith.cmpi eq, %19, %21 : vector<18x1x1xi32>
    %23 = vector.broadcast %20 : i1 to vector<18x1x1xi1>
    %24 = arith.andi %23, %22 : vector<18x1x1xi1>
    %c0_i32_11 = arith.constant 0 : i32
    %25 = arith.cmpi eq, %arg1, %c0_i32_11 : i32
    %c17_i32 = arith.constant 17 : i32
    %26 = vector.broadcast %c17_i32 : i32 to vector<18x1x1xi32>
    %27 = arith.cmpi sge, %19, %26 : vector<18x1x1xi32>
    %28 = vector.broadcast %25 : i1 to vector<18x1x1xi1>
    %29 = arith.andi %28, %27 : vector<18x1x1xi1>
    %30 = arith.ori %24, %29 : vector<18x1x1xi1>
    %cst = arith.constant 0.000000e+00 : bf16
    %31 = vector.broadcast %cst : bf16 to vector<18x16x128xbf16>
    %32 = vector.shape_cast %30 : vector<18x1x1xi1> to vector<18x1x1xi1>
    %33 = vector.broadcast %32 : vector<18x1x1xi1> to vector<18x16x128xi1>
    %34 = arith.select %33, %31, %18 : vector<18x16x128xi1>, vector<18x16x128xbf16>
    %cst_12 = arith.constant 0.000000e+00 : bf16
    %35 = vector.broadcast %cst_12 : bf16 to vector<18x1x128xbf16>
    %36 = tpu.concatenate %35, %34, %35 in 1 : vector<18x1x128xbf16>, vector<18x16x128xbf16>, vector<18x1x128xbf16> -> vector<18x18x128xbf16>
    %cst_13 = arith.constant 0.000000e+00 : f32
    %37 = vector.broadcast %cst_13 : f32 to vector<256x128xf32>
    %38 = vector.extract_strided_slice %36 {offsets = [0, 0, 0], sizes = [16, 16, 128], strides = [1, 1, 1]} : vector<18x18x128xbf16> to vector<16x16x128xbf16>
    %39 = vector.shape_cast %38 : vector<16x16x128xbf16> to vector<256x128xbf16>
    %c0_14 = arith.constant 0 : index
    %c0_15 = arith.constant 0 : index
    %40 = vector.load %arg3[%c0_14, %c0_15] : memref<1152x128xbf16, #tpu.memory_space<vmem>>, vector<128x128xbf16>
    %cst_16 = arith.constant dense<0.000000e+00> : vector<256x128xf32>
    %41 = tpu.matmul %39, %40, %cst_16 {dimension_numbers = #tpu.dot_dimension_numbers<[1], [0], [0], [1], [0, 0, 1, 1], [], []>} : vector<256x128xbf16>, vector<128x128xbf16>, vector<256x128xf32> -> vector<256x128xf32>
    %42 = arith.addf %37, %41 : vector<256x128xf32>
    %43 = vector.extract_strided_slice %36 {offsets = [0, 1, 0], sizes = [16, 16, 128], strides = [1, 1, 1]} : vector<18x18x128xbf16> to vector<16x16x128xbf16>
    %44 = vector.shape_cast %43 : vector<16x16x128xbf16> to vector<256x128xbf16>
    %c128 = arith.constant 128 : index
    %c0_17 = arith.constant 0 : index
    %45 = vector.load %arg3[%c128, %c0_17] : memref<1152x128xbf16, #tpu.memory_space<vmem>>, vector<128x128xbf16>
    %cst_18 = arith.constant dense<0.000000e+00> : vector<256x128xf32>
    %46 = tpu.matmul %44, %45, %cst_18 {dimension_numbers = #tpu.dot_dimension_numbers<[1], [0], [0], [1], [0, 0, 1, 1], [], []>} : vector<256x128xbf16>, vector<128x128xbf16>, vector<256x128xf32> -> vector<256x128xf32>
    %47 = arith.addf %42, %46 : vector<256x128xf32>
    %48 = vector.extract_strided_slice %36 {offsets = [0, 2, 0], sizes = [16, 16, 128], strides = [1, 1, 1]} : vector<18x18x128xbf16> to vector<16x16x128xbf16>
    %49 = vector.shape_cast %48 : vector<16x16x128xbf16> to vector<256x128xbf16>
    %c256 = arith.constant 256 : index
    %c0_19 = arith.constant 0 : index
    %50 = vector.load %arg3[%c256, %c0_19] : memref<1152x128xbf16, #tpu.memory_space<vmem>>, vector<128x128xbf16>
    %cst_20 = arith.constant dense<0.000000e+00> : vector<256x128xf32>
    %51 = tpu.matmul %49, %50, %cst_20 {dimension_numbers = #tpu.dot_dimension_numbers<[1], [0], [0], [1], [0, 0, 1, 1], [], []>} : vector<256x128xbf16>, vector<128x128xbf16>, vector<256x128xf32> -> vector<256x128xf32>
    %52 = arith.addf %47, %51 : vector<256x128xf32>
    %53 = vector.extract_strided_slice %36 {offsets = [1, 0, 0], sizes = [16, 16, 128], strides = [1, 1, 1]} : vector<18x18x128xbf16> to vector<16x16x128xbf16>
    %54 = vector.shape_cast %53 : vector<16x16x128xbf16> to vector<256x128xbf16>
    %c384 = arith.constant 384 : index
    %c0_21 = arith.constant 0 : index
    %55 = vector.load %arg3[%c384, %c0_21] : memref<1152x128xbf16, #tpu.memory_space<vmem>>, vector<128x128xbf16>
    %cst_22 = arith.constant dense<0.000000e+00> : vector<256x128xf32>
    %56 = tpu.matmul %54, %55, %cst_22 {dimension_numbers = #tpu.dot_dimension_numbers<[1], [0], [0], [1], [0, 0, 1, 1], [], []>} : vector<256x128xbf16>, vector<128x128xbf16>, vector<256x128xf32> -> vector<256x128xf32>
    %57 = arith.addf %52, %56 : vector<256x128xf32>
    %58 = vector.extract_strided_slice %36 {offsets = [1, 1, 0], sizes = [16, 16, 128], strides = [1, 1, 1]} : vector<18x18x128xbf16> to vector<16x16x128xbf16>
    %59 = vector.shape_cast %58 : vector<16x16x128xbf16> to vector<256x128xbf16>
    %c512 = arith.constant 512 : index
    %c0_23 = arith.constant 0 : index
    %60 = vector.load %arg3[%c512, %c0_23] : memref<1152x128xbf16, #tpu.memory_space<vmem>>, vector<128x128xbf16>
    %cst_24 = arith.constant dense<0.000000e+00> : vector<256x128xf32>
    %61 = tpu.matmul %59, %60, %cst_24 {dimension_numbers = #tpu.dot_dimension_numbers<[1], [0], [0], [1], [0, 0, 1, 1], [], []>} : vector<256x128xbf16>, vector<128x128xbf16>, vector<256x128xf32> -> vector<256x128xf32>
    %62 = arith.addf %57, %61 : vector<256x128xf32>
    %63 = vector.extract_strided_slice %36 {offsets = [1, 2, 0], sizes = [16, 16, 128], strides = [1, 1, 1]} : vector<18x18x128xbf16> to vector<16x16x128xbf16>
    %64 = vector.shape_cast %63 : vector<16x16x128xbf16> to vector<256x128xbf16>
    %c640 = arith.constant 640 : index
    %c0_25 = arith.constant 0 : index
    %65 = vector.load %arg3[%c640, %c0_25] : memref<1152x128xbf16, #tpu.memory_space<vmem>>, vector<128x128xbf16>
    %cst_26 = arith.constant dense<0.000000e+00> : vector<256x128xf32>
    %66 = tpu.matmul %64, %65, %cst_26 {dimension_numbers = #tpu.dot_dimension_numbers<[1], [0], [0], [1], [0, 0, 1, 1], [], []>} : vector<256x128xbf16>, vector<128x128xbf16>, vector<256x128xf32> -> vector<256x128xf32>
    %67 = arith.addf %62, %66 : vector<256x128xf32>
    %68 = vector.extract_strided_slice %36 {offsets = [2, 0, 0], sizes = [16, 16, 128], strides = [1, 1, 1]} : vector<18x18x128xbf16> to vector<16x16x128xbf16>
    %69 = vector.shape_cast %68 : vector<16x16x128xbf16> to vector<256x128xbf16>
    %c768 = arith.constant 768 : index
    %c0_27 = arith.constant 0 : index
    %70 = vector.load %arg3[%c768, %c0_27] : memref<1152x128xbf16, #tpu.memory_space<vmem>>, vector<128x128xbf16>
    %cst_28 = arith.constant dense<0.000000e+00> : vector<256x128xf32>
    %71 = tpu.matmul %69, %70, %cst_28 {dimension_numbers = #tpu.dot_dimension_numbers<[1], [0], [0], [1], [0, 0, 1, 1], [], []>} : vector<256x128xbf16>, vector<128x128xbf16>, vector<256x128xf32> -> vector<256x128xf32>
    %72 = arith.addf %67, %71 : vector<256x128xf32>
    %73 = vector.extract_strided_slice %36 {offsets = [2, 1, 0], sizes = [16, 16, 128], strides = [1, 1, 1]} : vector<18x18x128xbf16> to vector<16x16x128xbf16>
    %74 = vector.shape_cast %73 : vector<16x16x128xbf16> to vector<256x128xbf16>
    %c896 = arith.constant 896 : index
    %c0_29 = arith.constant 0 : index
    %75 = vector.load %arg3[%c896, %c0_29] : memref<1152x128xbf16, #tpu.memory_space<vmem>>, vector<128x128xbf16>
    %cst_30 = arith.constant dense<0.000000e+00> : vector<256x128xf32>
    %76 = tpu.matmul %74, %75, %cst_30 {dimension_numbers = #tpu.dot_dimension_numbers<[1], [0], [0], [1], [0, 0, 1, 1], [], []>} : vector<256x128xbf16>, vector<128x128xbf16>, vector<256x128xf32> -> vector<256x128xf32>
    %77 = arith.addf %72, %76 : vector<256x128xf32>
    %78 = vector.extract_strided_slice %36 {offsets = [2, 2, 0], sizes = [16, 16, 128], strides = [1, 1, 1]} : vector<18x18x128xbf16> to vector<16x16x128xbf16>
    %79 = vector.shape_cast %78 : vector<16x16x128xbf16> to vector<256x128xbf16>
    %c1024 = arith.constant 1024 : index
    %c0_31 = arith.constant 0 : index
    %80 = vector.load %arg3[%c1024, %c0_31] : memref<1152x128xbf16, #tpu.memory_space<vmem>>, vector<128x128xbf16>
    %cst_32 = arith.constant dense<0.000000e+00> : vector<256x128xf32>
    %81 = tpu.matmul %79, %80, %cst_32 {dimension_numbers = #tpu.dot_dimension_numbers<[1], [0], [0], [1], [0, 0, 1, 1], [], []>} : vector<256x128xbf16>, vector<128x128xbf16>, vector<256x128xf32> -> vector<256x128xf32>
    %82 = arith.addf %77, %81 : vector<256x128xf32>
    %c0_33 = arith.constant 0 : index
    %c0_34 = arith.constant 0 : index
    %83 = vector.load %arg4[%c0_33, %c0_34] : memref<1x128xf32, #tpu.memory_space<vmem>>, vector<1x128xf32>
    %84 = vector.broadcast %83 : vector<1x128xf32> to vector<256x128xf32>
    %85 = arith.addf %82, %84 : vector<256x128xf32>
    %c0_35 = arith.constant 0 : index
    %c0_36 = arith.constant 0 : index
    %c0_37 = arith.constant 0 : index
    %c0_38 = arith.constant 0 : index
    %86 = vector.load %arg5[%c0_35, %c0_36, %c0_37, %c0_38] : memref<1x16x16x128xbf16, #tpu.memory_space<vmem>>, vector<1x16x16x128xbf16>
    %87 = vector.shape_cast %86 : vector<1x16x16x128xbf16> to vector<16x16x128xbf16>
    %88 = vector.shape_cast %87 : vector<16x16x128xbf16> to vector<256x128xbf16>
    %89 = arith.extf %88 : vector<256x128xbf16> to vector<256x128xf32>
    %90 = vector.extract_strided_slice %34 {offsets = [1, 0, 0], sizes = [16, 16, 128], strides = [1, 1, 1]} : vector<18x16x128xbf16> to vector<16x16x128xbf16>
    %91 = vector.shape_cast %90 : vector<16x16x128xbf16> to vector<256x128xbf16>
    %92 = arith.extf %91 : vector<256x128xbf16> to vector<256x128xf32>
    %93 = arith.mulf %89, %85 : vector<256x128xf32>
    %94 = arith.negf %93 : vector<256x128xf32>
    %95 = math.exp %94 : vector<256x128xf32>
    %cst_39 = arith.constant 1.000000e+00 : f32
    %96 = vector.broadcast %cst_39 : f32 to vector<256x128xf32>
    %97 = arith.addf %96, %95 : vector<256x128xf32>
    %98 = arith.divf %96, %97 : vector<256x128xf32>
    %cst_40 = arith.constant 1.000000e+00 : f32
    %99 = vector.broadcast %cst_40 : f32 to vector<256x128xf32>
    %100 = arith.addf %99, %98 : vector<256x128xf32>
    %101 = arith.mulf %92, %100 : vector<256x128xf32>
    %102 = vector.shape_cast %101 : vector<256x128xf32> to vector<16x16x128xf32>
    %c0_41 = arith.constant 0 : index
    %c0_42 = arith.constant 0 : index
    %c0_43 = arith.constant 0 : index
    %c0_44 = arith.constant 0 : index
    %103 = vector.load %arg6[%c0_41, %c0_42, %c0_43, %c0_44] : memref<1x16x16x128xf32, #tpu.memory_space<vmem>>, vector<1x16x16x128xf32>
    %104 = vector.shape_cast %103 : vector<1x16x16x128xf32> to vector<16x16x128xf32>
    %105 = vector.shape_cast %102 : vector<16x16x128xf32> to vector<1x16x16x128xf32>
    tpu.vector_store %arg6[%c0_41, %c0_42, %c0_43, %c0_44], %105 {strides = array<i32>} : memref<1x16x16x128xf32, #tpu.memory_space<vmem>>, vector<1x16x16x128xf32>,
    return
  }
  func.func @transform_1(%arg0: i32, %arg1: i32) -> (i32, i32) {
    %c0_i32 = arith.constant 0 : i32
    %c0_i32_0 = arith.constant 0 : i32
    %c0_i32_1 = arith.constant 0 : i32
    return %c0_i32, %c0_i32_0 : i32, i32
  }
  func.func @transform_2(%arg0: i32, %arg1: i32) -> (i32, i32) {
    %c0_i32 = arith.constant 0 : i32
    %c0_i32_0 = arith.constant 0 : i32
    %c0_i32_1 = arith.constant 0 : i32
    return %c0_i32, %c0_i32_0 : i32, i32
  }
  func.func @transform_3(%arg0: i32, %arg1: i32) -> (i32, i32, i32, i32) {
    %c0_i32 = arith.constant 0 : i32
    %c0_i32_0 = arith.constant 0 : i32
    %c0_i32_1 = arith.constant 0 : i32
    return %arg0, %arg1, %c0_i32, %c0_i32_0 : i32, i32, i32, i32
  }
  func.func @transform_4(%arg0: i32, %arg1: i32) -> (i32, i32, i32, i32) {
    %c0_i32 = arith.constant 0 : i32
    %c0_i32_0 = arith.constant 0 : i32
    %c0_i32_1 = arith.constant 0 : i32
    return %arg0, %arg1, %c0_i32, %c0_i32_0 : i32, i32, i32, i32
  }
}

</mosaic_0001>

<bundles_post_ra>
// kernel: scale_module_forward.4
= control target key start
LH: loop header
LB: loop body
LE: loop exit
PB: predicated region body
PF: predicated region fallthrough
CT: control target
= control target key end

     0   :  { %s2785_s12 = smov 0   ;;  %s2787_s13 = smov 0   ;;  %s3379_s0 = inlined_call_operand.vmem [shape: bf16[2,8,8,128], index: 0, kind: input, shape index: {}]   ;;  %s3380_s1 = inlined_call_operand.vmem [shape: bf16[1152,128], index: 1, kind: input, shape index: {}]   ;;  %s3381_s2 = inlined_call_operand.vmem [shape: f32[1,128], index: 2, kind: input, shape index: {}]   ;;  %s3382_s3 = inlined_call_operand.vmem [shape: bf16[2,8,8,128], index: 3, kind: output, shape index: {}]  }
   0x1   :  { %s2789_s14 = smov 0  }
   0x2 LB: > { %s25_s15 = sadd.s32 1, %s2758_s13  ;;  %p2050_p0 = scmp.ge.s32.totalorder %s2762_s14, 1  ;;  %s2762_s14 = sphi %s2789_s14, %s13_s14   ;;  %s2758_s13 = sphi %s2787_s13, %s3392_s13   ;;  %s2754_s12 = sphi %s2785_s12, %s3391_s12  }
   0x3   : > { %p27_p1 = scmp.ge.s32.totalorder %s25_s15, 2  ;;  %p117_p2 = scmp.lt.s32.totalorder %s2762_s14, 3 }
   0x5   : > { %s3394_s15 = smov (%p27_p1, %s25_s15), 0  ;;  %p118_p3 = pnand %p2050_p0, %p117_p2 }
   0x6   : > { %p139_p4 = scmp.lt.s32.totalorder (!%p118_p3), %s2754_s12, 1  ;;  %s2205_s16 = sshll.u32 (!%p118_p3), %s2754_s12, 5 }
   0x7   : > { %121 = sbr.rel (%p118_p3) target bundleno = 415 (0x19f), region = 28  ;;  %s167_s19 = scalar_lea.vmem (!%p118_p3), %s3379_s0, %s2205_s16 }
   0x8   : > { %v205_v0 = vld [vmem:[%s167_s19] sm:$0xff] (!%p118_p3)  ;;  %v207_v1 = vld [vmem:[%s167_s19 + $0x8] sm:$0xff] (!%p118_p3)  ;;  %v209_v2 = vld [vmem:[%s167_s19 + $0x10] sm:$0xff] (!%p118_p3) }
   0x9   : > { %2055 = vst [vmem:[#allocation2 + $0x4] sm:$0xff] (!%p118_p3), %v205_v0  ;;  %2056 = vst [vmem:[#allocation2 + $0xc] sm:$0xff] (!%p118_p3), %v207_v1  ;;  %v211_v3 = vld [vmem:[%s167_s19 + $0x18] sm:$0xff] (!%p118_p3) }
   0xa   : > { %2057 = vst [vmem:[#allocation2 + $0x14] sm:$0xff] (!%p118_p3), %v209_v2  ;;  %2058 = vst [vmem:[#allocation2 + $0x1c] sm:$0xff] (!%p118_p3), %v211_v3 }
   0xe   : > { %s3396_s12 = smov (!%p139_p4, %s2754_s12), 1 }
   0xf   : > { %s2204_s20 = sshll.u32 %s3396_s12, 5 }
  0x10   : > { %s2809_s23 = scalar_lea.vmem %s3382_s3, %s2204_s20 }
  0x11   : > { %220 = vsyncadd [#allocation3], 512 }
  0x12   : > { %2750 = dma.done.wait [#allocation3], 512 }
  0x13   : > { %2751 = vsyncadd [#allocation3], 4294966784  ;;  %v2764_v4 = vmov 0   ;;  %vm364_vm0 = vcmask 1040384   ;;  %vm365_vm1 = vsmask.f32 256 }
  0x14   : > { %v2060_v5 = vcombine.low %v2764_v4, %v2764_v4  ;;  %vm377_vm2 = vcmask 1044480   ;;  %vm378_vm3 = vsmask.f32 4352  ;;  %vm2811_vm4 = vmand %vm364_vm0, %vm365_vm1  ;;  %v2658_v11 = vld [vmem:[%s3380_s1 + $0x40] sm:$0xff]   ;;  %v2660_v14 = vld [vmem:[%s3380_s1 + $0x48] sm:$0xff]   ;;  %vm827_vm9 = vcmask 1042432  }
  0x15   : > { %vm2815_vm5 = vmand %vm377_vm2, %vm378_vm3  ;;  %v2659_v13 = vld [vmem:[%s3380_s1 + $0x100] sm:$0xff]   ;;  %2337 = vmatprep.subr.bf16.mxu1 %v2658_v11  ;;  %v2661_v16 = vld [vmem:[%s3380_s1 + $0x108] sm:$0xff]   ;;  %vm446_vm6 = vsmask.f32 3328  ;;  %vm447_vm7 = vsmask.f32 7440 }
  0x16   : > { %v285_v6 = vshrl.u32 %v2060_v5, 16  ;;  %v288_v7 = vshll.u32 %v2060_v5, 16  ;;  %2433 = vmatprep.subr.bf16.mxu0 %v2659_v13  ;;  %2338 = vmatpush3.bf16.msra.mxu1 %v2658_v11  ;;  %v2662_v18 = vld [vmem:[%s3380_s1 + $0x50] sm:$0xff]   ;;  %v2664_v21 = vld [vmem:[%s3380_s1 + $0x58] sm:$0xff]   ;;  %v2666_v26 = vld [vmem:[%s3380_s1 + $0x60] sm:$0xff]   ;;  %vm828_vm10 = vcmask 1046532  }
  0x17   : > { %2434 = vmatpush3.bf16.msra.mxu0 %v2659_v13  ;;  %2339 = vmatprep.subr.bf16.mxu1 %v2660_v14  ;;  %v2663_v20 = vld [vmem:[%s3380_s1 + $0x110] sm:$0xff]   ;;  %v2665_v23 = vld [vmem:[%s3380_s1 + $0x118] sm:$0xff]   ;;  %v2667_v28 = vld [vmem:[%s3380_s1 + $0x120] sm:$0xff]  }
  0x18   : > { %v287_v8 = vrot.slane %v285_v6, 7  ;;  %2435 = vmatprep.subr.bf16.mxu0 %v2661_v16  ;;  %v2668_v30 = vld [vmem:[%s3380_s1 + $0x68] sm:$0xff]   ;;  %v2674_v33 = vld [vmem:[#allocation2 + $0x4] ss:$0 sps:$4 sm:$0xff]   ;;  %v2675_v34 = vld [vmem:[#allocation2 + $0x20] ss:$0 sps:$4 sm:$0xff]  }
  0x19   : > { %v2669_v32 = vld [vmem:[%s3380_s1 + $0x128] sm:$0xff]   ;;  %v2670_v36 = vld [vmem:[%s3380_s1 + $0x70] sm:$0xff]   ;;  %v292_v37 = vshrl.u32 %v2674_v33, 16  ;;  %v295_v38 = vshll.u32 %v2674_v33, 16  ;;  %v341_v40 = vshrl.u32 %v2675_v34, 16  ;;  %v344_v41 = vshll.u32 %v2675_v34, 16  ;;  %vm2883_vm8 = vmor %vm446_vm6, %vm447_vm7 }
  0x1a   : > { %v290_v12 = vor.u32 %v288_v7, %v287_v8  ;;  %2340 = vmatpush3.bf16.msra.mxu1 %v2660_v14  ;;  %v2677_v42 = vld [vmem:[#allocation2 + $0x8] ss:$0 sps:$4 sm:$0xff]   ;;  %v2671_v43 = vld [vmem:[%s3380_s1 + $0x130] sm:$0xff]   ;;  %v2678_v45 = vld [vmem:[#allocation2 + $0xc] ss:$0 sps:$4 sm:$0xff]  }
  0x1b   : > { %2436 = vmatpush3.bf16.msra.mxu0 %v2661_v16  ;;  %2341 = vmatprep.subr.bf16.mxu1 %v2662_v18  ;;  %v294_v44 = vrot.slane %v292_v37, 7  ;;  %v343_v46 = vrot.slane %v341_v40, 7  ;;  %v299_v48 = vshrl.u32 %v2677_v42, 16  ;;  %v302_v49 = vshll.u32 %v2677_v42, 16  ;;  %v2672_v50 = vld [vmem:[%s3380_s1 + $0x78] sm:$0xff]   ;;  %v2921_v6 = vld [vmem:[%s3380_s1] sm:$0xff]   ;;  %vm3102_vm11 = vmor %vm827_vm9, %vm828_vm10 }
  0x1c   : > { %v367_v15 = vsel %vm2811_vm4, 0, %v290_v12  ;;  %2437 = vmatprep.subr.bf16.mxu0 %v2663_v20  ;;  %v306_v53 = vshrl.u32 %v2678_v45, 16  ;;  %v309_v54 = vshll.u32 %v2678_v45, 16  ;;  %v2887_v55 = vld [vmem:[#allocation2 + $0x10] ss:$0 sps:$4 sm:$0xff]   ;;  %v2673_v56 = vld [vmem:[%s3380_s1 + $0x138] sm:$0xff]  }
  0x1d   : > { %v2835_v17 = vsel %vm2815_vm5, %v367_v15, 0  ;;  %v297_v51 = vor.u32 %v295_v38, %v294_v44  ;;  %v346_v57 = vor.u32 %v344_v41, %v343_v46  ;;  %v301_v58 = vrot.slane %v299_v48, 7  ;;  %v2687_v10 = vld [vmem:[%s3380_s1 + $0x20] sm:$0xff]  }
  0x1e   : > { %v2842_v19 = vcombine.low %v2835_v17, %v2835_v17  ;;  %v2857_v25 = vcombine.high %v2835_v17, %v2835_v17  ;;  %2342 = vmatpush3.bf16.msra.mxu1 %v2662_v18  ;;  %v308_v60 = vrot.slane %v306_v53, 7  ;;  %v313_v61 = vshrl.u32 %v2887_v55, 16 }
  0x1f   : > { %2438 = vmatpush3.bf16.msra.mxu0 %v2663_v20  ;;  %2343 = vmatprep.subr.bf16.mxu1 %v2664_v21  ;;  %v368_v59 = vsel %vm2811_vm4, 0, %v297_v51  ;;  %v316_v62 = vshll.u32 %v2887_v55, 16  ;;  %v375_v63 = vsel %vm2811_vm4, 0, %v346_v57  ;;  %v304_v2 = vor.u32 %v302_v49, %v301_v58 }
  0x20   : > { %v450_v22 = vshrl.u32 %v2842_v19, 16  ;;  %v453_v24 = vshll.u32 %v2842_v19, 16  ;;  %2439 = vmatprep.subr.bf16.mxu0 %v2665_v23  ;;  %v459_v31 = vshll.u32 %v2857_v25, 16  ;;  %v2900_v0 = vsel %vm2815_vm5, %v368_v59, 0 }
  0x21   : > { %v2908_v3 = vsel %vm2815_vm5, %v375_v63, 0  ;;  %v2912_v4 = vcombine.low %v2900_v0, %v2900_v0  ;;  %v2916_v5 = vcombine.high %v2900_v0, %v2900_v0  ;;  %v311_v7 = vor.u32 %v309_v54, %v308_v60  ;;  %v2691_v63 = vld [vmem:[#allocation2 + $0x14] ss:$0 sps:$4 sm:$0xff]  }
  0x22   : > { %v452_v27 = vrot.slane %v450_v22, 4  ;;  %v455_v29 = vrot.slane %v453_v24, 5  ;;  %2344 = vmatpush3.bf16.msra.mxu1 %v2664_v21  ;;  %v461_v39 = vrot.slane %v459_v31, 5  ;;  %v2925_v8 = vcombine.low %v2908_v3, %v2908_v3  ;;  %v2948_v24 = vld [vmem:[%s3380_s1 + $0x140] sm:$0xff]  }
  0x23   : > { %2440 = vmatpush3.bf16.msra.mxu0 %v2665_v23  ;;  %2345 = vmatprep.subr.bf16.mxu1 %v2666_v26  ;;  %v2929_v11 = vcombine.high %v2908_v3, %v2908_v3  ;;  %v369_v12 = vsel %vm2811_vm4, 0, %v304_v2  ;;  %v315_v13 = vrot.slane %v313_v61, 7  ;;  %v464_v14 = vshrl.u32 %v2912_v4, 16 }
  0x24   : > { %2441 = vmatprep.subr.bf16.mxu0 %v2667_v28  ;;  %v456_v35 = vor.u32 %v455_v29, %v452_v27  ;;  %v467_v15 = vshll.u32 %v2912_v4, 16  ;;  %v473_v16 = vshll.u32 %v2916_v5, 16  ;;  %v370_v18 = vsel %vm2811_vm4, 0, %v311_v7  ;;  %v2693_v7 = vld [vmem:[#allocation2 + $0x18] ss:$0 sps:$4 sm:$0xff]  }
  0x25   : > { %v1166_v20 = vshrl.u32 %v2925_v8, 16  ;;  %v1169_v21 = vshll.u32 %v2925_v8, 16  ;;  %v1175_v22 = vshll.u32 %v2929_v11, 16  ;;  %v2943_v23 = vsel %vm2815_vm5, %v369_v12, 0 }
  0x26   : > { %2346 = vmatpush3.bf16.msra.mxu1 %v2666_v26  ;;  %v457_v47 = vrot.slane %v456_v35, 4  ;;  %v466_v26 = vrot.slane %v464_v14, 4  ;;  %v469_v27 = vrot.slane %v467_v15, 5  ;;  %v2952_v29 = vsel %vm2815_vm5, %v370_v18, 0 }
  0x27   : > { %2442 = vmatpush3.bf16.msra.mxu0 %v2667_v28  ;;  %2347 = vmatprep.subr.bf16.mxu1 %v2668_v30  ;;  %v475_v28 = vrot.slane %v473_v16, 5  ;;  %v1171_v31 = vrot.slane %v1169_v21, 5  ;;  %v2956_v33 = vcombine.low %v2943_v23, %v2943_v23  ;;  %v2961_v35 = vcombine.high %v2943_v23, %v2943_v23 }
  0x28   : > { %2443 = vmatprep.subr.bf16.mxu0 %v2669_v32  ;;  %v2904_v1 = vsel %vm2883_vm8, %v457_v47, %v461_v39  ;;  %v470_v34 = vor.u32 %v469_v27, %v466_v26  ;;  %v2969_v38 = vcombine.high %v2952_v29, %v2952_v29  ;;  %v318_v61 = vor.u32 %v316_v62, %v315_v13  ;;  %v2681_v13 = vld [vmem:[%s3380_s1 + $0x8] sm:$0xff]  }
  0x29   : > { %v478_v39 = vshrl.u32 %v2956_v33, 16  ;;  %v481_v40 = vshll.u32 %v2956_v33, 16  ;;  %v487_v42 = vshll.u32 %v2961_v35, 16  ;;  %v2169_v12 = vcombine.low %v2908_v3, %v2835_v17 }
  0x2a   : > { %2348 = vmatpush3.bf16.msra.mxu1 %v2668_v30  ;;  %v1168_v30 = vrot.slane %v1166_v20, 4  ;;  %v471_v41 = vrot.slane %v470_v34, 4  ;;  %v501_v48 = vshll.u32 %v2969_v38, 16  ;;  %v2130_v14 = vcombine.low %v2900_v0, %v2943_v23 }
  0x2b   : > { %2444 = vmatpush3.bf16.msra.mxu0 %v2669_v32  ;;  %2349 = vmatprep.subr.bf16.mxu1 %v2670_v36  ;;  %v1177_v32 = vrot.slane %v1175_v22, 5  ;;  %v480_v46 = vrot.slane %v478_v39, 4  ;;  %v483_v47 = vrot.slane %v481_v40, 5  ;;  %v371_v16 = vsel %vm2811_vm4, 0, %v318_v61 }
  0x2c   : > { %2445 = vmatprep.subr.bf16.mxu0 %v2671_v43  ;;  %v1172_v37 = vor.u32 %v1171_v31, %v1168_v30  ;;  %v476_v49 = vsel %vm2883_vm8, %v471_v41, %v475_v28  ;;  %v503_v58 = vrot.slane %v501_v48, 5  ;;  %v320_v18 = vshrl.u32 %v2691_v63, 16  ;;  %v2695_v31 = vld [vmem:[#allocation2 + $0x1c] ss:$0 sps:$4 sm:$0xff]  }
  0x2d   : > { %v2086_v54 = vcombine.low %v2904_v1, %v476_v49  ;;  %v484_v57 = vor.u32 %v483_v47, %v480_v46  ;;  %v323_v20 = vshll.u32 %v2691_v63, 16  ;;  %v2999_v62 = vsel %vm2815_vm5, %v371_v16, 0  ;;  %v2685_v16 = vld [vmem:[%s3380_s1 + $0x18] sm:$0xff]  }
  0x2e   : > { %2350 = vmatpush3.bf16.msra.mxu1 %v2670_v36  ;;  %v2965_v36 = vcombine.low %v2952_v29, %v2952_v29  ;;  %v1173_v45 = vrot.slane %v1172_v37, 4  ;;  %v327_v21 = vshrl.u32 %v2693_v7, 16  ;;  %v330_v22 = vshll.u32 %v2693_v7, 16 }
  0x2f   : > { %2446 = vmatpush3.bf16.msra.mxu0 %v2671_v43  ;;  %2351 = vmatprep.subr.bf16.mxu1 %v2672_v50  ;;  %v485_v2 = vrot.slane %v484_v57, 4  ;;  %v3008_v28 = vcombine.low %v2999_v62, %v2999_v62  ;;  %v3012_v30 = vcombine.high %v2999_v62, %v2999_v62  ;;  %v322_v34 = vrot.slane %v320_v18, 7 }
  0x30   : > { %2447 = vmatprep.subr.bf16.mxu0 %v2673_v56  ;;  %v492_v43 = vshrl.u32 %v2965_v36, 16  ;;  %v495_v44 = vshll.u32 %v2965_v36, 16  ;;  %2353 = vmatprep.mubr.bf16.mxu1 %v2086_v54  ;;  %v329_v37 = vrot.slane %v327_v21, 7  ;;  %v2131_v39 = vcombine.low %v2952_v29, %v2999_v62 }
  0x31   : > { %v506_v40 = vshrl.u32 %v3008_v28, 16  ;;  %v509_v41 = vshll.u32 %v3008_v28, 16  ;;  %v337_v46 = vshll.u32 %v2695_v31, 16 }
  0x32   : > { %2352 = vmatpush3.bf16.msra.mxu1 %v2672_v50  ;;  %v489_v50 = vrot.slane %v487_v42, 5  ;;  %v494_v51 = vrot.slane %v492_v43, 4  ;;  %v497_v53 = vrot.slane %v495_v44, 5  ;;  %v515_v42 = vshll.u32 %v3012_v30, 16 }
  0x33   : > { %2448 = vmatpush3.bf16.msra.mxu0 %v2673_v56  ;;  %2361 = vmatprep.subr.bf16.mxu1 %v2921_v6  ;;  %v2983_v56 = vsel %vm2883_vm8, %v1173_v45, %v1177_v32  ;;  %v334_v43 = vshrl.u32 %v2695_v31, 16  ;;  %v325_v44 = vor.u32 %v323_v20, %v322_v34  ;;  %v332_v45 = vor.u32 %v330_v22, %v329_v37  ;;  %v2682_v37 = vld [vmem:[%s3380_s1 + $0x148] sm:$0xff]  }
  0x34   : > { %2457 = vmatprep.subr.bf16.mxu0 %v2948_v24  ;;  %v2180_v59 = vcombine.low %v2983_v56, %v2904_v1  ;;  %v498_v60 = vor.u32 %v497_v53, %v494_v51  ;;  %v490_v55 = vsel %vm2883_vm8, %v485_v2, %v489_v50  ;;  %v508_v47 = vrot.slane %v506_v40, 4  ;;  %v2683_v51 = vld [vmem:[%s3380_s1 + $0x10] sm:$0xff]  }
  0x35   : > { %v2144_v27 = vcombine.low %v476_v49, %v490_v55  ;;  %v511_v48 = vrot.slane %v509_v41, 5  ;;  %v336_v49 = vrot.slane %v334_v43, 7  ;;  %v517_v50 = vrot.slane %v515_v42, 5 }
  0x36   : > { %v499_v15 = vrot.slane %v498_v60, 4  ;;  %v372_v53 = vsel %vm2811_vm4, 0, %v325_v44  ;;  %v373_v54 = vsel %vm2811_vm4, 0, %v332_v45 }
  0x37   : > { %2449 = vmatprep.mubr.bf16.mxu0 %v2144_v27  ;;  %v512_v57 = vor.u32 %v511_v48, %v508_v47  ;;  %v339_v60 = vor.u32 %v337_v46, %v336_v49  ;;  %v2684_v47 = vld [vmem:[%s3380_s1 + $0x150] sm:$0xff]  }
  0x38   : > { %v504_v26 = vsel %vm2883_vm8, %v499_v15, %v503_v58  ;;  %v3032_v58 = vsel %vm2815_vm5, %v372_v53, 0  ;;  %v2689_v53 = vld [vmem:[%s3380_s1 + $0x28] sm:$0xff]  }
  0x39   : > { %v3014_v32 = vcombine.low %v490_v55, %v504_v26  ;;  %v3040_v61 = vcombine.low %v3032_v58, %v3032_v58  ;;  %v3044_v63 = vcombine.high %v3032_v58, %v3032_v58  ;;  %v513_v15 = vrot.slane %v512_v57, 4 }
  0x3a   : > { %v374_v18 = vsel %vm2811_vm4, 0, %v339_v60  ;;  %v836_v60 = vrot.slane %v2916_v5, 5 }
  0x3b   : > { %2354 = vmatmul.mubr.bf16.vlgmr.msra.gmra.mrb[0].mxu1 %v3014_v32  ;;  %v520_v20 = vshrl.u32 %v3040_v61, 16  ;;  %v523_v55 = vshll.u32 %v3040_v61, 16  ;;  %v529_v21 = vshll.u32 %v3044_v63, 16  ;;  %v518_v27 = vsel %vm2883_vm8, %v513_v15, %v517_v50 }
  0x3c   : > { %2362 = vmatpush3.bf16.msra.mxu1 %v2921_v6  ;;  %v3036_v6 = vsel %vm2815_vm5, %v373_v54, 0  ;;  %v3069_v9 = vsel %vm2815_vm5, %v374_v18, 0  ;;  %v2145_v34 = vcombine.low %v504_v26, %v518_v27 }
  0x3d   : > { %2363 = vmatprep.subr.bf16.mxu1 %v2681_v13  ;;  %v3048_v2 = vcombine.low %v3036_v6, %v3036_v6  ;;  %v3052_v7 = vcombine.high %v3036_v6, %v3036_v6  ;;  %v522_v40 = vrot.slane %v520_v20, 4  ;;  %v525_v41 = vrot.slane %v523_v55, 5 }
  0x3e   : > { %v3076_v44 = vcombine.low %v3069_v9, %v3069_v9  ;;  %2450 = vmatmul.mubr.bf16.vlgmr.msra.gmra.mrb[0].mxu0 %v2145_v34  ;;  %v531_v45 = vrot.slane %v529_v21, 5  ;;  %v3083_v46 = vcombine.high %v3069_v9, %v3069_v9  ;;  %v2112_v55 = vrot.slane %v2956_v33, 9 }
  0x3f   : > { %v534_v22 = vshrl.u32 %v3048_v2, 16  ;;  %v543_v31 = vshll.u32 %v3052_v7, 16  ;;  %v526_v26 = vor.u32 %v525_v41, %v522_v40  ;;  %2458 = vmatpush3.bf16.msra.mxu0 %v2948_v24  ;;  %v2111_v24 = vrot.slane %v2912_v4, 9 }
  0x40   : > { %2364 = vmatpush3.bf16.msra.mxu1 %v2681_v13  ;;  %v537_v13 = vshll.u32 %v3048_v2, 16  ;;  %v548_v50 = vshrl.u32 %v3076_v44, 16  ;;  %2459 = vmatprep.subr.bf16.mxu0 %v2682_v37  ;;  %v557_v57 = vshll.u32 %v3083_v46, 16  ;;  %v840_v4 = vrot.slane %v2961_v35, 5  ;;  %v2692_v35 = vld [vmem:[%s3380_s1 + $0x30] sm:$0xff]  }
  0x41   : > { %2365 = vmatprep.subr.bf16.mxu1 %v2683_v51  ;;  %v536_v42 = vrot.slane %v534_v22, 4  ;;  %v545_v49 = vrot.slane %v543_v31, 5  ;;  %v527_v54 = vrot.slane %v526_v26, 4  ;;  %v2686_v31 = vld [vmem:[%s3380_s1 + $0x158] sm:$0xff]   ;;  %v2110_v41 = vrot.slane %v2842_v19, 9 }
  0x42   : > { %v539_v43 = vrot.slane %v537_v13, 5  ;;  %v550_v18 = vrot.slane %v548_v50, 4  ;;  %v559_v22 = vrot.slane %v557_v57, 5  ;;  %v2156_v26 = vrot.slane %v2925_v8, 9  ;;  %v2694_v57 = vld [vmem:[%s3380_s1 + $0x170] sm:$0xff]   ;;  %v2705_v13 = vld [vmem:[%s3380_s1 + $0x198] sm:$0xff]  }
  0x43   : > { %v532_v21 = vsel %vm2883_vm8, %v527_v54, %v531_v45  ;;  %2460 = vmatpush3.bf16.msra.mxu0 %v2682_v37  ;;  %v3124_v37 = vsel %vm3102_vm11, %v2112_v55, %v840_v4  ;;  %v832_v45 = vrot.slane %v2857_v25, 5  ;;  %v2696_v25 = vld [vmem:[%s3380_s1 + $0x38] sm:$0xff]   ;;  %v2133_v8 = vcombine.low %v3069_v9, %v2908_v3  ;;  %v2698_v54 = vld [vmem:[%s3380_s1 + $0x80] sm:$0xff]   ;;  %v2735_v3 = vld [vmem:[%s3380_s1 + $0x228] sm:$0xff]  }
  0x44   : > { %2366 = vmatpush3.bf16.msra.mxu1 %v2683_v51  ;;  %v540_v48 = vor.u32 %v539_v43, %v536_v42  ;;  %v551_v51 = vshll.u32 %v3076_v44, 16  ;;  %v3107_v5 = vcombine.low %v518_v27, %v532_v21  ;;  %2461 = vmatprep.subr.bf16.mxu0 %v2684_v47  ;;  %v3120_v27 = vsel %vm3102_vm11, %v2111_v24, %v836_v60  ;;  %v2700_v60 = vld [vmem:[%s3380_s1 + $0x88] sm:$0xff]   ;;  %v2697_v55 = vld [vmem:[%s3380_s1 + $0x178] sm:$0xff]  }
  0x45   : > { %2367 = vmatprep.subr.bf16.mxu1 %v2685_v16  ;;  %v2132_v42 = vcombine.low %v3032_v58, %v3036_v6  ;;  %v2157_v52 = vcombine.low %v3120_v27, %v3124_v37  ;;  %v2099_v24 = vcombine.low %v2943_v23, %v2952_v29  ;;  %v2115_v4 = vrot.slane %v3040_v61, 9  ;;  %v2721_v23 = vld [vmem:[%s3380_s1 + $0x1d8] sm:$0xff]   ;;  %v2734_v29 = vld [vmem:[%s3380_s1 + $0x220] sm:$0xff]  }
  0x46   : > { %v541_v15 = vrot.slane %v540_v48, 4  ;;  %v553_v20 = vrot.slane %v551_v51, 5  ;;  %2357 = vmatprep.mubr.bf16.mxu1 %v3107_v5  ;;  %v2688_v48 = vld [vmem:[%s3380_s1 + $0x160] sm:$0xff]   ;;  %v3156_v51 = vsel %vm3102_vm11, %v2110_v41, %v832_v45  ;;  %v2117_v41 = vrot.slane %v3076_v44, 9 }
  0x47   : > { %2462 = vmatpush3.bf16.msra.mxu0 %v2684_v47  ;;  %v1327_v47 = vrot.slane %v2929_v11, 5  ;;  %v2690_v11 = vld [vmem:[%s3380_s1 + $0x168] sm:$0xff]  }
  0x48   : > { %2368 = vmatpush3.bf16.msra.mxu1 %v2685_v16  ;;  %v546_v16 = vsel %vm2883_vm8, %v541_v15, %v545_v49  ;;  %v554_v33 = vor.u32 %v553_v20, %v550_v18  ;;  %2463 = vmatprep.subr.bf16.mxu0 %v2686_v31  ;;  %v2113_v15 = vrot.slane %v2965_v36, 9  ;;  %v844_v18 = vrot.slane %v2969_v38, 5 }
  0x49   : > { %2369 = vmatprep.subr.bf16.mxu1 %v2687_v10  ;;  %v2146_v34 = vcombine.low %v532_v21, %v546_v16  ;;  %v3152_v50 = vsel %vm3102_vm11, %v2156_v26, %v1327_v47  ;;  %v3178_v20 = vcombine.low %v2999_v62, %v3032_v58  ;;  %v2114_v21 = vrot.slane %v3008_v28, 9  ;;  %v2702_v28 = vld [vmem:[%s3380_s1 + $0x90] sm:$0xff]   ;;  %v2708_v26 = vld [vmem:[%s3380_s1 + $0xa8] sm:$0xff]  }
  0x4a   : > { %v555_v40 = vrot.slane %v554_v33, 4  ;;  %v852_v36 = vrot.slane %v3044_v63, 5  ;;  %v2116_v38 = vrot.slane %v3048_v2, 9  ;;  %v2699_v63 = vld [vmem:[%s3380_s1 + $0x180] sm:$0xff]   ;;  %v3208_v33 = vcombine.low %v3036_v6, %v3069_v9  ;;  %v2709_v47 = vld [vmem:[%s3380_s1 + $0x1a8] sm:$0xff]   ;;  %v2736_v62 = vld [vmem:[%s3380_s1 + $0x230] sm:$0xff]  }
  0x4b   : > { %2453 = vmatprep.mubr.bf16.mxu0 %v2146_v34  ;;  %2464 = vmatpush3.bf16.msra.mxu0 %v2686_v31  ;;  %v2118_v31 = vcombine.low %v3156_v51, %v3120_v27  ;;  %v2706_v27 = vld [vmem:[%s3380_s1 + $0xa0] sm:$0xff]  }
  0x4c   : > { %2370 = vmatpush3.bf16.msra.mxu1 %v2687_v10  ;;  %v560_v43 = vsel %vm2883_vm8, %v555_v40, %v559_v22  ;;  %v2098_v10 = vcombine.low %v2835_v17, %v2900_v0  ;;  %2465 = vmatprep.subr.bf16.mxu0 %v2688_v48  ;;  %v848_v22 = vrot.slane %v3012_v30, 5  ;;  %v845_v30 = vsel %vm3102_vm11, %v2113_v15, %v844_v18  ;;  %v2704_v40 = vld [vmem:[%s3380_s1 + $0x98] sm:$0xff]   ;;  %v2715_v15 = vld [vmem:[%s3380_s1 + $0x1c0] sm:$0xff]   ;;  %v2724_v0 = vld [vmem:[%s3380_s1 + $0xe8] sm:$0xff]  }
  0x4d   : > { %2371 = vmatprep.subr.bf16.mxu1 %v2689_v53  ;;  %v3138_v19 = vcombine.low %v546_v16, %v560_v43  ;;  %v2147_v49 = vcombine.low %v560_v43, %v2983_v56  ;;  %v856_v16 = vrot.slane %v3052_v7, 5  ;;  %v853_v2 = vsel %vm3102_vm11, %v2115_v4, %v852_v36  ;;  %v2719_v4 = vld [vmem:[%s3380_s1 + $0x1d0] sm:$0xff]   ;;  %v2728_v36 = vld [vmem:[%s3380_s1 + $0xf8] sm:$0xff]   ;;  %v2725_v17 = vld [vmem:[%s3380_s1 + $0x1e8] sm:$0xff]  }
  0x4e   : > { %v849_v61 = vsel %vm3102_vm11, %v2114_v21, %v848_v22  ;;  %v860_v43 = vrot.slane %v3083_v46, 5  ;;  %v2703_v46 = vld [vmem:[%s3380_s1 + $0x190] sm:$0xff]   ;;  %v2717_v21 = vld [vmem:[%s3380_s1 + $0x1c8] sm:$0xff]   ;;  %v2722_v22 = vld [vmem:[%s3380_s1 + $0xe0] sm:$0xff]  }
  0x4f   : > { %2358 = vmatmul.mubr.bf16.gmra.mrb[4].mxu1 %v3138_v19  ;;  %2454 = vmatmul.mubr.bf16.gmra.mrb[4].mxu0 %v2147_v49  ;;  %v3204_v7 = vsel %vm3102_vm11, %v2116_v38, %v856_v16  ;;  %v2158_v34 = vcombine.low %v845_v30, %v849_v61  ;;  %v2707_v49 = vld [vmem:[%s3380_s1 + $0x1a0] sm:$0xff]   ;;  %v2731_v38 = vld [vmem:[%s3380_s1 + $0x208] sm:$0xff]   ;;  %v2729_v16 = vld [vmem:[%s3380_s1 + $0x1f8] sm:$0xff]  }
  0x50   : > { %2372 = vmatpush3.bf16.msra.mxu1 %v2689_v53  ;;  %2377 = vmatprep.mubr.bf16.mxu1 %v2098_v10  ;;  %v2190_v53 = vcombine.low %v3152_v50, %v3156_v51  ;;  %v2701_v10 = vld [vmem:[%s3380_s1 + $0x188] sm:$0xff]   ;;  %v861_v44 = vsel %vm3102_vm11, %v2117_v41, %v860_v43 }
  0x51   : > { %2373 = vmatprep.subr.bf16.mxu1 %v2692_v35  ;;  %2473 = vmatprep.mubr.bf16.mxu0 %v2157_v52  ;;  %v2160_v45 = vcombine.low %v861_v44, %v3152_v50  ;;  %v2712_v52 = vld [vmem:[%s3380_s1 + $0xb8] sm:$0xff]   ;;  %v2121_v18 = vcombine.low %v3204_v7, %v861_v44 }
  0x52   : > { %2466 = vmatpush3.bf16.msra.mxu0 %v2688_v48  ;;  %v2710_v48 = vld [vmem:[%s3380_s1 + $0xb0] sm:$0xff]  }
  0x53   : > { %2467 = vmatprep.subr.bf16.mxu0 %v2690_v11 }
  0x54   : > { %2374 = vmatpush3.bf16.msra.mxu1 %v2692_v35  ;;  %v2159_v35 = vcombine.low %v853_v2, %v3204_v7 }
  0x55   : > { %2375 = vmatprep.subr.bf16.mxu1 %v2696_v25 }
  0x56   : > { %2468 = vmatpush3.bf16.msra.mxu0 %v2690_v11  ;;  %v3253_v11 = vcombine.low %v3124_v37, %v845_v30  ;;  %v2713_v37 = vld [vmem:[%s3380_s1 + $0x1b8] sm:$0xff]  }
  0x57   : > { %2469 = vmatprep.subr.bf16.mxu0 %v2694_v57  ;;  %v2733_v30 = vld [vmem:[%s3380_s1 + $0x218] sm:$0xff]  }
  0x58   : > { %2376 = vmatpush3.bf16.msra.mxu1 %v2696_v25  ;;  %v2714_v25 = vld [vmem:[%s3380_s1 + $0xc0] sm:$0xff]  }
  0x59   : > { %2385 = vmatprep.subr.bf16.mxu1 %v2698_v54 }
  0x5a   : > { %2470 = vmatpush3.bf16.msra.mxu0 %v2694_v57  ;;  %v3258_v57 = vcombine.low %v849_v61, %v853_v2 }
  0x5b   : > { %2378 = vmatmul.mubr.bf16.vlgmr.msra.gmra.mrb[0].mxu1 %v2099_v24  ;;  %2471 = vmatprep.subr.bf16.mxu0 %v2697_v55 }
  0x5c   : > { %2386 = vmatpush3.bf16.msra.mxu1 %v2698_v54  ;;  %2381 = vmatprep.mubr.bf16.mxu1 %v3178_v20  ;;  %v2711_v54 = vld [vmem:[%s3380_s1 + $0x1b0] sm:$0xff]  }
  0x5d   : > { %2387 = vmatprep.subr.bf16.mxu1 %v2700_v60 }
  0x5e   : > { %2472 = vmatpush3.bf16.msra.mxu0 %v2697_v55  ;;  %v2720_v55 = vld [vmem:[%s3380_s1 + $0xd8] sm:$0xff]  }
  0x5f   : > { %2481 = vmatprep.subr.bf16.mxu0 %v2699_v63 }
  0x60   : > { %2388 = vmatpush3.bf16.msra.mxu1 %v2700_v60  ;;  %v2718_v60 = vld [vmem:[%s3380_s1 + $0xd0] sm:$0xff]  }
  0x61   : > { %2389 = vmatprep.subr.bf16.mxu1 %v2702_v28  ;;  %2474 = vmatmul.mubr.bf16.vlgmr.msra.gmra.mrb[0].mxu0 %v2158_v34  ;;  %v2199_v34 = vld [vmem:[%s3381_s2] ss:$0 sm:$0xff] }
  0x62   : > { %2482 = vmatpush3.bf16.msra.mxu0 %v2699_v63  ;;  %2477 = vmatprep.mubr.bf16.mxu0 %v2159_v35 }
  0x63   : > { %2382 = vmatmul.mubr.bf16.gmra.mrb[4].mxu1 %v3208_v33  ;;  %2483 = vmatprep.subr.bf16.mxu0 %v2701_v10 }
  0x64   : > { %2390 = vmatpush3.bf16.msra.mxu1 %v2702_v28  ;;  %2401 = vmatprep.mubr.bf16.mxu1 %v2118_v31  ;;  %v2732_v28 = vld [vmem:[%s3380_s1 + $0x210] sm:$0xff]  }
  0x65   : > { %2391 = vmatprep.subr.bf16.mxu1 %v2704_v40 }
  0x66   : > { %2484 = vmatpush3.bf16.msra.mxu0 %v2701_v10 }
  0x67   : > { %2485 = vmatprep.subr.bf16.mxu0 %v2703_v46 }
  0x68   : > { %2392 = vmatpush3.bf16.msra.mxu1 %v2704_v40 }
  0x69   : > { %2393 = vmatprep.subr.bf16.mxu1 %v2706_v27  ;;  %2478 = vmatmul.mubr.bf16.gmra.mrb[4].mxu0 %v2160_v45 }
  0x6a   : > { %2486 = vmatpush3.bf16.msra.mxu0 %v2703_v46  ;;  %2497 = vmatprep.mubr.bf16.mxu0 %v2099_v24  ;;  %v2716_v24 = vld [vmem:[%s3380_s1 + $0xc8] sm:$0xff]  }
  0x6b   : > { %2487 = vmatprep.subr.bf16.mxu0 %v2705_v13 }
  0x6c   : > { %2394 = vmatpush3.bf16.msra.mxu1 %v2706_v27 }
  0x6d   : > { %2395 = vmatprep.subr.bf16.mxu1 %v2708_v26 }
  0x6e   : > { %2488 = vmatpush3.bf16.msra.mxu0 %v2705_v13 }
  0x6f   : > { %2489 = vmatprep.subr.bf16.mxu0 %v2707_v49 }
  0x70   : > { %2396 = vmatpush3.bf16.msra.mxu1 %v2708_v26 }
  0x71   : > { %2397 = vmatprep.subr.bf16.mxu1 %v2710_v48 }
  0x72   : > { %2490 = vmatpush3.bf16.msra.mxu0 %v2707_v49 }
  0x73   : > { %2491 = vmatprep.subr.bf16.mxu0 %v2709_v47 }
  0x74   : > { %2398 = vmatpush3.bf16.msra.mxu1 %v2710_v48 }
  0x75   : > { %2399 = vmatprep.subr.bf16.mxu1 %v2712_v52 }
  0x76   : > { %2492 = vmatpush3.bf16.msra.mxu0 %v2709_v47 }
  0x77   : > { %2493 = vmatprep.subr.bf16.mxu0 %v2711_v54 }
  0x78   : > { %2400 = vmatpush3.bf16.msra.mxu1 %v2712_v52 }
  0x79   : > { %2409 = vmatprep.subr.bf16.mxu1 %v2714_v25 }
  0x7a   : > { %2494 = vmatpush3.bf16.msra.mxu0 %v2711_v54 }
  0x7b   : > { %2402 = vmatmul.mubr.bf16.vlgmr.msra.gmra.mrb[0].mxu1 %v3253_v11  ;;  %2495 = vmatprep.subr.bf16.mxu0 %v2713_v37 }
  0x7c   : > { %2410 = vmatpush3.bf16.msra.mxu1 %v2714_v25  ;;  %2405 = vmatprep.mubr.bf16.mxu1 %v3258_v57 }
  0x7d   : > { %2411 = vmatprep.subr.bf16.mxu1 %v2716_v24 }
  0x7e   : > { %2496 = vmatpush3.bf16.msra.mxu0 %v2713_v37 }
  0x7f   : > { %2505 = vmatprep.subr.bf16.mxu0 %v2715_v15 }
  0x80   : > { %2412 = vmatpush3.bf16.msra.mxu1 %v2716_v24 }
  0x81   : > { %2413 = vmatprep.subr.bf16.mxu1 %v2718_v60  ;;  %2498 = vmatmul.mubr.bf16.vlgmr.msra.gmra.mrb[0].mxu0 %v3178_v20  ;;  %v2723_v20 = vld [vmem:[%s3380_s1 + $0x1e0] sm:$0xff]  }
  0x82   : > { %2506 = vmatpush3.bf16.msra.mxu0 %v2715_v15  ;;  %2501 = vmatprep.mubr.bf16.mxu0 %v3208_v33 }
  0x83   : > { %2406 = vmatmul.mubr.bf16.gmra.mrb[4].mxu1 %v2121_v18  ;;  %2507 = vmatprep.subr.bf16.mxu0 %v2717_v21 }
  0x84   : > { %2414 = vmatpush3.bf16.msra.mxu1 %v2718_v60  ;;  %2425 = vmatprep.mubr.bf16.mxu1 %v2130_v14  ;;  %v2726_v14 = vld [vmem:[%s3380_s1 + $0xf0] sm:$0xff]  }
  0x85   : > { %2415 = vmatprep.subr.bf16.mxu1 %v2720_v55 }
  0x86   : > { %2508 = vmatpush3.bf16.msra.mxu0 %v2717_v21 }
  0x87   : > { %2509 = vmatprep.subr.bf16.mxu0 %v2719_v4 }
  0x88   : > { %2416 = vmatpush3.bf16.msra.mxu1 %v2720_v55 }
  0x89   : > { %2417 = vmatprep.subr.bf16.mxu1 %v2722_v22  ;;  %2502 = vmatmul.mubr.bf16.gmra.mrb[4].mxu0 %v2169_v12  ;;  %v2730_v12 = vld [vmem:[%s3380_s1 + $0x200] sm:$0xff]  }
  0x8a   : > { %2510 = vmatpush3.bf16.msra.mxu0 %v2719_v4  ;;  %2521 = vmatprep.mubr.bf16.mxu0 %v3014_v32  ;;  %v2727_v32 = vld [vmem:[%s3380_s1 + $0x1f0] sm:$0xff]  }
  0x8b   : > { %2511 = vmatprep.subr.bf16.mxu0 %v2721_v23 }
  0x8c   : > { %2418 = vmatpush3.bf16.msra.mxu1 %v2722_v22 }
  0x8d   : > { %2419 = vmatprep.subr.bf16.mxu1 %v2724_v0 }
  0x8e   : > { %2512 = vmatpush3.bf16.msra.mxu0 %v2721_v23 }
  0x8f   : > { %2513 = vmatprep.subr.bf16.mxu0 %v2723_v20 }
  0x90   : > { %2420 = vmatpush3.bf16.msra.mxu1 %v2724_v0 }
  0x91   : > { %2421 = vmatprep.subr.bf16.mxu1 %v2726_v14 }
  0x92   : > { %2514 = vmatpush3.bf16.msra.mxu0 %v2723_v20 }
  0x93   : > { %2515 = vmatprep.subr.bf16.mxu0 %v2725_v17 }
  0x94   : > { %2422 = vmatpush3.bf16.msra.mxu1 %v2726_v14 }
  0x95   : > { %2423 = vmatprep.subr.bf16.mxu1 %v2728_v36 }
  0x96   : > { %2516 = vmatpush3.bf16.msra.mxu0 %v2725_v17 }
  0x97   : > { %2517 = vmatprep.subr.bf16.mxu0 %v2727_v32 }
  0x98   : > { %2424 = vmatpush3.bf16.msra.mxu1 %v2728_v36 }
  0x99   : > { %2553 = vmatprep.subr.bf16.mxu1 %v2730_v12 }
  0x9a   : > { %2518 = vmatpush3.bf16.msra.mxu0 %v2727_v32 }
  0x9b   : > { %2426 = vmatmul.mubr.bf16.vlgmr.msra.gmra.mrb[0].mxu1 %v2131_v39  ;;  %2519 = vmatprep.subr.bf16.mxu0 %v2729_v16  ;;  %v2737_v39 = vld [vmem:[%s3380_s1 + $0x238] sm:$0xff]  }
  0x9c   : > { %2561 = vmatpush3.bf16.msra.mxu1 %v2730_v12  ;;  %2429 = vmatprep.mubr.bf16.mxu1 %v2132_v42 }
  0x9d   : > { %2554 = vmatprep.subr.bf16.mxu1 %v2731_v38 }
  0x9e   : > { %2520 = vmatpush3.bf16.msra.mxu0 %v2729_v16 }
  0x9f   : > { %2529 = vmatprep.subr.bf16.mxu0 %v2730_v12 }
  0xa0   : > { %2562 = vmatpush3.bf16.msra.mxu1 %v2731_v38 }
  0xa1   : > { %2555 = vmatprep.subr.bf16.mxu1 %v2732_v28  ;;  %2522 = vmatmul.mubr.bf16.vlgmr.msra.gmra.mrb[0].mxu0 %v3107_v5 }
  0xa2   : > { %2530 = vmatpush3.bf16.msra.mxu0 %v2730_v12  ;;  %2525 = vmatprep.mubr.bf16.mxu0 %v3138_v19 }
  0xa3   : > { %2430 = vmatmul.mubr.bf16.gmra.mrb[4].mxu1 %v2133_v8  ;;  %2531 = vmatprep.subr.bf16.mxu0 %v2731_v38 }
  0xa4   : > { %2563 = vmatpush3.bf16.msra.mxu1 %v2732_v28  ;;  %2549 = vmatprep.mubr.bf16.mxu1 %v2121_v18 }
  0xa5   : > { %2556 = vmatprep.subr.bf16.mxu1 %v2733_v30 }
  0xa6   : > { %2532 = vmatpush3.bf16.msra.mxu0 %v2731_v38 }
  0xa7   : > { %2533 = vmatprep.subr.bf16.mxu0 %v2732_v28 }
  0xa8   : > { %2564 = vmatpush3.bf16.msra.mxu1 %v2733_v30 }
  0xa9   : > { %2557 = vmatprep.subr.bf16.mxu1 %v2734_v29  ;;  %2526 = vmatmul.mubr.bf16.gmra.mrb[4].mxu0 %v2180_v59 }
  0xaa   : > { %2534 = vmatpush3.bf16.msra.mxu0 %v2732_v28  ;;  %2545 = vmatprep.mubr.bf16.mxu0 %v3253_v11 }
  0xab   : > { %2535 = vmatprep.subr.bf16.mxu0 %v2733_v30 }
  0xac   : > { %2565 = vmatpush3.bf16.msra.mxu1 %v2734_v29 }
  0xad   : > { %2558 = vmatprep.subr.bf16.mxu1 %v2735_v3 }
  0xae   : > { %2536 = vmatpush3.bf16.msra.mxu0 %v2733_v30 }
  0xaf   : > { %2537 = vmatprep.subr.bf16.mxu0 %v2734_v29 }
  0xb0   : > { %2566 = vmatpush3.bf16.msra.mxu1 %v2735_v3 }
  0xb1   : > { %2559 = vmatprep.subr.bf16.mxu1 %v2736_v62 }
  0xb2   : > { %2538 = vmatpush3.bf16.msra.mxu0 %v2734_v29 }
  0xb3   : > { %2539 = vmatprep.subr.bf16.mxu0 %v2735_v3 }
  0xb4   : > { %2567 = vmatpush3.bf16.msra.mxu1 %v2736_v62 }
  0xb5   : > { %2560 = vmatprep.subr.bf16.mxu1 %v2737_v39 }
  0xb6   : > { %2540 = vmatpush3.bf16.msra.mxu0 %v2735_v3 }
  0xb7   : > { %2541 = vmatprep.subr.bf16.mxu0 %v2736_v62 }
  0xb8   : > { %2568 = vmatpush3.bf16.msra.mxu1 %v2737_v39 }
  0xba   : > { %2542 = vmatpush3.bf16.msra.mxu0 %v2736_v62 }
  0xbb   : > { %2550 = vmatmul.mubr.bf16.vlgmr.msra.gmra.mrb[8].mxu1 %v2190_v53  ;;  %2543 = vmatprep.subr.bf16.mxu0 %v2737_v39 }
  0xbe   : > { %2544 = vmatpush3.bf16.msra.mxu0 %v2737_v39 }
  0xc1   : > { %2546 = vmatmul.mubr.bf16.vlgmr.msra.gmra.mrb[0].mxu0 %v3258_v57 }
 0x16e   : > { %v2427_v1 = vpop.f32.mrb[0].mxu1 }
 0x16f   : > { %v1123_v56 = vpop.f32.mrb[1].mxu1 }
 0x170   : > { %v2428_v59 = vpop.f32.mrb[2].mxu1 }
 0x171   : > { %v1126_v58 = vpop.f32.mrb[3].mxu1 }
 0x176   : > { %v2431_v6 = vpop.f32.mrb[4].mxu1 }
 0x177   : > { %v1139_v9 = vpop.f32.mrb[5].mxu1 }
 0x178   : > { %v2432_v5 = vpop.f32.mrb[6].mxu1 }
 0x179   : > { %v1142_v42 = vpop.f32.mrb[7].mxu1 }
 0x17c   : > { %v2527_v19 = vpop.f32.mrb[4].mxu0 }
 0x17d   : > { %v2573_v8 = vadd.f32 %v2527_v19, %v2431_v6  ;;  %v1750_v61 = vpop.f32.mrb[5].mxu0 }
 0x17e   : > { %v2575_v63 = vadd.f32 %v1750_v61, %v1139_v9  ;;  %v2528_v2 = vpop.f32.mrb[6].mxu0 }
 0x17f   : > { %v2577_v50 = vadd.f32 %v2528_v2, %v2432_v5  ;;  %v1753_v51 = vpop.f32.mrb[7].mxu0 }
 0x180   : > { %v2579_v53 = vadd.f32 %v1753_v51, %v1142_v42 }
 0x18e   : > { %v2551_v7 = vpop.f32.mrb[8].mxu1 }
 0x18f   : > { %v2574_v33 = vadd.f32 %v2573_v8, %v2551_v7  ;;  %v1894_v31 = vpop.f32.mrb[9].mxu1 }
 0x190   : > { %v2576_v40 = vadd.f32 %v2575_v63, %v1894_v31  ;;  %v2552_v35 = vpop.f32.mrb[10].mxu1 }
 0x191   : > { %v2578_v41 = vadd.f32 %v2577_v50, %v2552_v35  ;;  %v1897_v43 = vpop.f32.mrb[11].mxu1  ;;  %v1930_v27 = vadd.f32 %v2574_v33, %v2199_v34 }
 0x192   : > { %v2580_v10 = vadd.f32 %v2579_v53, %v1897_v43  ;;  %v1928_v46 = vadd.f32 %v2576_v40, %v2199_v34 }
 0x193   : > { %v1931_v44 = vadd.f32 %v2578_v41, %v2199_v34 }
 0x194   : > { %v1929_v26 = vadd.f32 %v2580_v10, %v2199_v34  ;;  %v2547_v48 = vpop.f32.mrb[0].mxu0 }
 0x195   : > { %v2224_v45 = vpack.c.bf16 %v1931_v44, %v1930_v27  ;;  %v2569_v49 = vadd.f32 %v2547_v48, %v2427_v1  ;;  %v1878_v52 = vpop.f32.mrb[1].mxu0 }
 0x196   : > { %v2219_v13 = vpack.c.bf16 %v1929_v26, %v1928_v46  ;;  %v2570_v47 = vadd.f32 %v1878_v52, %v1123_v56  ;;  %v2548_v25 = vpop.f32.mrb[2].mxu0 }
 0x197   : > { %2228 = vst [vmem:[%s2809_s23 + $0x18] sm:$0xff] %v2224_v45   ;;  %v2571_v11 = vadd.f32 %v2548_v25, %v2428_v59  ;;  %v1881_v54 = vpop.f32.mrb[3].mxu0  ;;  %v1926_v24 = vadd.f32 %v2569_v49, %v2199_v34 }
 0x198   : > { %2227 = vst [vmem:[%s2809_s23 + $0x10] sm:$0xff] %v2219_v13   ;;  %v2572_v57 = vadd.f32 %v1881_v54, %v1126_v58  ;;  %v1924_v60 = vadd.f32 %v2570_v47, %v2199_v34 }
 0x199   : > { %v1927_v37 = vadd.f32 %v2571_v11, %v2199_v34 }
 0x19a   : > { %v1925_v15 = vadd.f32 %v2572_v57, %v2199_v34 }
 0x19b   : > { %v2214_v18 = vpack.c.bf16 %v1927_v37, %v1926_v24 }
 0x19c   : > { %v2209_v55 = vpack.c.bf16 %v1925_v15, %v1924_v60 }
 0x19d   : > { %2226 = vst [vmem:[%s2809_s23 + $0x8] sm:$0xff] %v2214_v18  }
 0x19e   : > { %2210 = vst [vmem:[%s2809_s23] sm:$0xff] %v2209_v55  }
 0x19f PF: > { %s13_s14 = sadd.s32 1, %s2762_s14   ;;  %s3391_s12 = smov %s2758_s13 }
 0x1a0   : > { %p10_p5 = scmp.ge.s32.totalorder %s13_s14, 4   ;;  %s3392_s13 = smov %s3394_s15 }
 0x1a2   :  { %12 = sbr.rel (!%p10_p5) target bundleno = 2 (0x2), region = 106 }
 0x1a9   :  { %1978 = vsyncmov [#allocation3] }
 0x1ac   :  { %s1979_s5 = vpop.sfrf %1978 }
 0x1ad   :  { %p2202_p6 = scmp.ne.s32.totalorder %s1979_s5, 0 }
 0x1af   :  { %1983 = shalt.err (%p2202_p6)  }
 0x1b0   :  { %1985 = vsyncmov [#allocation3 + $0x1] }
 0x1b3   :  { %s1986_s6 = vpop.sfrf %1985 }
 0x1b4   :  { %p2203_p7 = scmp.ne.s32.totalorder %s1986_s6, 0 }
 0x1b6   :  { %1990 = shalt.err (%p2203_p7)  }

// kernel: scale_module_forward.3
= control target key start
LH: loop header
LB: loop body
LE: loop exit
PB: predicated region body
PF: predicated region fallthrough
CT: control target
= control target key end

     0   :  { %s2809_s12 = smov 0   ;;  %s2811_s13 = smov 0   ;;  %s3403_s0 = inlined_call_operand.vmem [shape: bf16[2,8,8,128], index: 0, kind: input, shape index: {}]   ;;  %s3404_s1 = inlined_call_operand.vmem [shape: bf16[1152,128], index: 1, kind: input, shape index: {}]   ;;  %s3405_s2 = inlined_call_operand.vmem [shape: f32[1,128], index: 2, kind: input, shape index: {}]   ;;  %s3406_s3 = inlined_call_operand.vmem [shape: bf16[2,8,8,128], index: 3, kind: output, shape index: {}]  }
   0x1   :  { %s2813_s14 = smov 0  }
   0x2 LB: > { %s25_s15 = sadd.s32 1, %s2782_s13  ;;  %p2074_p0 = scmp.ge.s32.totalorder %s2786_s14, 1  ;;  %s2786_s14 = sphi %s2813_s14, %s13_s14   ;;  %s2782_s13 = sphi %s2811_s13, %s3416_s13   ;;  %s2778_s12 = sphi %s2809_s12, %s3415_s12  }
   0x3   : > { %p27_p1 = scmp.ge.s32.totalorder %s25_s15, 2  ;;  %p117_p2 = scmp.lt.s32.totalorder %s2786_s14, 3 }
   0x5   : > { %s3418_s15 = smov (%p27_p1, %s25_s15), 0  ;;  %p118_p3 = pnand %p2074_p0, %p117_p2 }
   0x6   : > { %p139_p4 = scmp.lt.s32.totalorder (!%p118_p3), %s2778_s12, 1  ;;  %s2229_s16 = sshll.u32 (!%p118_p3), %s2778_s12, 5 }
   0x7   : > { %121 = sbr.rel (%p118_p3) target bundleno = 418 (0x1a2), region = 28  ;;  %s167_s19 = scalar_lea.vmem (!%p118_p3), %s3403_s0, %s2229_s16 }
   0x8   : > { %v205_v0 = vld [vmem:[%s167_s19] sm:$0xff] (!%p118_p3)  ;;  %v207_v1 = vld [vmem:[%s167_s19 + $0x8] sm:$0xff] (!%p118_p3)  ;;  %v209_v2 = vld [vmem:[%s167_s19 + $0x10] sm:$0xff] (!%p118_p3) }
   0x9   : > { %2079 = vst [vmem:[#allocation2 + $0x4] sm:$0xff] (!%p118_p3), %v205_v0  ;;  %2080 = vst [vmem:[#allocation2 + $0xc] sm:$0xff] (!%p118_p3), %v207_v1  ;;  %v211_v3 = vld [vmem:[%s167_s19 + $0x18] sm:$0xff] (!%p118_p3) }
   0xa   : > { %2081 = vst [vmem:[#allocation2 + $0x14] sm:$0xff] (!%p118_p3), %v209_v2  ;;  %2082 = vst [vmem:[#allocation2 + $0x1c] sm:$0xff] (!%p118_p3), %v211_v3 }
   0xe   : > { %s3420_s12 = smov (!%p139_p4, %s2778_s12), 1 }
   0xf   : > { %s2228_s20 = sshll.u32 %s3420_s12, 5 }
  0x10   : > { %s2833_s23 = scalar_lea.vmem %s3406_s3, %s2228_s20 }
  0x11   : > { %220 = vsyncadd [#allocation3], 512 }
  0x12   : > { %2774 = dma.done.wait [#allocation3], 512 }
  0x13   : > { %2775 = vsyncadd [#allocation3], 4294966784  ;;  %v2788_v4 = vmov 0   ;;  %vm364_vm0 = vcmask 1040384   ;;  %vm365_vm1 = vsmask.f32 256 }
  0x14   : > { %v2084_v5 = vcombine.low %v2788_v4, %v2788_v4  ;;  %vm377_vm2 = vcmask 1044480   ;;  %vm378_vm3 = vsmask.f32 4352  ;;  %vm2835_vm4 = vmand %vm364_vm0, %vm365_vm1  ;;  %v2682_v11 = vld [vmem:[%s3404_s1 + $0x40] sm:$0xff]   ;;  %v2684_v14 = vld [vmem:[%s3404_s1 + $0x48] sm:$0xff]   ;;  %vm827_vm9 = vcmask 1042432  }
  0x15   : > { %vm2839_vm5 = vmand %vm377_vm2, %vm378_vm3  ;;  %v2683_v13 = vld [vmem:[%s3404_s1 + $0x100] sm:$0xff]   ;;  %2361 = vmatprep.subr.bf16.mxu1 %v2682_v11  ;;  %v2685_v16 = vld [vmem:[%s3404_s1 + $0x108] sm:$0xff]   ;;  %vm446_vm6 = vsmask.f32 3328  ;;  %vm447_vm7 = vsmask.f32 7440 }
  0x16   : > { %v285_v6 = vshrl.u32 %v2084_v5, 16  ;;  %v288_v7 = vshll.u32 %v2084_v5, 16  ;;  %2457 = vmatprep.subr.bf16.mxu0 %v2683_v13  ;;  %2362 = vmatpush3.bf16.msra.mxu1 %v2682_v11  ;;  %v2686_v18 = vld [vmem:[%s3404_s1 + $0x50] sm:$0xff]   ;;  %v2688_v21 = vld [vmem:[%s3404_s1 + $0x58] sm:$0xff]   ;;  %v2690_v26 = vld [vmem:[%s3404_s1 + $0x60] sm:$0xff]   ;;  %vm828_vm10 = vcmask 1046532  }
  0x17   : > { %2458 = vmatpush3.bf16.msra.mxu0 %v2683_v13  ;;  %2363 = vmatprep.subr.bf16.mxu1 %v2684_v14  ;;  %v2687_v20 = vld [vmem:[%s3404_s1 + $0x110] sm:$0xff]   ;;  %v2689_v23 = vld [vmem:[%s3404_s1 + $0x118] sm:$0xff]   ;;  %v2691_v28 = vld [vmem:[%s3404_s1 + $0x120] sm:$0xff]  }
  0x18   : > { %v287_v8 = vrot.slane %v285_v6, 7  ;;  %2459 = vmatprep.subr.bf16.mxu0 %v2685_v16  ;;  %v2692_v30 = vld [vmem:[%s3404_s1 + $0x68] sm:$0xff]   ;;  %v2698_v33 = vld [vmem:[#allocation2 + $0x4] ss:$0 sps:$4 sm:$0xff]   ;;  %v2699_v34 = vld [vmem:[#allocation2 + $0x20] ss:$0 sps:$4 sm:$0xff]  }
  0x19   : > { %v2693_v32 = vld [vmem:[%s3404_s1 + $0x128] sm:$0xff]   ;;  %v2694_v36 = vld [vmem:[%s3404_s1 + $0x70] sm:$0xff]   ;;  %v292_v37 = vshrl.u32 %v2698_v33, 16  ;;  %v295_v38 = vshll.u32 %v2698_v33, 16  ;;  %v341_v40 = vshrl.u32 %v2699_v34, 16  ;;  %v344_v41 = vshll.u32 %v2699_v34, 16  ;;  %vm2907_vm8 = vmor %vm446_vm6, %vm447_vm7 }
  0x1a   : > { %v290_v12 = vor.u32 %v288_v7, %v287_v8  ;;  %2364 = vmatpush3.bf16.msra.mxu1 %v2684_v14  ;;  %v2701_v42 = vld [vmem:[#allocation2 + $0x8] ss:$0 sps:$4 sm:$0xff]   ;;  %v2695_v43 = vld [vmem:[%s3404_s1 + $0x130] sm:$0xff]   ;;  %v2702_v45 = vld [vmem:[#allocation2 + $0xc] ss:$0 sps:$4 sm:$0xff]  }
  0x1b   : > { %2460 = vmatpush3.bf16.msra.mxu0 %v2685_v16  ;;  %2365 = vmatprep.subr.bf16.mxu1 %v2686_v18  ;;  %v294_v44 = vrot.slane %v292_v37, 7  ;;  %v343_v46 = vrot.slane %v341_v40, 7  ;;  %v299_v48 = vshrl.u32 %v2701_v42, 16  ;;  %v302_v49 = vshll.u32 %v2701_v42, 16  ;;  %v2696_v50 = vld [vmem:[%s3404_s1 + $0x78] sm:$0xff]   ;;  %v2945_v6 = vld [vmem:[%s3404_s1] sm:$0xff]   ;;  %vm3126_vm11 = vmor %vm827_vm9, %vm828_vm10 }
  0x1c   : > { %v367_v15 = vsel %vm2835_vm4, 0, %v290_v12  ;;  %2461 = vmatprep.subr.bf16.mxu0 %v2687_v20  ;;  %v306_v53 = vshrl.u32 %v2702_v45, 16  ;;  %v309_v54 = vshll.u32 %v2702_v45, 16  ;;  %v2911_v55 = vld [vmem:[#allocation2 + $0x10] ss:$0 sps:$4 sm:$0xff]   ;;  %v2697_v56 = vld [vmem:[%s3404_s1 + $0x138] sm:$0xff]  }
  0x1d   : > { %v2859_v17 = vsel %vm2839_vm5, %v367_v15, 0  ;;  %v297_v51 = vor.u32 %v295_v38, %v294_v44  ;;  %v346_v57 = vor.u32 %v344_v41, %v343_v46  ;;  %v301_v58 = vrot.slane %v299_v48, 7  ;;  %v2711_v10 = vld [vmem:[%s3404_s1 + $0x20] sm:$0xff]  }
  0x1e   : > { %v2866_v19 = vcombine.low %v2859_v17, %v2859_v17  ;;  %v2881_v25 = vcombine.high %v2859_v17, %v2859_v17  ;;  %2366 = vmatpush3.bf16.msra.mxu1 %v2686_v18  ;;  %v308_v60 = vrot.slane %v306_v53, 7  ;;  %v313_v61 = vshrl.u32 %v2911_v55, 16 }
  0x1f   : > { %2462 = vmatpush3.bf16.msra.mxu0 %v2687_v20  ;;  %2367 = vmatprep.subr.bf16.mxu1 %v2688_v21  ;;  %v368_v59 = vsel %vm2835_vm4, 0, %v297_v51  ;;  %v316_v62 = vshll.u32 %v2911_v55, 16  ;;  %v375_v63 = vsel %vm2835_vm4, 0, %v346_v57  ;;  %v304_v2 = vor.u32 %v302_v49, %v301_v58 }
  0x20   : > { %v450_v22 = vshrl.u32 %v2866_v19, 16  ;;  %v453_v24 = vshll.u32 %v2866_v19, 16  ;;  %2463 = vmatprep.subr.bf16.mxu0 %v2689_v23  ;;  %v459_v31 = vshll.u32 %v2881_v25, 16  ;;  %v2924_v0 = vsel %vm2839_vm5, %v368_v59, 0 }
  0x21   : > { %v2932_v3 = vsel %vm2839_vm5, %v375_v63, 0  ;;  %v2936_v4 = vcombine.low %v2924_v0, %v2924_v0  ;;  %v2940_v5 = vcombine.high %v2924_v0, %v2924_v0  ;;  %v311_v7 = vor.u32 %v309_v54, %v308_v60  ;;  %v2715_v63 = vld [vmem:[#allocation2 + $0x14] ss:$0 sps:$4 sm:$0xff]  }
  0x22   : > { %v452_v27 = vrot.slane %v450_v22, 4  ;;  %v455_v29 = vrot.slane %v453_v24, 5  ;;  %2368 = vmatpush3.bf16.msra.mxu1 %v2688_v21  ;;  %v461_v39 = vrot.slane %v459_v31, 5  ;;  %v2949_v8 = vcombine.low %v2932_v3, %v2932_v3  ;;  %v2972_v24 = vld [vmem:[%s3404_s1 + $0x140] sm:$0xff]  }
  0x23   : > { %2464 = vmatpush3.bf16.msra.mxu0 %v2689_v23  ;;  %2369 = vmatprep.subr.bf16.mxu1 %v2690_v26  ;;  %v2953_v11 = vcombine.high %v2932_v3, %v2932_v3  ;;  %v369_v12 = vsel %vm2835_vm4, 0, %v304_v2  ;;  %v315_v13 = vrot.slane %v313_v61, 7  ;;  %v464_v14 = vshrl.u32 %v2936_v4, 16 }
  0x24   : > { %2465 = vmatprep.subr.bf16.mxu0 %v2691_v28  ;;  %v456_v35 = vor.u32 %v455_v29, %v452_v27  ;;  %v467_v15 = vshll.u32 %v2936_v4, 16  ;;  %v473_v16 = vshll.u32 %v2940_v5, 16  ;;  %v370_v18 = vsel %vm2835_vm4, 0, %v311_v7  ;;  %v2717_v7 = vld [vmem:[#allocation2 + $0x18] ss:$0 sps:$4 sm:$0xff]  }
  0x25   : > { %v1166_v20 = vshrl.u32 %v2949_v8, 16  ;;  %v1169_v21 = vshll.u32 %v2949_v8, 16  ;;  %v1175_v22 = vshll.u32 %v2953_v11, 16  ;;  %v2967_v23 = vsel %vm2839_vm5, %v369_v12, 0 }
  0x26   : > { %2370 = vmatpush3.bf16.msra.mxu1 %v2690_v26  ;;  %v457_v47 = vrot.slane %v456_v35, 4  ;;  %v466_v26 = vrot.slane %v464_v14, 4  ;;  %v469_v27 = vrot.slane %v467_v15, 5  ;;  %v2976_v29 = vsel %vm2839_vm5, %v370_v18, 0 }
  0x27   : > { %2466 = vmatpush3.bf16.msra.mxu0 %v2691_v28  ;;  %2371 = vmatprep.subr.bf16.mxu1 %v2692_v30  ;;  %v475_v28 = vrot.slane %v473_v16, 5  ;;  %v1171_v31 = vrot.slane %v1169_v21, 5  ;;  %v2980_v33 = vcombine.low %v2967_v23, %v2967_v23  ;;  %v2985_v35 = vcombine.high %v2967_v23, %v2967_v23 }
  0x28   : > { %2467 = vmatprep.subr.bf16.mxu0 %v2693_v32  ;;  %v2928_v1 = vsel %vm2907_vm8, %v457_v47, %v461_v39  ;;  %v470_v34 = vor.u32 %v469_v27, %v466_v26  ;;  %v2993_v38 = vcombine.high %v2976_v29, %v2976_v29  ;;  %v318_v61 = vor.u32 %v316_v62, %v315_v13  ;;  %v2705_v13 = vld [vmem:[%s3404_s1 + $0x8] sm:$0xff]  }
  0x29   : > { %v478_v39 = vshrl.u32 %v2980_v33, 16  ;;  %v481_v40 = vshll.u32 %v2980_v33, 16  ;;  %v487_v42 = vshll.u32 %v2985_v35, 16  ;;  %v2193_v12 = vcombine.low %v2932_v3, %v2859_v17 }
  0x2a   : > { %2372 = vmatpush3.bf16.msra.mxu1 %v2692_v30  ;;  %v1168_v30 = vrot.slane %v1166_v20, 4  ;;  %v471_v41 = vrot.slane %v470_v34, 4  ;;  %v501_v48 = vshll.u32 %v2993_v38, 16  ;;  %v2154_v14 = vcombine.low %v2924_v0, %v2967_v23 }
  0x2b   : > { %2468 = vmatpush3.bf16.msra.mxu0 %v2693_v32  ;;  %2373 = vmatprep.subr.bf16.mxu1 %v2694_v36  ;;  %v1177_v32 = vrot.slane %v1175_v22, 5  ;;  %v480_v46 = vrot.slane %v478_v39, 4  ;;  %v483_v47 = vrot.slane %v481_v40, 5  ;;  %v371_v16 = vsel %vm2835_vm4, 0, %v318_v61 }
  0x2c   : > { %2469 = vmatprep.subr.bf16.mxu0 %v2695_v43  ;;  %v1172_v37 = vor.u32 %v1171_v31, %v1168_v30  ;;  %v476_v49 = vsel %vm2907_vm8, %v471_v41, %v475_v28  ;;  %v503_v58 = vrot.slane %v501_v48, 5  ;;  %v320_v18 = vshrl.u32 %v2715_v63, 16  ;;  %v2719_v31 = vld [vmem:[#allocation2 + $0x1c] ss:$0 sps:$4 sm:$0xff]  }
  0x2d   : > { %v2110_v54 = vcombine.low %v2928_v1, %v476_v49  ;;  %v484_v57 = vor.u32 %v483_v47, %v480_v46  ;;  %v323_v20 = vshll.u32 %v2715_v63, 16  ;;  %v3023_v62 = vsel %vm2839_vm5, %v371_v16, 0  ;;  %v2709_v16 = vld [vmem:[%s3404_s1 + $0x18] sm:$0xff]  }
  0x2e   : > { %2374 = vmatpush3.bf16.msra.mxu1 %v2694_v36  ;;  %v2989_v36 = vcombine.low %v2976_v29, %v2976_v29  ;;  %v1173_v45 = vrot.slane %v1172_v37, 4  ;;  %v327_v21 = vshrl.u32 %v2717_v7, 16  ;;  %v330_v22 = vshll.u32 %v2717_v7, 16 }
  0x2f   : > { %2470 = vmatpush3.bf16.msra.mxu0 %v2695_v43  ;;  %2375 = vmatprep.subr.bf16.mxu1 %v2696_v50  ;;  %v485_v2 = vrot.slane %v484_v57, 4  ;;  %v3032_v28 = vcombine.low %v3023_v62, %v3023_v62  ;;  %v3036_v30 = vcombine.high %v3023_v62, %v3023_v62  ;;  %v322_v34 = vrot.slane %v320_v18, 7 }
  0x30   : > { %2471 = vmatprep.subr.bf16.mxu0 %v2697_v56  ;;  %v492_v43 = vshrl.u32 %v2989_v36, 16  ;;  %v495_v44 = vshll.u32 %v2989_v36, 16  ;;  %2377 = vmatprep.mubr.bf16.mxu1 %v2110_v54  ;;  %v329_v37 = vrot.slane %v327_v21, 7  ;;  %v2155_v39 = vcombine.low %v2976_v29, %v3023_v62 }
  0x31   : > { %v506_v40 = vshrl.u32 %v3032_v28, 16  ;;  %v509_v41 = vshll.u32 %v3032_v28, 16  ;;  %v337_v46 = vshll.u32 %v2719_v31, 16 }
  0x32   : > { %2376 = vmatpush3.bf16.msra.mxu1 %v2696_v50  ;;  %v489_v50 = vrot.slane %v487_v42, 5  ;;  %v494_v51 = vrot.slane %v492_v43, 4  ;;  %v497_v53 = vrot.slane %v495_v44, 5  ;;  %v515_v42 = vshll.u32 %v3036_v30, 16 }
  0x33   : > { %2472 = vmatpush3.bf16.msra.mxu0 %v2697_v56  ;;  %2385 = vmatprep.subr.bf16.mxu1 %v2945_v6  ;;  %v3007_v56 = vsel %vm2907_vm8, %v1173_v45, %v1177_v32  ;;  %v334_v43 = vshrl.u32 %v2719_v31, 16  ;;  %v325_v44 = vor.u32 %v323_v20, %v322_v34  ;;  %v332_v45 = vor.u32 %v330_v22, %v329_v37  ;;  %v2706_v37 = vld [vmem:[%s3404_s1 + $0x148] sm:$0xff]  }
  0x34   : > { %2481 = vmatprep.subr.bf16.mxu0 %v2972_v24  ;;  %v2204_v59 = vcombine.low %v3007_v56, %v2928_v1  ;;  %v498_v60 = vor.u32 %v497_v53, %v494_v51  ;;  %v490_v55 = vsel %vm2907_vm8, %v485_v2, %v489_v50  ;;  %v508_v47 = vrot.slane %v506_v40, 4  ;;  %v2707_v51 = vld [vmem:[%s3404_s1 + $0x10] sm:$0xff]  }
  0x35   : > { %v2168_v27 = vcombine.low %v476_v49, %v490_v55  ;;  %v511_v48 = vrot.slane %v509_v41, 5  ;;  %v336_v49 = vrot.slane %v334_v43, 7  ;;  %v517_v50 = vrot.slane %v515_v42, 5 }
  0x36   : > { %v499_v15 = vrot.slane %v498_v60, 4  ;;  %v372_v53 = vsel %vm2835_vm4, 0, %v325_v44  ;;  %v373_v54 = vsel %vm2835_vm4, 0, %v332_v45 }
  0x37   : > { %2473 = vmatprep.mubr.bf16.mxu0 %v2168_v27  ;;  %v512_v57 = vor.u32 %v511_v48, %v508_v47  ;;  %v339_v60 = vor.u32 %v337_v46, %v336_v49  ;;  %v2708_v47 = vld [vmem:[%s3404_s1 + $0x150] sm:$0xff]  }
  0x38   : > { %v504_v26 = vsel %vm2907_vm8, %v499_v15, %v503_v58  ;;  %v3056_v58 = vsel %vm2839_vm5, %v372_v53, 0  ;;  %v2713_v53 = vld [vmem:[%s3404_s1 + $0x28] sm:$0xff]  }
  0x39   : > { %v3038_v32 = vcombine.low %v490_v55, %v504_v26  ;;  %v3064_v61 = vcombine.low %v3056_v58, %v3056_v58  ;;  %v3068_v63 = vcombine.high %v3056_v58, %v3056_v58  ;;  %v513_v15 = vrot.slane %v512_v57, 4 }
  0x3a   : > { %v374_v18 = vsel %vm2835_vm4, 0, %v339_v60  ;;  %v836_v60 = vrot.slane %v2940_v5, 5 }
  0x3b   : > { %2378 = vmatmul.mubr.bf16.vlgmr.msra.gmra.mrb[0].mxu1 %v3038_v32  ;;  %v520_v20 = vshrl.u32 %v3064_v61, 16  ;;  %v523_v55 = vshll.u32 %v3064_v61, 16  ;;  %v529_v21 = vshll.u32 %v3068_v63, 16  ;;  %v518_v27 = vsel %vm2907_vm8, %v513_v15, %v517_v50 }
  0x3c   : > { %2386 = vmatpush3.bf16.msra.mxu1 %v2945_v6  ;;  %v3060_v6 = vsel %vm2839_vm5, %v373_v54, 0  ;;  %v3093_v9 = vsel %vm2839_vm5, %v374_v18, 0  ;;  %v2169_v34 = vcombine.low %v504_v26, %v518_v27 }
  0x3d   : > { %2387 = vmatprep.subr.bf16.mxu1 %v2705_v13  ;;  %v3072_v2 = vcombine.low %v3060_v6, %v3060_v6  ;;  %v3076_v7 = vcombine.high %v3060_v6, %v3060_v6  ;;  %v522_v40 = vrot.slane %v520_v20, 4  ;;  %v525_v41 = vrot.slane %v523_v55, 5 }
  0x3e   : > { %v3100_v44 = vcombine.low %v3093_v9, %v3093_v9  ;;  %2474 = vmatmul.mubr.bf16.vlgmr.msra.gmra.mrb[0].mxu0 %v2169_v34  ;;  %v531_v45 = vrot.slane %v529_v21, 5  ;;  %v3107_v46 = vcombine.high %v3093_v9, %v3093_v9  ;;  %v2136_v55 = vrot.slane %v2980_v33, 9 }
  0x3f   : > { %v534_v22 = vshrl.u32 %v3072_v2, 16  ;;  %v543_v31 = vshll.u32 %v3076_v7, 16  ;;  %v526_v26 = vor.u32 %v525_v41, %v522_v40  ;;  %2482 = vmatpush3.bf16.msra.mxu0 %v2972_v24  ;;  %v2135_v24 = vrot.slane %v2936_v4, 9 }
  0x40   : > { %2388 = vmatpush3.bf16.msra.mxu1 %v2705_v13  ;;  %v537_v13 = vshll.u32 %v3072_v2, 16  ;;  %v548_v50 = vshrl.u32 %v3100_v44, 16  ;;  %2483 = vmatprep.subr.bf16.mxu0 %v2706_v37  ;;  %v557_v57 = vshll.u32 %v3107_v46, 16  ;;  %v840_v4 = vrot.slane %v2985_v35, 5  ;;  %v2716_v35 = vld [vmem:[%s3404_s1 + $0x30] sm:$0xff]  }
  0x41   : > { %2389 = vmatprep.subr.bf16.mxu1 %v2707_v51  ;;  %v536_v42 = vrot.slane %v534_v22, 4  ;;  %v545_v49 = vrot.slane %v543_v31, 5  ;;  %v527_v54 = vrot.slane %v526_v26, 4  ;;  %v2710_v31 = vld [vmem:[%s3404_s1 + $0x158] sm:$0xff]   ;;  %v2134_v41 = vrot.slane %v2866_v19, 9 }
  0x42   : > { %v539_v43 = vrot.slane %v537_v13, 5  ;;  %v550_v18 = vrot.slane %v548_v50, 4  ;;  %v559_v22 = vrot.slane %v557_v57, 5  ;;  %v2180_v26 = vrot.slane %v2949_v8, 9  ;;  %v2718_v57 = vld [vmem:[%s3404_s1 + $0x170] sm:$0xff]   ;;  %v2729_v13 = vld [vmem:[%s3404_s1 + $0x198] sm:$0xff]  }
  0x43   : > { %v532_v21 = vsel %vm2907_vm8, %v527_v54, %v531_v45  ;;  %2484 = vmatpush3.bf16.msra.mxu0 %v2706_v37  ;;  %v3148_v37 = vsel %vm3126_vm11, %v2136_v55, %v840_v4  ;;  %v832_v45 = vrot.slane %v2881_v25, 5  ;;  %v2720_v25 = vld [vmem:[%s3404_s1 + $0x38] sm:$0xff]   ;;  %v2157_v8 = vcombine.low %v3093_v9, %v2932_v3  ;;  %v2722_v54 = vld [vmem:[%s3404_s1 + $0x80] sm:$0xff]   ;;  %v2759_v3 = vld [vmem:[%s3404_s1 + $0x228] sm:$0xff]  }
  0x44   : > { %2390 = vmatpush3.bf16.msra.mxu1 %v2707_v51  ;;  %v540_v48 = vor.u32 %v539_v43, %v536_v42  ;;  %v551_v51 = vshll.u32 %v3100_v44, 16  ;;  %v3131_v5 = vcombine.low %v518_v27, %v532_v21  ;;  %2485 = vmatprep.subr.bf16.mxu0 %v2708_v47  ;;  %v3144_v27 = vsel %vm3126_vm11, %v2135_v24, %v836_v60  ;;  %v2724_v60 = vld [vmem:[%s3404_s1 + $0x88] sm:$0xff]   ;;  %v2721_v55 = vld [vmem:[%s3404_s1 + $0x178] sm:$0xff]  }
  0x45   : > { %2391 = vmatprep.subr.bf16.mxu1 %v2709_v16  ;;  %v2156_v42 = vcombine.low %v3056_v58, %v3060_v6  ;;  %v2181_v52 = vcombine.low %v3144_v27, %v3148_v37  ;;  %v2123_v24 = vcombine.low %v2967_v23, %v2976_v29  ;;  %v2139_v4 = vrot.slane %v3064_v61, 9  ;;  %v2745_v23 = vld [vmem:[%s3404_s1 + $0x1d8] sm:$0xff]   ;;  %v2758_v29 = vld [vmem:[%s3404_s1 + $0x220] sm:$0xff]  }
  0x46   : > { %v541_v15 = vrot.slane %v540_v48, 4  ;;  %v553_v20 = vrot.slane %v551_v51, 5  ;;  %2381 = vmatprep.mubr.bf16.mxu1 %v3131_v5  ;;  %v2712_v48 = vld [vmem:[%s3404_s1 + $0x160] sm:$0xff]   ;;  %v3180_v51 = vsel %vm3126_vm11, %v2134_v41, %v832_v45  ;;  %v2141_v41 = vrot.slane %v3100_v44, 9 }
  0x47   : > { %2486 = vmatpush3.bf16.msra.mxu0 %v2708_v47  ;;  %v1327_v47 = vrot.slane %v2953_v11, 5  ;;  %v2714_v11 = vld [vmem:[%s3404_s1 + $0x168] sm:$0xff]  }
  0x48   : > { %2392 = vmatpush3.bf16.msra.mxu1 %v2709_v16  ;;  %v546_v16 = vsel %vm2907_vm8, %v541_v15, %v545_v49  ;;  %v554_v33 = vor.u32 %v553_v20, %v550_v18  ;;  %2487 = vmatprep.subr.bf16.mxu0 %v2710_v31  ;;  %v2137_v15 = vrot.slane %v2989_v36, 9  ;;  %v844_v18 = vrot.slane %v2993_v38, 5 }
  0x49   : > { %2393 = vmatprep.subr.bf16.mxu1 %v2711_v10  ;;  %v2170_v34 = vcombine.low %v532_v21, %v546_v16  ;;  %v3176_v50 = vsel %vm3126_vm11, %v2180_v26, %v1327_v47  ;;  %v3202_v20 = vcombine.low %v3023_v62, %v3056_v58  ;;  %v2138_v21 = vrot.slane %v3032_v28, 9  ;;  %v2726_v28 = vld [vmem:[%s3404_s1 + $0x90] sm:$0xff]   ;;  %v2732_v26 = vld [vmem:[%s3404_s1 + $0xa8] sm:$0xff]  }
  0x4a   : > { %v555_v40 = vrot.slane %v554_v33, 4  ;;  %v852_v36 = vrot.slane %v3068_v63, 5  ;;  %v2140_v38 = vrot.slane %v3072_v2, 9  ;;  %v2723_v63 = vld [vmem:[%s3404_s1 + $0x180] sm:$0xff]   ;;  %v3232_v33 = vcombine.low %v3060_v6, %v3093_v9  ;;  %v2733_v47 = vld [vmem:[%s3404_s1 + $0x1a8] sm:$0xff]   ;;  %v2760_v62 = vld [vmem:[%s3404_s1 + $0x230] sm:$0xff]  }
  0x4b   : > { %2477 = vmatprep.mubr.bf16.mxu0 %v2170_v34  ;;  %2488 = vmatpush3.bf16.msra.mxu0 %v2710_v31  ;;  %v2142_v31 = vcombine.low %v3180_v51, %v3144_v27  ;;  %v2730_v27 = vld [vmem:[%s3404_s1 + $0xa0] sm:$0xff]  }
  0x4c   : > { %2394 = vmatpush3.bf16.msra.mxu1 %v2711_v10  ;;  %v560_v43 = vsel %vm2907_vm8, %v555_v40, %v559_v22  ;;  %v2122_v10 = vcombine.low %v2859_v17, %v2924_v0  ;;  %2489 = vmatprep.subr.bf16.mxu0 %v2712_v48  ;;  %v848_v22 = vrot.slane %v3036_v30, 5  ;;  %v845_v30 = vsel %vm3126_vm11, %v2137_v15, %v844_v18  ;;  %v2728_v40 = vld [vmem:[%s3404_s1 + $0x98] sm:$0xff]   ;;  %v2739_v15 = vld [vmem:[%s3404_s1 + $0x1c0] sm:$0xff]   ;;  %v2748_v0 = vld [vmem:[%s3404_s1 + $0xe8] sm:$0xff]  }
  0x4d   : > { %2395 = vmatprep.subr.bf16.mxu1 %v2713_v53  ;;  %v3162_v19 = vcombine.low %v546_v16, %v560_v43  ;;  %v2171_v49 = vcombine.low %v560_v43, %v3007_v56  ;;  %v856_v16 = vrot.slane %v3076_v7, 5  ;;  %v853_v2 = vsel %vm3126_vm11, %v2139_v4, %v852_v36  ;;  %v2743_v4 = vld [vmem:[%s3404_s1 + $0x1d0] sm:$0xff]   ;;  %v2752_v36 = vld [vmem:[%s3404_s1 + $0xf8] sm:$0xff]   ;;  %v2749_v17 = vld [vmem:[%s3404_s1 + $0x1e8] sm:$0xff]  }
  0x4e   : > { %v849_v61 = vsel %vm3126_vm11, %v2138_v21, %v848_v22  ;;  %v860_v43 = vrot.slane %v3107_v46, 5  ;;  %v2727_v46 = vld [vmem:[%s3404_s1 + $0x190] sm:$0xff]   ;;  %v2741_v21 = vld [vmem:[%s3404_s1 + $0x1c8] sm:$0xff]   ;;  %v2746_v22 = vld [vmem:[%s3404_s1 + $0xe0] sm:$0xff]  }
  0x4f   : > { %2382 = vmatmul.mubr.bf16.gmra.mrb[4].mxu1 %v3162_v19  ;;  %2478 = vmatmul.mubr.bf16.gmra.mrb[4].mxu0 %v2171_v49  ;;  %v3228_v7 = vsel %vm3126_vm11, %v2140_v38, %v856_v16  ;;  %v2182_v34 = vcombine.low %v845_v30, %v849_v61  ;;  %v2731_v49 = vld [vmem:[%s3404_s1 + $0x1a0] sm:$0xff]   ;;  %v2755_v38 = vld [vmem:[%s3404_s1 + $0x208] sm:$0xff]   ;;  %v2753_v16 = vld [vmem:[%s3404_s1 + $0x1f8] sm:$0xff]  }
  0x50   : > { %2396 = vmatpush3.bf16.msra.mxu1 %v2713_v53  ;;  %2401 = vmatprep.mubr.bf16.mxu1 %v2122_v10  ;;  %v2214_v53 = vcombine.low %v3176_v50, %v3180_v51  ;;  %v2725_v10 = vld [vmem:[%s3404_s1 + $0x188] sm:$0xff]   ;;  %v861_v44 = vsel %vm3126_vm11, %v2141_v41, %v860_v43 }
  0x51   : > { %2397 = vmatprep.subr.bf16.mxu1 %v2716_v35  ;;  %2497 = vmatprep.mubr.bf16.mxu0 %v2181_v52  ;;  %v2184_v45 = vcombine.low %v861_v44, %v3176_v50  ;;  %v2736_v52 = vld [vmem:[%s3404_s1 + $0xb8] sm:$0xff]   ;;  %v2145_v18 = vcombine.low %v3228_v7, %v861_v44 }
  0x52   : > { %2490 = vmatpush3.bf16.msra.mxu0 %v2712_v48  ;;  %v2734_v48 = vld [vmem:[%s3404_s1 + $0xb0] sm:$0xff]  }
  0x53   : > { %2491 = vmatprep.subr.bf16.mxu0 %v2714_v11 }
  0x54   : > { %2398 = vmatpush3.bf16.msra.mxu1 %v2716_v35  ;;  %v2183_v35 = vcombine.low %v853_v2, %v3228_v7  ;;  %v2223_v7 = vld [vmem:[%s3405_s2] ss:$0 sm:$0xff] }
  0x55   : > { %2399 = vmatprep.subr.bf16.mxu1 %v2720_v25 }
  0x56   : > { %2492 = vmatpush3.bf16.msra.mxu0 %v2714_v11  ;;  %v3277_v11 = vcombine.low %v3148_v37, %v845_v30  ;;  %v2737_v37 = vld [vmem:[%s3404_s1 + $0x1b8] sm:$0xff]  }
  0x57   : > { %2493 = vmatprep.subr.bf16.mxu0 %v2718_v57  ;;  %v2757_v30 = vld [vmem:[%s3404_s1 + $0x218] sm:$0xff]  }
  0x58   : > { %2400 = vmatpush3.bf16.msra.mxu1 %v2720_v25  ;;  %v2738_v25 = vld [vmem:[%s3404_s1 + $0xc0] sm:$0xff]  }
  0x59   : > { %2409 = vmatprep.subr.bf16.mxu1 %v2722_v54 }
  0x5a   : > { %2494 = vmatpush3.bf16.msra.mxu0 %v2718_v57  ;;  %v3282_v57 = vcombine.low %v849_v61, %v853_v2 }
  0x5b   : > { %2402 = vmatmul.mubr.bf16.vlgmr.msra.gmra.mrb[0].mxu1 %v2123_v24  ;;  %2495 = vmatprep.subr.bf16.mxu0 %v2721_v55 }
  0x5c   : > { %2410 = vmatpush3.bf16.msra.mxu1 %v2722_v54  ;;  %2405 = vmatprep.mubr.bf16.mxu1 %v3202_v20  ;;  %v2735_v54 = vld [vmem:[%s3404_s1 + $0x1b0] sm:$0xff]  }
  0x5d   : > { %2411 = vmatprep.subr.bf16.mxu1 %v2724_v60 }
  0x5e   : > { %2496 = vmatpush3.bf16.msra.mxu0 %v2721_v55  ;;  %v2744_v55 = vld [vmem:[%s3404_s1 + $0xd8] sm:$0xff]  }
  0x5f   : > { %2505 = vmatprep.subr.bf16.mxu0 %v2723_v63 }
  0x60   : > { %2412 = vmatpush3.bf16.msra.mxu1 %v2724_v60  ;;  %v2742_v60 = vld [vmem:[%s3404_s1 + $0xd0] sm:$0xff]  }
  0x61   : > { %2413 = vmatprep.subr.bf16.mxu1 %v2726_v28  ;;  %2498 = vmatmul.mubr.bf16.vlgmr.msra.gmra.mrb[0].mxu0 %v2182_v34 }
  0x62   : > { %2506 = vmatpush3.bf16.msra.mxu0 %v2723_v63  ;;  %2501 = vmatprep.mubr.bf16.mxu0 %v2183_v35 }
  0x63   : > { %2406 = vmatmul.mubr.bf16.gmra.mrb[4].mxu1 %v3232_v33  ;;  %2507 = vmatprep.subr.bf16.mxu0 %v2725_v10 }
  0x64   : > { %2414 = vmatpush3.bf16.msra.mxu1 %v2726_v28  ;;  %2425 = vmatprep.mubr.bf16.mxu1 %v2142_v31  ;;  %v2756_v28 = vld [vmem:[%s3404_s1 + $0x210] sm:$0xff]  }
  0x65   : > { %2415 = vmatprep.subr.bf16.mxu1 %v2728_v40 }
  0x66   : > { %2508 = vmatpush3.bf16.msra.mxu0 %v2725_v10 }
  0x67   : > { %2509 = vmatprep.subr.bf16.mxu0 %v2727_v46 }
  0x68   : > { %2416 = vmatpush3.bf16.msra.mxu1 %v2728_v40 }
  0x69   : > { %2417 = vmatprep.subr.bf16.mxu1 %v2730_v27  ;;  %2502 = vmatmul.mubr.bf16.gmra.mrb[4].mxu0 %v2184_v45 }
  0x6a   : > { %2510 = vmatpush3.bf16.msra.mxu0 %v2727_v46  ;;  %2521 = vmatprep.mubr.bf16.mxu0 %v2123_v24  ;;  %v2740_v24 = vld [vmem:[%s3404_s1 + $0xc8] sm:$0xff]  }
  0x6b   : > { %2511 = vmatprep.subr.bf16.mxu0 %v2729_v13 }
  0x6c   : > { %2418 = vmatpush3.bf16.msra.mxu1 %v2730_v27 }
  0x6d   : > { %2419 = vmatprep.subr.bf16.mxu1 %v2732_v26 }
  0x6e   : > { %2512 = vmatpush3.bf16.msra.mxu0 %v2729_v13 }
  0x6f   : > { %2513 = vmatprep.subr.bf16.mxu0 %v2731_v49 }
  0x70   : > { %2420 = vmatpush3.bf16.msra.mxu1 %v2732_v26 }
  0x71   : > { %2421 = vmatprep.subr.bf16.mxu1 %v2734_v48 }
  0x72   : > { %2514 = vmatpush3.bf16.msra.mxu0 %v2731_v49 }
  0x73   : > { %2515 = vmatprep.subr.bf16.mxu0 %v2733_v47 }
  0x74   : > { %2422 = vmatpush3.bf16.msra.mxu1 %v2734_v48 }
  0x75   : > { %2423 = vmatprep.subr.bf16.mxu1 %v2736_v52 }
  0x76   : > { %2516 = vmatpush3.bf16.msra.mxu0 %v2733_v47 }
  0x77   : > { %2517 = vmatprep.subr.bf16.mxu0 %v2735_v54 }
  0x78   : > { %2424 = vmatpush3.bf16.msra.mxu1 %v2736_v52 }
  0x79   : > { %2433 = vmatprep.subr.bf16.mxu1 %v2738_v25 }
  0x7a   : > { %2518 = vmatpush3.bf16.msra.mxu0 %v2735_v54 }
  0x7b   : > { %2426 = vmatmul.mubr.bf16.vlgmr.msra.gmra.mrb[0].mxu1 %v3277_v11  ;;  %2519 = vmatprep.subr.bf16.mxu0 %v2737_v37 }
  0x7c   : > { %2434 = vmatpush3.bf16.msra.mxu1 %v2738_v25  ;;  %2429 = vmatprep.mubr.bf16.mxu1 %v3282_v57 }
  0x7d   : > { %2435 = vmatprep.subr.bf16.mxu1 %v2740_v24 }
  0x7e   : > { %2520 = vmatpush3.bf16.msra.mxu0 %v2737_v37 }
  0x7f   : > { %2529 = vmatprep.subr.bf16.mxu0 %v2739_v15 }
  0x80   : > { %2436 = vmatpush3.bf16.msra.mxu1 %v2740_v24 }
  0x81   : > { %2437 = vmatprep.subr.bf16.mxu1 %v2742_v60  ;;  %2522 = vmatmul.mubr.bf16.vlgmr.msra.gmra.mrb[0].mxu0 %v3202_v20  ;;  %v2747_v20 = vld [vmem:[%s3404_s1 + $0x1e0] sm:$0xff]  }
  0x82   : > { %2530 = vmatpush3.bf16.msra.mxu0 %v2739_v15  ;;  %2525 = vmatprep.mubr.bf16.mxu0 %v3232_v33 }
  0x83   : > { %2430 = vmatmul.mubr.bf16.gmra.mrb[4].mxu1 %v2145_v18  ;;  %2531 = vmatprep.subr.bf16.mxu0 %v2741_v21 }
  0x84   : > { %2438 = vmatpush3.bf16.msra.mxu1 %v2742_v60  ;;  %2449 = vmatprep.mubr.bf16.mxu1 %v2154_v14  ;;  %v2750_v14 = vld [vmem:[%s3404_s1 + $0xf0] sm:$0xff]  }
  0x85   : > { %2439 = vmatprep.subr.bf16.mxu1 %v2744_v55 }
  0x86   : > { %2532 = vmatpush3.bf16.msra.mxu0 %v2741_v21 }
  0x87   : > { %2533 = vmatprep.subr.bf16.mxu0 %v2743_v4 }
  0x88   : > { %2440 = vmatpush3.bf16.msra.mxu1 %v2744_v55 }
  0x89   : > { %2441 = vmatprep.subr.bf16.mxu1 %v2746_v22  ;;  %2526 = vmatmul.mubr.bf16.gmra.mrb[4].mxu0 %v2193_v12  ;;  %v2754_v12 = vld [vmem:[%s3404_s1 + $0x200] sm:$0xff]  }
  0x8a   : > { %2534 = vmatpush3.bf16.msra.mxu0 %v2743_v4  ;;  %2545 = vmatprep.mubr.bf16.mxu0 %v3038_v32  ;;  %v2751_v32 = vld [vmem:[%s3404_s1 + $0x1f0] sm:$0xff]  }
  0x8b   : > { %2535 = vmatprep.subr.bf16.mxu0 %v2745_v23 }
  0x8c   : > { %2442 = vmatpush3.bf16.msra.mxu1 %v2746_v22 }
  0x8d   : > { %2443 = vmatprep.subr.bf16.mxu1 %v2748_v0 }
  0x8e   : > { %2536 = vmatpush3.bf16.msra.mxu0 %v2745_v23 }
  0x8f   : > { %2537 = vmatprep.subr.bf16.mxu0 %v2747_v20 }
  0x90   : > { %2444 = vmatpush3.bf16.msra.mxu1 %v2748_v0 }
  0x91   : > { %2445 = vmatprep.subr.bf16.mxu1 %v2750_v14 }
  0x92   : > { %2538 = vmatpush3.bf16.msra.mxu0 %v2747_v20 }
  0x93   : > { %2539 = vmatprep.subr.bf16.mxu0 %v2749_v17 }
  0x94   : > { %2446 = vmatpush3.bf16.msra.mxu1 %v2750_v14 }
  0x95   : > { %2447 = vmatprep.subr.bf16.mxu1 %v2752_v36 }
  0x96   : > { %2540 = vmatpush3.bf16.msra.mxu0 %v2749_v17 }
  0x97   : > { %2541 = vmatprep.subr.bf16.mxu0 %v2751_v32 }
  0x98   : > { %2448 = vmatpush3.bf16.msra.mxu1 %v2752_v36 }
  0x99   : > { %2577 = vmatprep.subr.bf16.mxu1 %v2754_v12 }
  0x9a   : > { %2542 = vmatpush3.bf16.msra.mxu0 %v2751_v32 }
  0x9b   : > { %2450 = vmatmul.mubr.bf16.vlgmr.msra.gmra.mrb[0].mxu1 %v2155_v39  ;;  %2543 = vmatprep.subr.bf16.mxu0 %v2753_v16  ;;  %v2761_v39 = vld [vmem:[%s3404_s1 + $0x238] sm:$0xff]  }
  0x9c   : > { %2585 = vmatpush3.bf16.msra.mxu1 %v2754_v12  ;;  %2453 = vmatprep.mubr.bf16.mxu1 %v2156_v42 }
  0x9d   : > { %2578 = vmatprep.subr.bf16.mxu1 %v2755_v38 }
  0x9e   : > { %2544 = vmatpush3.bf16.msra.mxu0 %v2753_v16 }
  0x9f   : > { %2553 = vmatprep.subr.bf16.mxu0 %v2754_v12 }
  0xa0   : > { %2586 = vmatpush3.bf16.msra.mxu1 %v2755_v38 }
  0xa1   : > { %2579 = vmatprep.subr.bf16.mxu1 %v2756_v28  ;;  %2546 = vmatmul.mubr.bf16.vlgmr.msra.gmra.mrb[0].mxu0 %v3131_v5 }
  0xa2   : > { %2554 = vmatpush3.bf16.msra.mxu0 %v2754_v12  ;;  %2549 = vmatprep.mubr.bf16.mxu0 %v3162_v19 }
  0xa3   : > { %2454 = vmatmul.mubr.bf16.gmra.mrb[4].mxu1 %v2157_v8  ;;  %2555 = vmatprep.subr.bf16.mxu0 %v2755_v38 }
  0xa4   : > { %2587 = vmatpush3.bf16.msra.mxu1 %v2756_v28  ;;  %2573 = vmatprep.mubr.bf16.mxu1 %v2145_v18 }
  0xa5   : > { %2580 = vmatprep.subr.bf16.mxu1 %v2757_v30 }
  0xa6   : > { %2556 = vmatpush3.bf16.msra.mxu0 %v2755_v38 }
  0xa7   : > { %2557 = vmatprep.subr.bf16.mxu0 %v2756_v28 }
  0xa8   : > { %2588 = vmatpush3.bf16.msra.mxu1 %v2757_v30 }
  0xa9   : > { %2581 = vmatprep.subr.bf16.mxu1 %v2758_v29  ;;  %2550 = vmatmul.mubr.bf16.gmra.mrb[4].mxu0 %v2204_v59 }
  0xaa   : > { %2558 = vmatpush3.bf16.msra.mxu0 %v2756_v28  ;;  %2569 = vmatprep.mubr.bf16.mxu0 %v3277_v11 }
  0xab   : > { %2559 = vmatprep.subr.bf16.mxu0 %v2757_v30 }
  0xac   : > { %2589 = vmatpush3.bf16.msra.mxu1 %v2758_v29 }
  0xad   : > { %2582 = vmatprep.subr.bf16.mxu1 %v2759_v3 }
  0xae   : > { %2560 = vmatpush3.bf16.msra.mxu0 %v2757_v30 }
  0xaf   : > { %2561 = vmatprep.subr.bf16.mxu0 %v2758_v29 }
  0xb0   : > { %2590 = vmatpush3.bf16.msra.mxu1 %v2759_v3 }
  0xb1   : > { %2583 = vmatprep.subr.bf16.mxu1 %v2760_v62 }
  0xb2   : > { %2562 = vmatpush3.bf16.msra.mxu0 %v2758_v29 }
  0xb3   : > { %2563 = vmatprep.subr.bf16.mxu0 %v2759_v3 }
  0xb4   : > { %2591 = vmatpush3.bf16.msra.mxu1 %v2760_v62 }
  0xb5   : > { %2584 = vmatprep.subr.bf16.mxu1 %v2761_v39 }
  0xb6   : > { %2564 = vmatpush3.bf16.msra.mxu0 %v2759_v3 }
  0xb7   : > { %2565 = vmatprep.subr.bf16.mxu0 %v2760_v62 }
  0xb8   : > { %2592 = vmatpush3.bf16.msra.mxu1 %v2761_v39 }
  0xba   : > { %2566 = vmatpush3.bf16.msra.mxu0 %v2760_v62 }
  0xbb   : > { %2574 = vmatmul.mubr.bf16.vlgmr.msra.gmra.mrb[8].mxu1 %v2214_v53  ;;  %2567 = vmatprep.subr.bf16.mxu0 %v2761_v39 }
  0xbe   : > { %2568 = vmatpush3.bf16.msra.mxu0 %v2761_v39 }
  0xc1   : > { %2570 = vmatmul.mubr.bf16.vlgmr.msra.gmra.mrb[0].mxu0 %v3282_v57 }
 0x16e   : > { %v2451_v1 = vpop.f32.mrb[0].mxu1 }
 0x16f   : > { %v1123_v56 = vpop.f32.mrb[1].mxu1 }
 0x170   : > { %v2452_v59 = vpop.f32.mrb[2].mxu1 }
 0x171   : > { %v1126_v58 = vpop.f32.mrb[3].mxu1 }
 0x176   : > { %v2455_v6 = vpop.f32.mrb[4].mxu1 }
 0x177   : > { %v1139_v9 = vpop.f32.mrb[5].mxu1 }
 0x178   : > { %v2456_v5 = vpop.f32.mrb[6].mxu1 }
 0x179   : > { %v1142_v42 = vpop.f32.mrb[7].mxu1 }
 0x17c   : > { %v2551_v19 = vpop.f32.mrb[4].mxu0 }
 0x17d   : > { %v2597_v8 = vadd.f32 %v2551_v19, %v2455_v6  ;;  %v1750_v61 = vpop.f32.mrb[5].mxu0 }
 0x17e   : > { %v2599_v63 = vadd.f32 %v1750_v61, %v1139_v9  ;;  %v2552_v2 = vpop.f32.mrb[6].mxu0 }
 0x17f   : > { %v2601_v50 = vadd.f32 %v2552_v2, %v2456_v5  ;;  %v1753_v51 = vpop.f32.mrb[7].mxu0 }
 0x180   : > { %v2603_v53 = vadd.f32 %v1753_v51, %v1142_v42 }
 0x18e   : > { %v2575_v33 = vpop.f32.mrb[8].mxu1 }
 0x18f   : > { %v2598_v31 = vadd.f32 %v2597_v8, %v2575_v33  ;;  %v1894_v34 = vpop.f32.mrb[9].mxu1 }
 0x190   : > { %v2600_v40 = vadd.f32 %v2599_v63, %v1894_v34  ;;  %v2576_v35 = vpop.f32.mrb[10].mxu1 }
 0x191   : > { %v1930_v41 = vadd.f32 %v2598_v31, %v2223_v7  ;;  %v2602_v43 = vadd.f32 %v2601_v50, %v2576_v35  ;;  %v1897_v10 = vpop.f32.mrb[11].mxu1 }
 0x192   : > { %v1928_v27 = vadd.f32 %v2600_v40, %v2223_v7  ;;  %v2604_v44 = vadd.f32 %v2603_v53, %v1897_v10 }
 0x193   : > { %v1946_v46 = vmul.f32 0.01, %v1930_v41  ;;  %v1931_v26 = vadd.f32 %v2602_v43, %v2223_v7  ;;  %vm1938_vm12 = vcmp.ge.f32.partialorder %v1930_v41, 0.0 }
 0x194   : > { %v1944_v45 = vmul.f32 0.01, %v1928_v27  ;;  %v1929_v13 = vadd.f32 %v2604_v44, %v2223_v7  ;;  %vm1936_vm13 = vcmp.ge.f32.partialorder %v1928_v27, 0.0  ;;  %v2571_v25 = vpop.f32.mrb[0].mxu0 }
 0x195   : > { %vm1939_vm14 = vcmp.ge.f32.partialorder %v1931_v26, 0.0  ;;  %v1947_v48 = vmul.f32 0.01, %v1931_v26  ;;  %v1954_v52 = vsel %vm1938_vm12, %v1930_v41, %v1946_v46  ;;  %v2593_v24 = vadd.f32 %v2571_v25, %v2451_v1  ;;  %v1878_v37 = vpop.f32.mrb[1].mxu0 }
 0x196   : > { %vm1937_vm15 = vcmp.ge.f32.partialorder %v1929_v13, 0.0  ;;  %v1945_v49 = vmul.f32 0.01, %v1929_v13  ;;  %v1952_v11 = vsel %vm1936_vm13, %v1928_v27, %v1944_v45  ;;  %v2594_v15 = vadd.f32 %v1878_v37, %v1123_v56  ;;  %v2572_v18 = vpop.f32.mrb[2].mxu0 }
 0x197   : > { %v1955_v47 = vsel %vm1939_vm14, %v1931_v26, %v1947_v48  ;;  %v1926_v55 = vadd.f32 %v2593_v24, %v2223_v7  ;;  %v2595_v21 = vadd.f32 %v2572_v18, %v2452_v59  ;;  %v1881_v22 = vpop.f32.mrb[3].mxu0 }
 0x198   : > { %v2248_v54 = vpack.c.bf16 %v1955_v47, %v1954_v52  ;;  %v1953_v57 = vsel %vm1937_vm15, %v1929_v13, %v1945_v49  ;;  %v1924_v4 = vadd.f32 %v2594_v15, %v2223_v7  ;;  %v2596_v0 = vadd.f32 %v1881_v22, %v1126_v58 }
 0x199   : > { %v2243_v60 = vpack.c.bf16 %v1953_v57, %v1952_v11  ;;  %v1942_v23 = vmul.f32 0.01, %v1926_v55  ;;  %v1927_v14 = vadd.f32 %v2595_v21, %v2223_v7  ;;  %vm1934_vm0 = vcmp.ge.f32.partialorder %v1926_v55, 0.0 }
 0x19a   : > { %2252 = vst [vmem:[%s2833_s23 + $0x18] sm:$0xff] %v2248_v54   ;;  %v1940_v20 = vmul.f32 0.01, %v1924_v4  ;;  %v1925_v36 = vadd.f32 %v2596_v0, %v2223_v7  ;;  %vm1932_vm1 = vcmp.ge.f32.partialorder %v1924_v4, 0.0 }
 0x19b   : > { %2251 = vst [vmem:[%s2833_s23 + $0x10] sm:$0xff] %v2243_v60   ;;  %vm1935_vm2 = vcmp.ge.f32.partialorder %v1927_v14, 0.0  ;;  %v1943_v17 = vmul.f32 0.01, %v1927_v14  ;;  %v1950_v32 = vsel %vm1934_vm0, %v1926_v55, %v1942_v23 }
 0x19c   : > { %vm1933_vm3 = vcmp.ge.f32.partialorder %v1925_v36, 0.0  ;;  %v1941_v12 = vmul.f32 0.01, %v1925_v36  ;;  %v1948_v16 = vsel %vm1932_vm1, %v1924_v4, %v1940_v20 }
 0x19d   : > { %v1951_v38 = vsel %vm1935_vm2, %v1927_v14, %v1943_v17 }
 0x19e   : > { %v2238_v28 = vpack.c.bf16 %v1951_v38, %v1950_v32  ;;  %v1949_v30 = vsel %vm1933_vm3, %v1925_v36, %v1941_v12 }
 0x19f   : > { %v2233_v29 = vpack.c.bf16 %v1949_v30, %v1948_v16 }
 0x1a0   : > { %2250 = vst [vmem:[%s2833_s23 + $0x8] sm:$0xff] %v2238_v28  }
 0x1a1   : > { %2234 = vst [vmem:[%s2833_s23] sm:$0xff] %v2233_v29  }
 0x1a2 PF: > { %s13_s14 = sadd.s32 1, %s2786_s14   ;;  %s3415_s12 = smov %s2782_s13 }
 0x1a3   : > { %p10_p5 = scmp.ge.s32.totalorder %s13_s14, 4   ;;  %s3416_s13 = smov %s3418_s15 }
 0x1a5   :  { %12 = sbr.rel (!%p10_p5) target bundleno = 2 (0x2), region = 106 }
 0x1ac   :  { %2002 = vsyncmov [#allocation3] }
 0x1af   :  { %s2003_s5 = vpop.sfrf %2002 }
 0x1b0   :  { %p2226_p6 = scmp.ne.s32.totalorder %s2003_s5, 0 }
 0x1b2   :  { %2007 = shalt.err (%p2226_p6)  }
 0x1b3   :  { %2009 = vsyncmov [#allocation3 + $0x1] }
 0x1b6   :  { %s2010_s6 = vpop.sfrf %2009 }
 0x1b7   :  { %p2227_p7 = scmp.ne.s32.totalorder %s2010_s6, 0 }
 0x1b9   :  { %2014 = shalt.err (%p2227_p7)  }

// kernel: scale_module_forward.5
= control target key start
LH: loop header
LB: loop body
LE: loop exit
PB: predicated region body
PF: predicated region fallthrough
CT: control target
= control target key end

     0   :  { %s5161_s15 = smov 0   ;;  %s5163_s16 = smov 0   ;;  %s6283_s0 = inlined_call_operand.vmem [shape: bf16[2,16,16,128], index: 0, kind: input, shape index: {}]   ;;  %s6284_s1 = inlined_call_operand.vmem [shape: bf16[1152,128], index: 1, kind: input, shape index: {}]   ;;  %s6285_s2 = inlined_call_operand.vmem [shape: f32[1,128], index: 2, kind: input, shape index: {}]   ;;  %s6286_s3 = inlined_call_operand.vmem [shape: bf16[2,16,16,128], index: 3, kind: input, shape index: {}]   ;;  %s6287_s4 = inlined_call_operand.vmem [shape: f32[2,16,16,128], index: 4, kind: output, shape index: {}]  }
   0x1   :  { %s5165_s17 = smov 0  }
   0x2 LB: > { %s26_s18 = sadd.s32 1, %s5129_s16  ;;  %p3741_p0 = scmp.ge.s32.totalorder %s5133_s17, 1  ;;  %s5133_s17 = sphi %s5165_s17, %s14_s17   ;;  %s5129_s16 = sphi %s5163_s16, %s6371_s16   ;;  %s5125_s15 = sphi %s5161_s15, %s6370_s15  }
   0x3   : > { %p28_p1 = scmp.ge.s32.totalorder %s26_s18, 2  ;;  %p160_p2 = scmp.lt.s32.totalorder %s5133_s17, 3 }
   0x5   : > { %s6373_s18 = smov (%p28_p1, %s26_s18), 0  ;;  %p161_p3 = pnand %p3741_p0, %p160_p2 }
   0x7   : > { %164 = sbr.rel (%p161_p3) target bundleno = 605 (0x25d), region = 32 }
   0xe   : > { %p195_p4 = scmp.lt.s32.totalorder %s5125_s15, 1  ;;  %s3876_s19 = sshll.u32 %s5125_s15, 7 }
   0xf   : > { %s235_s22 = scalar_lea.vmem %s6283_s0, %s3876_s19 }
  0x10   : > { %s6375_s15 = smov (!%p195_p4, %s5125_s15), 1  ;;  %v5182_v0 = vld [vmem:[%s235_s22] sm:$0xff]  ;;  %v5184_v1 = vld [vmem:[%s235_s22 + $0x8] sm:$0xff]  ;;  %v5186_v2 = vld [vmem:[%s235_s22 + $0x10] sm:$0xff] }
  0x11   : > { %6321 = vst [vmem:[#allocation6_spill] sm:$0xff] %v5182_v0  ;;  %6322 = vst [vmem:[#allocation7_spill] sm:$0xff] %v5184_v1  ;;  %v5188_v3 = vld [vmem:[%s235_s22 + $0x18] sm:$0xff]  ;;  %v5190_v4 = vld [vmem:[%s235_s22 + $0x20] sm:$0xff]  ;;  %s3874_s23 = sshll.u32 %s6375_s15, 7  ;;  %s3875_s24 = sshll.u32 %s6375_s15, 8 }
  0x12   : > { %6323 = vst [vmem:[#allocation8_spill] sm:$0xff] %v5186_v2  ;;  %6324 = vst [vmem:[#allocation9_spill] sm:$0xff] %v5188_v3  ;;  %v5192_v5 = vld [vmem:[%s235_s22 + $0x28] sm:$0xff]  ;;  %v5194_v6 = vld [vmem:[%s235_s22 + $0x30] sm:$0xff]  ;;  %s5203_s27 = scalar_lea.vmem %s6286_s3, %s3874_s23  ;;  %s5208_s30 = scalar_lea.vmem %s6287_s4, %s3875_s24 }
  0x13   : > { %6325 = vst [vmem:[#allocation10_spill] sm:$0xff] %v5190_v4  ;;  %6326 = vst [vmem:[#allocation11_spill] sm:$0xff] %v5192_v5  ;;  %v5196_v7 = vld [vmem:[%s235_s22 + $0x38] sm:$0xff]  ;;  %v5198_v8 = vld [vmem:[%s235_s22 + $0x40] sm:$0xff] }
  0x14   : > { %6327 = vst [vmem:[#allocation12_spill] sm:$0xff] %v5194_v6  ;;  %6328 = vst [vmem:[#allocation13_spill] sm:$0xff] %v5196_v7  ;;  %v5210_v9 = vld [vmem:[%s235_s22 + $0x48] sm:$0xff]  ;;  %v5212_v10 = vld [vmem:[%s235_s22 + $0x50] sm:$0xff] }
  0x15   : > { %6329 = vst [vmem:[#allocation14_spill] sm:$0xff] %v5198_v8  ;;  %6330 = vst [vmem:[#allocation15_spill] sm:$0xff] %v5210_v9  ;;  %v5214_v11 = vld [vmem:[%s235_s22 + $0x58] sm:$0xff]  ;;  %v5216_v12 = vld [vmem:[%s235_s22 + $0x60] sm:$0xff] }
  0x16   : > { %6331 = vst [vmem:[#allocation16_spill] sm:$0xff] %v5212_v10  ;;  %6332 = vst [vmem:[#allocation17_spill] sm:$0xff] %v5214_v11  ;;  %v5218_v13 = vld [vmem:[%s235_s22 + $0x68] sm:$0xff]  ;;  %v5220_v14 = vld [vmem:[%s235_s22 + $0x70] sm:$0xff] }
  0x17   : > { %6333 = vst [vmem:[#allocation18_spill] sm:$0xff] %v5216_v12  ;;  %6334 = vst [vmem:[#allocation19_spill] sm:$0xff] %v5218_v13  ;;  %v5222_v15 = vld [vmem:[%s235_s22 + $0x78] sm:$0xff] }
  0x18   : > { %6335 = vst [vmem:[#allocation20_spill] sm:$0xff] %v5220_v14 }
  0x19   : > { %312 = vsyncadd [#allocation3], 2048 }
  0x1a   : > { %5121 = dma.done.wait [#allocation3], 2048 }
  0x1b   : > { %5122 = vsyncadd [#allocation3], 4294965248  ;;  %vm524_vm0 = vcmask 1040384   ;;  %vm525_vm1 = vsmask.f32 256  ;;  %v5135_v16 = vmov 0  }
  0x1c   : > { %v365_v17 = vrot.slane %v5135_v16, 7  ;;  %vm5224_vm2 = vmand %vm524_vm0, %vm525_vm1  ;;  %v370_v19 = vshrl.u32 %v5182_v0, 16  ;;  %v373_v20 = vshll.u32 %v5182_v0, 16  ;;  %vm579_vm3 = vsmask.f32 7424  ;;  %v4901_v33 = vld [vmem:[%s6284_s1 + $0x40] sm:$0xff]  }
  0x1d   : > { %v377_v32 = vshrl.u32 %v5184_v1, 16  ;;  %v4902_v35 = vld [vmem:[%s6284_s1 + $0x100] sm:$0xff]   ;;  %4172 = vmatprep.subr.bf16.mxu1 %v4901_v33  ;;  %v4903_v38 = vld [vmem:[%s6284_s1 + $0x48] sm:$0xff]   ;;  %v4905_v43 = vld [vmem:[%s6284_s1 + $0x50] sm:$0xff]   ;;  %v384_v47 = vshrl.u32 %v5186_v2, 16  ;;  %v380_v49 = vshll.u32 %v5184_v1, 16 }
  0x1e   : > { %v5232_v21 = vsel %vm5224_vm2, 0, %v365_v17  ;;  %v5236_v22 = vsel %vm5224_vm2, %v365_v17, 0  ;;  %v372_v23 = vrot.slane %v370_v19, 7  ;;  %4364 = vmatprep.subr.bf16.mxu0 %v4902_v35  ;;  %4173 = vmatpush3.bf16.msra.mxu1 %v4901_v33  ;;  %v4904_v40 = vld [vmem:[%s6284_s1 + $0x108] sm:$0xff]   ;;  %v4906_v45 = vld [vmem:[%s6284_s1 + $0x110] sm:$0xff]   ;;  %v4907_v50 = vld [vmem:[%s6284_s1 + $0x58] sm:$0xff]  }
  0x1f   : > { %v581_v24 = vshrl.u32 %v5232_v21, 16  ;;  %v583_v25 = vshll.u32 %v5232_v21, 16  ;;  %v588_v26 = vshll.u32 %v5236_v22, 16  ;;  %4365 = vmatpush3.bf16.msra.mxu0 %v4902_v35  ;;  %4174 = vmatprep.subr.bf16.mxu1 %v4903_v38  ;;  %v379_v48 = vrot.slane %v377_v32, 7  ;;  %v4908_v52 = vld [vmem:[%s6284_s1 + $0x118] sm:$0xff]   ;;  %v4909_v57 = vld [vmem:[%s6284_s1 + $0x60] sm:$0xff]  }
  0x20   : > { %v375_v27 = vor.u32 %v373_v20, %v372_v23  ;;  %v5243_v28 = vsel %vm5224_vm2, %v372_v23, 0  ;;  %4366 = vmatprep.subr.bf16.mxu0 %v4904_v40  ;;  %v386_v53 = vrot.slane %v384_v47, 7  ;;  %v387_v54 = vshll.u32 %v5186_v2, 16  ;;  %v4910_v58 = vld [vmem:[%s6284_s1 + $0x120] sm:$0xff]   ;;  %v4911_v62 = vld [vmem:[%s6284_s1 + $0x68] sm:$0xff]   ;;  %v4913_v23 = vld [vmem:[%s6284_s1 + $0x70] sm:$0xff]  }
  0x21   : > { %v585_v29 = vrot.slane %v583_v25, 1  ;;  %v590_v30 = vrot.slane %v588_v26, 1  ;;  %v600_v31 = vshll.u32 %v5243_v28, 16  ;;  %v382_v55 = vor.u32 %v380_v49, %v379_v48  ;;  %v4912_v16 = vld [vmem:[%s6284_s1 + $0x128] sm:$0xff]   ;;  %v4915_v35 = vld [vmem:[%s6284_s1 + $0x78] sm:$0xff]   ;;  %v4949_v18 = vld [vmem:[%s6284_s1 + $0xb0] sm:$0xff]  }
  0x22   : > { %v5252_v34 = vsel %vm5224_vm2, 0, %v375_v27  ;;  %4175 = vmatpush3.bf16.msra.mxu1 %v4903_v38  ;;  %v391_v56 = vshrl.u32 %v5188_v3, 16  ;;  %v389_v59 = vor.u32 %v387_v54, %v386_v53  ;;  %v5304_v63 = vsel %vm5224_vm2, %v379_v48, 0  ;;  %v4914_v27 = vld [vmem:[%s6284_s1 + $0x130] sm:$0xff]   ;;  %v4917_v54 = vld [vmem:[%s6284_s1] sm:$0xff]   ;;  %v4936_v0 = vld [vmem:[%s6284_s1 + $0x198] sm:$0xff]  }
  0x23   : > { %v586_v36 = vor.u32 %v585_v29, %v581_v24  ;;  %v593_v37 = vshrl.u32 %v5252_v34, 16  ;;  %v595_v39 = vshll.u32 %v5252_v34, 16  ;;  %v602_v42 = vrot.slane %v600_v31, 1  ;;  %4367 = vmatpush3.bf16.msra.mxu0 %v4904_v40  ;;  %4176 = vmatprep.subr.bf16.mxu1 %v4905_v43 }
  0x24   : > { %4368 = vmatprep.subr.bf16.mxu0 %v4906_v45  ;;  %v5297_v60 = vsel %vm5224_vm2, 0, %v382_v55  ;;  %v393_v61 = vrot.slane %v391_v56, 7  ;;  %v5313_v20 = vsel %vm5224_vm2, 0, %v389_v59  ;;  %v612_v24 = vshll.u32 %v5304_v63, 16  ;;  %v4918_v59 = vld [vmem:[%s6284_s1 + $0x140] sm:$0xff]  }
  0x25   : > { %v5266_v41 = vsel %vm579_vm3, %v586_v36, %v590_v30  ;;  %v597_v44 = vrot.slane %v595_v39, 1  ;;  %v605_v17 = vshrl.u32 %v5297_v60, 16  ;;  %v607_v19 = vshll.u32 %v5297_v60, 16 }
  0x26   : > { %6338 = vst [vmem:[#allocation21_spill] sm:$0xff] %v5266_v41  ;;  %4188 = vmatprep.mubr.bf16.mxu1 %v5266_v41  ;;  %4177 = vmatpush3.bf16.msra.mxu1 %v4905_v43  ;;  %v5321_v25 = vsel %vm5224_vm2, %v386_v53, 0  ;;  %v394_v26 = vshll.u32 %v5188_v3, 16  ;;  %v619_v29 = vshll.u32 %v5313_v20, 16  ;;  %v398_v32 = vshrl.u32 %v5190_v4, 16  ;;  %v5563_v3 = vld [vmem:[%s6284_s1 + $0x80] sm:$0xff]  }
  0x27   : > { %v598_v46 = vor.u32 %v597_v44, %v593_v37  ;;  %4369 = vmatpush3.bf16.msra.mxu0 %v4906_v45  ;;  %4178 = vmatprep.subr.bf16.mxu1 %v4907_v50  ;;  %v609_v30 = vrot.slane %v607_v19, 1  ;;  %v401_v33 = vshll.u32 %v5190_v4, 16  ;;  %v624_v36 = vshll.u32 %v5321_v25, 16  ;;  %v4928_v4 = vld [vmem:[%s6284_s1 + $0x178] sm:$0xff]  }
  0x28   : > { %4370 = vmatprep.subr.bf16.mxu0 %v4908_v52  ;;  %v396_v31 = vor.u32 %v394_v26, %v393_v61  ;;  %v405_v37 = vshrl.u32 %v5192_v5, 16  ;;  %v408_v38 = vshll.u32 %v5192_v5, 16  ;;  %v400_v40 = vrot.slane %v398_v32, 7 }
  0x29   : > { %v5281_v51 = vsel %vm579_vm3, %v598_v46, %v602_v42  ;;  %v4916_v42 = vld [vmem:[%s6284_s1 + $0x138] sm:$0xff]   ;;  %v617_v43 = vshrl.u32 %v5313_v20, 16  ;;  %v621_v44 = vrot.slane %v619_v29, 1  ;;  %v412_v48 = vshrl.u32 %v5194_v6, 16  ;;  %v4919_v29 = vld [vmem:[%s6284_s1 + $0x148] sm:$0xff]  }
  0x2a   : > { %4380 = vmatprep.mubr.bf16.mxu0 %v5281_v51  ;;  %4179 = vmatpush3.bf16.msra.mxu1 %v4907_v50  ;;  %v5338_v39 = vsel %vm5224_vm2, 0, %v396_v31  ;;  %v407_v45 = vrot.slane %v405_v37, 7  ;;  %v403_v47 = vor.u32 %v401_v33, %v400_v40  ;;  %v415_v49 = vshll.u32 %v5194_v6, 16 }
  0x2b   : > { %4371 = vmatpush3.bf16.msra.mxu0 %v4908_v52  ;;  %4180 = vmatprep.subr.bf16.mxu1 %v4909_v57  ;;  %v631_v46 = vshll.u32 %v5338_v39, 16  ;;  %v610_v50 = vor.u32 %v609_v30, %v605_v17  ;;  %v614_v52 = vrot.slane %v612_v24, 1  ;;  %v5349_v53 = vsel %vm5224_vm2, %v393_v61, 0 }
  0x2c   : > { %4372 = vmatprep.subr.bf16.mxu0 %v4910_v58  ;;  %v626_v55 = vrot.slane %v624_v36, 1  ;;  %v5356_v56 = vsel %vm5224_vm2, 0, %v403_v47  ;;  %v622_v61 = vor.u32 %v621_v44, %v617_v43  ;;  %v419_v17 = vshrl.u32 %v5196_v7, 16  ;;  %v4923_v44 = vld [vmem:[%s6284_s1 + $0x10] sm:$0xff]  }
  0x2d   : > { %v629_v19 = vshrl.u32 %v5338_v39, 16  ;;  %v636_v24 = vshll.u32 %v5349_v53, 16  ;;  %v641_v30 = vshrl.u32 %v5356_v56, 16  ;;  %v422_v37 = vshll.u32 %v5196_v7, 16 }
  0x2e   : > { %4181 = vmatpush3.bf16.msra.mxu1 %v4909_v57  ;;  %v410_v57 = vor.u32 %v408_v38, %v407_v45  ;;  %v421_v36 = vrot.slane %v419_v17, 7  ;;  %v5388_v38 = vsel %vm579_vm3, %v622_v61, %v626_v55  ;;  %v429_v17 = vshll.u32 %v5198_v8, 16 }
  0x2f   : > { %4373 = vmatpush3.bf16.msra.mxu0 %v4910_v58  ;;  %4182 = vmatprep.subr.bf16.mxu1 %v4911_v62  ;;  %v414_v58 = vrot.slane %v412_v48, 7  ;;  %v638_v43 = vrot.slane %v636_v24, 1  ;;  %vm1254_vm4 = vcmask 1046528  }
  0x30   : > { %4374 = vmatprep.subr.bf16.mxu0 %v4912_v16  ;;  %v5379_v32 = vsel %vm5224_vm2, 0, %v410_v57 }
  0x31   : > { %v417_v26 = vor.u32 %v415_v49, %v414_v58  ;;  %v5405_v47 = vsel %vm5224_vm2, %v414_v58, 0  ;;  %v426_v49 = vshrl.u32 %v5198_v8, 16  ;;  %v653_v57 = vshrl.u32 %v5379_v32, 16 }
  0x32   : > { %4183 = vmatpush3.bf16.msra.mxu1 %v4911_v62  ;;  %v5363_v62 = vsel %vm5224_vm2, %v400_v40, 0  ;;  %v4920_v40 = vld [vmem:[%s6284_s1 + $0x8] sm:$0xff]   ;;  %v672_v61 = vshll.u32 %v5405_v47, 16  ;;  %v1259_v8 = vrot.slane %v5243_v28, 1 }
  0x33   : > { %4375 = vmatpush3.bf16.msra.mxu0 %v4912_v16  ;;  %4184 = vmatprep.subr.bf16.mxu1 %v4913_v23  ;;  %v643_v16 = vshll.u32 %v5356_v56, 16  ;;  %v648_v31 = vshll.u32 %v5363_v62, 16 }
  0x34   : > { %4376 = vmatprep.subr.bf16.mxu0 %v4914_v27 }
  0x35   : > { %v645_v33 = vrot.slane %v643_v16, 1  ;;  %v428_v16 = vrot.slane %v426_v49, 7 }
  0x36   : > { %4185 = vmatpush3.bf16.msra.mxu1 %v4913_v23  ;;  %v633_v23 = vrot.slane %v631_v46, 1  ;;  %v5399_v46 = vsel %vm5224_vm2, %v407_v45, 0  ;;  %v4921_v45 = vld [vmem:[%s6284_s1 + $0x150] sm:$0xff]  }
  0x37   : > { %4377 = vmatpush3.bf16.msra.mxu0 %v4914_v27  ;;  %4186 = vmatprep.subr.bf16.mxu1 %v4915_v35  ;;  %v5370_v27 = vsel %vm579_vm3, %v610_v50, %v614_v52  ;;  %v646_v50 = vor.u32 %v645_v33, %v641_v30  ;;  %v650_v52 = vrot.slane %v648_v31, 1  ;;  %v660_v58 = vshll.u32 %v5399_v46, 16 }
  0x38   : > { %4378 = vmatprep.subr.bf16.mxu0 %v4916_v42  ;;  %v436_v30 = vshll.u32 %v5210_v9, 16 }
  0x39   : > { %v5427_v31 = vsel %vm579_vm3, %v646_v50, %v650_v52  ;;  %v4924_v52 = vld [vmem:[%s6284_s1 + $0x160] sm:$0xff]  }
  0x3a   : > { %4187 = vmatpush3.bf16.msra.mxu1 %v4915_v35  ;;  %v5383_v35 = vsel %vm5224_vm2, 0, %v417_v26 }
  0x3b   : > { %4379 = vmatpush3.bf16.msra.mxu0 %v4916_v42  ;;  %4220 = vmatprep.subr.bf16.mxu1 %v4917_v54  ;;  %v634_v42 = vor.u32 %v633_v23, %v629_v19  ;;  %v667_v48 = vshll.u32 %v5383_v35, 16  ;;  %v433_v19 = vshrl.u32 %v5210_v9, 16  ;;  %v665_v24 = vshrl.u32 %v5383_v35, 16 }
  0x3c   : > { %4412 = vmatprep.subr.bf16.mxu0 %v4918_v59 }
  0x3d   : > { %4189 = vmatmul.mubr.bf16.vlgmr.msra.gmra.mrb[0].mxu1 %v5281_v51  ;;  %v655_v51 = vshll.u32 %v5379_v32, 16  ;;  %v5414_v55 = vsel %vm579_vm3, %v634_v42, %v638_v43  ;;  %v669_v26 = vrot.slane %v667_v48, 1  ;;  %v431_v42 = vor.u32 %v429_v17, %v428_v16 }
  0x3e   : > { %4381 = vmatmul.mubr.bf16.vlgmr.msra.gmra.mrb[0].mxu0 %v5370_v27  ;;  %4221 = vmatpush3.bf16.msra.mxu1 %v4917_v54  ;;  %v424_v54 = vor.u32 %v422_v37, %v421_v36  ;;  %v435_v37 = vrot.slane %v433_v19, 7  ;;  %v440_v43 = vshrl.u32 %v5212_v10, 16  ;;  %v5443_v48 = vsel %vm5224_vm2, %v421_v36, 0 }
  0x3f   : > { %4413 = vmatpush3.bf16.msra.mxu0 %v4918_v59  ;;  %4192 = vmatprep.mubr.bf16.mxu1 %v5370_v27  ;;  %v4922_v59 = vld [vmem:[%s6284_s1 + $0x158] sm:$0xff]   ;;  %v657_v23 = vrot.slane %v655_v51, 1  ;;  %v684_v36 = vshll.u32 %v5443_v48, 16  ;;  %v5456_v17 = vsel %vm5224_vm2, 0, %v431_v42  ;;  %v4925_v42 = vld [vmem:[%s6284_s1 + $0x168] sm:$0xff]  }
  0x40   : > { %4414 = vmatprep.subr.bf16.mxu0 %v4919_v29  ;;  %4384 = vmatprep.mubr.bf16.mxu0 %v5388_v38  ;;  %v5431_v33 = vsel %vm5224_vm2, 0, %v424_v54  ;;  %v438_v50 = vor.u32 %v436_v30, %v435_v37  ;;  %v670_v54 = vor.u32 %v669_v26, %v665_v24  ;;  %v5458_v19 = vrot.slane %v440_v43, 7 }
  0x41   : > { %4222 = vmatprep.subr.bf16.mxu1 %v4920_v40  ;;  %v658_v51 = vor.u32 %v657_v23, %v653_v57  ;;  %v679_v49 = vshll.u32 %v5431_v33, 16  ;;  %v447_v57 = vshrl.u32 %v5214_v11, 16  ;;  %v443_v23 = vshll.u32 %v5212_v10, 16  ;;  %v4927_v10 = vld [vmem:[%s6284_s1 + $0x170] sm:$0xff]  }
  0x42   : > { %4223 = vmatpush3.bf16.msra.mxu1 %v4920_v40  ;;  %v662_v40 = vrot.slane %v660_v58, 1  ;;  %v674_v58 = vrot.slane %v672_v61, 1  ;;  %v677_v61 = vshrl.u32 %v5431_v33, 16  ;;  %v5467_v26 = vsel %vm5224_vm2, 0, %v438_v50 }
  0x43   : > { %4415 = vmatpush3.bf16.msra.mxu0 %v4919_v29  ;;  %4224 = vmatprep.subr.bf16.mxu1 %v4923_v44  ;;  %v4926_v29 = vld [vmem:[%s6284_s1 + $0x18] sm:$0xff]   ;;  %v681_v24 = vrot.slane %v679_v49, 1  ;;  %v450_v49 = vshll.u32 %v5214_v11, 16  ;;  %v1258_v50 = vrot.slane %v5252_v34, 1  ;;  %v686_v30 = vrot.slane %v684_v36, 1 }
  0x44   : > { %4416 = vmatprep.subr.bf16.mxu0 %v4921_v45  ;;  %v5474_v43 = vsel %vm579_vm3, %v670_v54, %v674_v58  ;;  %v703_v54 = vshll.u32 %v5467_v26, 16  ;;  %v445_v58 = vor.u32 %v443_v23, %v5458_v19  ;;  %v5497_v11 = vsel %vm5224_vm2, %v435_v37, 0 }
  0x45   : > { %4193 = vmatmul.mubr.bf16.gmra.mrb[4].mxu1 %v5388_v38  ;;  %v689_v36 = vshrl.u32 %v5456_v17, 16  ;;  %v461_v37 = vshrl.u32 %v5218_v13, 16  ;;  %v701_v9 = vshrl.u32 %v5467_v26, 16  ;;  %v708_v7 = vshll.u32 %v5497_v11, 16 }
  0x46   : > { %4385 = vmatmul.mubr.bf16.gmra.mrb[4].mxu0 %v5414_v55  ;;  %4196 = vmatprep.mubr.bf16.mxu1 %v5414_v55  ;;  %v705_v6 = vrot.slane %v703_v54, 1  ;;  %v5511_v28 = vsel %vm5224_vm2, 0, %v445_v58  ;;  %v5521_v54 = vsel %vm1254_vm4, %v1258_v50, %v1259_v8  ;;  %v4935_v8 = vld [vmem:[%s6284_s1 + $0x38] sm:$0xff]  }
  0x47   : > { %4417 = vmatpush3.bf16.msra.mxu0 %v4921_v45  ;;  %4388 = vmatprep.mubr.bf16.mxu0 %v5427_v31  ;;  %v4929_v45 = vld [vmem:[%s6284_s1 + $0x20] sm:$0xff]   ;;  %v710_v50 = vrot.slane %v708_v7, 1 }
  0x48   : > { %4418 = vmatprep.subr.bf16.mxu0 %v4922_v59  ;;  %4225 = vmatpush3.bf16.msra.mxu1 %v4923_v44  ;;  %v5462_v44 = vsel %vm579_vm3, %v658_v51, %v662_v40  ;;  %v691_v40 = vshll.u32 %v5456_v17, 16  ;;  %v4931_v51 = vld [vmem:[%s6284_s1 + $0x28] sm:$0xff]   ;;  %v4930_v7 = vld [vmem:[%s6284_s1 + $0x180] sm:$0xff]  }
  0x49   : > { %4226 = vmatprep.subr.bf16.mxu1 %v4926_v29 }
  0x4b   : > { %4419 = vmatpush3.bf16.msra.mxu0 %v4922_v59  ;;  %v449_v59 = vrot.slane %v447_v57, 7  ;;  %v682_v57 = vor.u32 %v681_v24, %v677_v61  ;;  %v693_v61 = vrot.slane %v691_v40, 1  ;;  %v457_v40 = vshll.u32 %v5216_v12, 16 }
  0x4c   : > { %4420 = vmatprep.subr.bf16.mxu0 %v4924_v52  ;;  %4227 = vmatpush3.bf16.msra.mxu1 %v4926_v29  ;;  %v5487_v29 = vsel %vm5224_vm2, %v428_v16, 0  ;;  %v454_v16 = vshrl.u32 %v5216_v12, 16  ;;  %v468_v12 = vshrl.u32 %v5220_v14, 16 }
  0x4d   : > { %4197 = vmatmul.mubr.bf16.gmra.mrb[8].mxu1 %v5427_v31  ;;  %4228 = vmatprep.subr.bf16.mxu1 %v4929_v45  ;;  %v452_v23 = vor.u32 %v450_v49, %v449_v59  ;;  %v696_v24 = vshll.u32 %v5487_v29, 16 }
  0x4e   : > { %4389 = vmatmul.mubr.bf16.gmra.mrb[8].mxu0 %v5462_v44  ;;  %4200 = vmatprep.mubr.bf16.mxu1 %v5462_v44  ;;  %v456_v49 = vrot.slane %v454_v16, 7  ;;  %v1261_v16 = vrot.slane %v5297_v60, 1 }
  0x4f   : > { %4421 = vmatpush3.bf16.msra.mxu0 %v4924_v52  ;;  %4392 = vmatprep.mubr.bf16.mxu0 %v5474_v43  ;;  %v4933_v52 = vld [vmem:[%s6284_s1 + $0x30] sm:$0xff]   ;;  %v5525_v58 = vsel %vm5224_vm2, 0, %v452_v23  ;;  %v5539_v23 = vsel %vm5224_vm2, %v5458_v19, 0  ;;  %v1264_v19 = vrot.slane %v5313_v20, 1 }
  0x50   : > { %4422 = vmatprep.subr.bf16.mxu0 %v4925_v42  ;;  %4229 = vmatpush3.bf16.msra.mxu1 %v4929_v45  ;;  %v5514_v45 = vsel %vm579_vm3, %v682_v57, %v686_v30  ;;  %v464_v30 = vshll.u32 %v5218_v13, 16  ;;  %v698_v57 = vrot.slane %v696_v24, 1  ;;  %v715_v24 = vshll.u32 %v5511_v28, 16 }
  0x51   : > { %4230 = vmatprep.subr.bf16.mxu1 %v4931_v51  ;;  %v5545_v13 = vsel %vm5224_vm2, %v449_v59, 0  ;;  %v727_v5 = vshll.u32 %v5525_v58, 16  ;;  %v459_v2 = vor.u32 %v457_v40, %v456_v49  ;;  %v720_v59 = vshll.u32 %v5539_v23, 16 }
  0x52   : > { %v471_v40 = vshll.u32 %v5220_v14, 16 }
  0x53   : > { %4423 = vmatpush3.bf16.msra.mxu0 %v4925_v42  ;;  %v463_v42 = vrot.slane %v461_v37, 7  ;;  %v706_v37 = vor.u32 %v705_v6, %v701_v9  ;;  %v6339_v6 = vrot.slane %v5304_v63, 1  ;;  %v717_v63 = vrot.slane %v715_v24, 1 }
  0x54   : > { %4424 = vmatprep.subr.bf16.mxu0 %v4927_v10  ;;  %4231 = vmatpush3.bf16.msra.mxu1 %v4931_v51  ;;  %v694_v51 = vor.u32 %v693_v61, %v689_v36  ;;  %v1265_v36 = vrot.slane %v5321_v25, 1  ;;  %v470_v61 = vrot.slane %v468_v12, 7  ;;  %v725_v12 = vshrl.u32 %v5525_v58, 16 }
  0x55   : > { %4201 = vmatmul.mubr.bf16.gmra.mrb[12].mxu1 %v5474_v43  ;;  %4232 = vmatprep.subr.bf16.mxu1 %v4933_v52  ;;  %v5556_v9 = vsel %vm1254_vm4, %v1261_v16, %v6339_v6  ;;  %v5571_v16 = vsel %vm579_vm3, %v706_v37, %v710_v50  ;;  %v729_v6 = vrot.slane %v727_v5, 1  ;;  %v5576_v14 = vsel %vm5224_vm2, 0, %v459_v2 }
  0x56   : > { %4393 = vmatmul.mubr.bf16.gmra.mrb[12].mxu0 %v5514_v45  ;;  %4204 = vmatprep.mubr.bf16.mxu1 %v5514_v45  ;;  %v5566_v25 = vsel %vm579_vm3, %v694_v51, %v698_v57  ;;  %6340 = vst [vmem:[#allocation22_spill] sm:$0xff] %v5571_v16  ;;  %v5579_v57 = vsel %vm1254_vm4, %v1264_v19, %v1265_v36  ;;  %v4932_v51 = vld [vmem:[%s6284_s1 + $0x188] sm:$0xff]   ;;  %v1267_v5 = vrot.slane %v5338_v39, 1  ;;  %v1268_v2 = vrot.slane %v5349_v53, 1 }
  0x57   : > { %4425 = vmatpush3.bf16.msra.mxu0 %v4927_v10  ;;  %4428 = vmatprep.mubr.bf16.mxu0 %v5521_v54  ;;  %v466_v10 = vor.u32 %v464_v30, %v463_v42  ;;  %v732_v30 = vshll.u32 %v5545_v13, 16  ;;  %v473_v50 = vor.u32 %v471_v40, %v470_v61  ;;  %v722_v37 = vrot.slane %v720_v59, 1 }
  0x58   : > { %4426 = vmatprep.subr.bf16.mxu0 %v4928_v4  ;;  %4233 = vmatpush3.bf16.msra.mxu1 %v4933_v52  ;;  %v713_v52 = vshrl.u32 %v5511_v28, 16  ;;  %v5596_v19 = vsel %vm5224_vm2, %v456_v49, 0  ;;  %v730_v36 = vor.u32 %v729_v6, %v725_v12  ;;  %v1270_v59 = vrot.slane %v5356_v56, 1  ;;  %v4934_v49 = vld [vmem:[%s6284_s1 + $0x190] sm:$0xff]  }
  0x59   : > { %4234 = vmatprep.subr.bf16.mxu1 %v4935_v8  ;;  %v734_v53 = vrot.slane %v732_v30, 1  ;;  %v1273_v30 = vrot.slane %v5379_v32, 1  ;;  %v5625_v1 = vsel %vm1254_vm4, %v1267_v5, %v1268_v2  ;;  %v1274_v2 = vrot.slane %v5399_v46, 1 }
  0x5a   : > { %v718_v24 = vor.u32 %v717_v63, %v713_v52  ;;  %v1271_v52 = vrot.slane %v5363_v62, 1  ;;  %v744_v63 = vshll.u32 %v5596_v19, 16 }
  0x5b   : > { %4427 = vmatpush3.bf16.msra.mxu0 %v4928_v4  ;;  %v5586_v4 = vsel %vm5224_vm2, 0, %v466_v10  ;;  %v5602_v10 = vsel %vm5224_vm2, %v463_v42, 0  ;;  %v5615_v42 = vsel %vm5224_vm2, 0, %v473_v50  ;;  %v5628_v41 = vsel %vm579_vm3, %v730_v36, %v734_v53  ;;  %v4938_v36 = vld [vmem:[%s6284_s1 + $0x1a0] sm:$0xff]  }
  0x5c   : > { %4460 = vmatprep.subr.bf16.mxu0 %v4930_v7  ;;  %4235 = vmatpush3.bf16.msra.mxu1 %v4935_v8  ;;  %v739_v8 = vshll.u32 %v5576_v14, 16  ;;  %v751_v40 = vshll.u32 %v5586_v4, 16  ;;  %v5618_v12 = vsel %vm579_vm3, %v718_v24, %v722_v37  ;;  %v756_v62 = vshll.u32 %v5602_v10, 16 }
  0x5d   : > { %4205 = vmatmul.mubr.bf16.gmra.mrb[16].mxu1 %v5566_v25  ;;  %4268 = vmatprep.subr.bf16.mxu1 %v5563_v3  ;;  %v749_v50 = vshrl.u32 %v5586_v4, 16  ;;  %v5632_v24 = vsel %vm1254_vm4, %v1270_v59, %v1271_v52  ;;  %v5636_v37 = vsel %vm5224_vm2, %v470_v61, 0  ;;  %v746_v5 = vrot.slane %v744_v63, 1 }
  0x5e   : > { %4429 = vmatmul.mubr.bf16.vlgmr.msra.gmra.mrb[0].mxu0 %v5556_v9  ;;  %4208 = vmatprep.mubr.bf16.mxu1 %v5571_v16  ;;  %v741_v6 = vrot.slane %v739_v8, 1  ;;  %v753_v16 = vrot.slane %v751_v40, 1  ;;  %v763_v8 = vshll.u32 %v5615_v42, 16  ;;  %v758_v53 = vrot.slane %v756_v62, 1 }
  0x5f   : > { %4461 = vmatpush3.bf16.msra.mxu0 %v4930_v7  ;;  %4432 = vmatprep.mubr.bf16.mxu0 %v5579_v57  ;;  %v737_v7 = vshrl.u32 %v5576_v14, 16  ;;  %v1276_v40 = vrot.slane %v5383_v35, 1  ;;  %v1277_v59 = vrot.slane %v5405_v47, 1  ;;  %v768_v52 = vshll.u32 %v5636_v37, 16  ;;  %v4940_v47 = vld [vmem:[%s6284_s1 + $0x1a8] sm:$0xff]  }
  0x60   : > { %4462 = vmatprep.subr.bf16.mxu0 %v4932_v51  ;;  %v754_v61 = vor.u32 %v753_v16, %v749_v50  ;;  %v765_v63 = vrot.slane %v763_v8, 1  ;;  %v1279_v50 = vrot.slane %v5431_v33, 1  ;;  %v1280_v8 = vrot.slane %v5443_v48, 1  ;;  %v4944_v48 = vld [vmem:[%s6284_s1 + $0x1b8] sm:$0xff]  }
  0x61   : > { %v5661_v16 = vsel %vm1254_vm4, %v1276_v40, %v1277_v59  ;;  %v770_v62 = vrot.slane %v768_v52, 1  ;;  %v1288_v40 = vrot.slane %v5511_v28, 1  ;;  %v1289_v59 = vrot.slane %v5539_v23, 1  ;;  %v5700_v52 = vld [vmem:[%s6284_s1 + $0x1c0] sm:$0xff]  }
  0x62   : > { %v1291_v23 = vrot.slane %v5525_v58, 1 }
  0x63   : > { %4463 = vmatpush3.bf16.msra.mxu0 %v4932_v51  ;;  %v742_v51 = vor.u32 %v741_v6, %v737_v7  ;;  %v761_v7 = vshrl.u32 %v5615_v42, 16  ;;  %v5655_v6 = vsel %vm1254_vm4, %v1273_v30, %v1274_v2 }
  0x64   : > { %4464 = vmatprep.subr.bf16.mxu0 %v4934_v49 }
  0x65   : > { %4209 = vmatmul.mubr.bf16.gmra.mrb[20].mxu1 %v5618_v12  ;;  %v5652_v46 = vsel %vm579_vm3, %v742_v51, %v746_v5  ;;  %v766_v30 = vor.u32 %v765_v63, %v761_v7  ;;  %v1282_v51 = vrot.slane %v5456_v17, 1  ;;  %v1283_v5 = vrot.slane %v5487_v29, 1 }
  0x66   : > { %4433 = vmatmul.mubr.bf16.gmra.mrb[4].mxu0 %v5625_v1  ;;  %4212 = vmatprep.mubr.bf16.mxu1 %v5628_v41  ;;  %v1285_v29 = vrot.slane %v5467_v26, 1  ;;  %v5706_v63 = vsel %vm1254_vm4, %v1288_v40, %v1289_v59  ;;  %v4945_v59 = vld [vmem:[%s6284_s1 + $0xa0] sm:$0xff]  }
  0x67   : > { %4436 = vmatprep.mubr.bf16.mxu0 %v5632_v24  ;;  %4465 = vmatpush3.bf16.msra.mxu0 %v4934_v49  ;;  %v5658_v49 = vsel %vm579_vm3, %v754_v61, %v758_v53  ;;  %v5678_v2 = vsel %vm579_vm3, %v766_v30, %v770_v62  ;;  %v5681_v61 = vsel %vm1254_vm4, %v1279_v50, %v1280_v8  ;;  %v4941_v30 = vld [vmem:[%s6284_s1 + $0x90] sm:$0xff]   ;;  %v1294_v62 = vrot.slane %v5576_v14, 1 }
  0x68   : > { %4466 = vmatprep.subr.bf16.mxu0 %v4936_v0  ;;  %v5684_v53 = vsel %vm1254_vm4, %v1282_v51, %v1283_v5  ;;  %v475_v50 = vshrl.u32 %v5222_v15, 16  ;;  %v478_v5 = vshll.u32 %v5222_v15, 16 }
  0x6a   : > { %v477_v51 = vrot.slane %v475_v50, 7  ;;  %v4951_v50 = vld [vmem:[%s6284_s1 + $0xb8] sm:$0xff]  }
  0x6b   : > { %4467 = vmatpush3.bf16.msra.mxu0 %v4936_v0  ;;  %v4942_v0 = vld [vmem:[%s6284_s1 + $0x1b0] sm:$0xff]  }
  0x6c   : > { %4468 = vmatprep.subr.bf16.mxu0 %v4938_v36  ;;  %v480_v40 = vor.u32 %v478_v5, %v477_v51  ;;  %v4950_v5 = vld [vmem:[%s6284_s1 + $0x1d0] sm:$0xff]  }
  0x6d   : > { %4213 = vmatmul.mubr.bf16.gmra.mrb[24].mxu1 %v5652_v46 }
  0x6e   : > { %4437 = vmatmul.mubr.bf16.gmra.mrb[8].mxu0 %v5655_v6  ;;  %4216 = vmatprep.mubr.bf16.mxu1 %v5658_v49 }
  0x6f   : > { %4440 = vmatprep.mubr.bf16.mxu0 %v5661_v16  ;;  %4469 = vmatpush3.bf16.msra.mxu0 %v4938_v36  ;;  %v1286_v36 = vrot.slane %v5497_v11, 1  ;;  %v4939_v11 = vld [vmem:[%s6284_s1 + $0x88] sm:$0xff]  }
  0x70   : > { %4470 = vmatprep.subr.bf16.mxu0 %v4940_v47 }
  0x71   : > { %v5703_v7 = vsel %vm1254_vm4, %v1285_v29, %v1286_v36  ;;  %v1300_v29 = vrot.slane %v5615_v42, 1  ;;  %v1301_v36 = vrot.slane %v5636_v37, 1  ;;  %v5758_v37 = vsel %vm5224_vm2, %v477_v51, 0  ;;  %v4948_v51 = vld [vmem:[%s6284_s1 + $0x1c8] sm:$0xff]  }
  0x73   : > { %4471 = vmatpush3.bf16.msra.mxu0 %v4940_v47  ;;  %v1292_v47 = vrot.slane %v5545_v13, 1  ;;  %v4943_v13 = vld [vmem:[%s6284_s1 + $0x98] sm:$0xff]  }
  0x74   : > { %4472 = vmatprep.subr.bf16.mxu0 %v4942_v0 }
  0x75   : > { %4217 = vmatmul.mubr.bf16.gmra.mrb[28].mxu1 %v5678_v2 }
  0x76   : > { %4441 = vmatmul.mubr.bf16.gmra.mrb[12].mxu0 %v5681_v61  ;;  %4236 = vmatprep.mubr.bf16.mxu1 %v5232_v21 }
  0x77   : > { %4444 = vmatprep.mubr.bf16.mxu0 %v5684_v53  ;;  %4473 = vmatpush3.bf16.msra.mxu0 %v4942_v0  ;;  %v1295_v0 = vrot.slane %v5596_v19, 1  ;;  %v1297_v19 = vrot.slane %v5586_v4, 1 }
  0x78   : > { %4474 = vmatprep.subr.bf16.mxu0 %v4944_v48 }
  0x79   : > { %v5729_v8 = vsel %vm1254_vm4, %v1294_v62, %v1295_v0  ;;  %v2106_v62 = vrot.slane %v5758_v37, 1 }
  0x7b   : > { %4475 = vmatpush3.bf16.msra.mxu0 %v4944_v48  ;;  %v1298_v48 = vrot.slane %v5602_v10, 1  ;;  %v5754_v10 = vsel %vm5224_vm2, 0, %v480_v40  ;;  %v4958_v40 = vld [vmem:[%s6284_s1 + $0x1f0] sm:$0xff]  }
  0x7c   : > { %4508 = vmatprep.subr.bf16.mxu0 %v5700_v52 }
  0x7d   : > { %4237 = vmatmul.mubr.bf16.vlgmr.msra.gmra.mrb[0].mxu1 %v5252_v34 }
  0x7e   : > { %4445 = vmatmul.mubr.bf16.gmra.mrb[16].mxu0 %v5703_v7  ;;  %4269 = vmatpush3.bf16.msra.mxu1 %v5563_v3  ;;  %v5726_v3 = vsel %vm1254_vm4, %v1291_v23, %v1292_v47  ;;  %v5750_v23 = vsel %vm1254_vm4, %v1300_v29, %v1301_v36  ;;  %v4947_v47 = vld [vmem:[%s6284_s1 + $0xa8] sm:$0xff]   ;;  %v1255_v29 = vrot.slane %v5232_v21, 1  ;;  %v1256_v36 = vrot.slane %v5236_v22, 1  ;;  %v4962_v22 = vld [vmem:[%s6284_s1 + $0x200] sm:$0xff]  }
  0x7f   : > { %4240 = vmatprep.mubr.bf16.mxu1 %v5297_v60  ;;  %4448 = vmatprep.mubr.bf16.mxu0 %v5706_v63 }
  0x80   : > { %4270 = vmatprep.subr.bf16.mxu1 %v4939_v11 }
  0x82   : > { %4271 = vmatpush3.bf16.msra.mxu1 %v4939_v11  ;;  %v5747_v11 = vsel %vm1254_vm4, %v1297_v19, %v1298_v48  ;;  %v4952_v19 = vld [vmem:[%s6284_s1 + $0x1d8] sm:$0xff]   ;;  %v4956_v48 = vld [vmem:[%s6284_s1 + $0x1e8] sm:$0xff]  }
  0x83   : > { %4272 = vmatprep.subr.bf16.mxu1 %v4941_v30 }
  0x85   : > { %4241 = vmatmul.mubr.bf16.gmra.mrb[4].mxu1 %v5313_v20 }
  0x86   : > { %4449 = vmatmul.mubr.bf16.gmra.mrb[20].mxu0 %v5726_v3  ;;  %4244 = vmatprep.mubr.bf16.mxu1 %v5338_v39 }
  0x87   : > { %4452 = vmatprep.mubr.bf16.mxu0 %v5729_v8  ;;  %4273 = vmatpush3.bf16.msra.mxu1 %v4941_v30  ;;  %v2105_v30 = vrot.slane %v5754_v10, 1 }
  0x88   : > { %4274 = vmatprep.subr.bf16.mxu1 %v4943_v13 }
  0x89   : > { %v5773_v0 = vsel %vm1254_vm4, %v2105_v30, %v2106_v62  ;;  %v4955_v30 = vld [vmem:[%s6284_s1 + $0xc8] sm:$0xff]   ;;  %v4957_v62 = vld [vmem:[%s6284_s1 + $0xd0] sm:$0xff]  }
  0x8b   : > { %4275 = vmatpush3.bf16.msra.mxu1 %v4943_v13  ;;  %v4953_v13 = vld [vmem:[%s6284_s1 + $0xc0] sm:$0xff]  }
  0x8c   : > { %4276 = vmatprep.subr.bf16.mxu1 %v4945_v59 }
  0x8d   : > { %4245 = vmatmul.mubr.bf16.gmra.mrb[8].mxu1 %v5356_v56 }
  0x8e   : > { %4453 = vmatmul.mubr.bf16.gmra.mrb[24].mxu0 %v5747_v11  ;;  %4248 = vmatprep.mubr.bf16.mxu1 %v5379_v32 }
  0x8f   : > { %4456 = vmatprep.mubr.bf16.mxu0 %v5750_v23  ;;  %4277 = vmatpush3.bf16.msra.mxu1 %v4945_v59  ;;  %v5819_v59 = vsel %vm1254_vm4, %v1255_v29, %v1256_v36 }
  0x90   : > { %4278 = vmatprep.subr.bf16.mxu1 %v4947_v47 }
  0x93   : > { %4279 = vmatpush3.bf16.msra.mxu1 %v4947_v47  ;;  %v4960_v47 = vld [vmem:[%s6284_s1 + $0x1f8] sm:$0xff]  }
  0x94   : > { %4280 = vmatprep.subr.bf16.mxu1 %v4949_v18 }
  0x95   : > { %4249 = vmatmul.mubr.bf16.gmra.mrb[12].mxu1 %v5383_v35 }
  0x96   : > { %4457 = vmatmul.mubr.bf16.gmra.mrb[28].mxu0 %v5773_v0  ;;  %4252 = vmatprep.mubr.bf16.mxu1 %v5431_v33 }
  0x97   : > { %4476 = vmatprep.mubr.bf16.mxu0 %v5297_v60  ;;  %4281 = vmatpush3.bf16.msra.mxu1 %v4949_v18  ;;  %v4959_v18 = vld [vmem:[%s6284_s1 + $0xd8] sm:$0xff]  }
  0x98   : > { %4282 = vmatprep.subr.bf16.mxu1 %v4951_v50 }
  0x9b   : > { %4283 = vmatpush3.bf16.msra.mxu1 %v4951_v50  ;;  %v4963_v50 = vld [vmem:[%s6284_s1 + $0xe8] sm:$0xff]  }
  0x9c   : > { %4316 = vmatprep.subr.bf16.mxu1 %v4953_v13 }
  0x9d   : > { %4253 = vmatmul.mubr.bf16.gmra.mrb[16].mxu1 %v5456_v17 }
  0x9e   : > { %4477 = vmatmul.mubr.bf16.vlgmr.msra.gmra.mrb[0].mxu0 %v5313_v20  ;;  %4256 = vmatprep.mubr.bf16.mxu1 %v5467_v26 }
  0x9f   : > { %4509 = vmatpush3.bf16.msra.mxu0 %v5700_v52  ;;  %4480 = vmatprep.mubr.bf16.mxu0 %v5338_v39  ;;  %v4954_v52 = vld [vmem:[%s6284_s1 + $0x1e0] sm:$0xff]  }
  0xa0   : > { %4510 = vmatprep.subr.bf16.mxu0 %v4948_v51 }
  0xa3   : > { %4511 = vmatpush3.bf16.msra.mxu0 %v4948_v51  ;;  %v4967_v51 = vld [vmem:[%s6284_s1 + $0xf8] sm:$0xff]  }
  0xa4   : > { %4512 = vmatprep.subr.bf16.mxu0 %v4950_v5 }
  0xa5   : > { %4257 = vmatmul.mubr.bf16.gmra.mrb[20].mxu1 %v5511_v28 }
  0xa6   : > { %4481 = vmatmul.mubr.bf16.gmra.mrb[4].mxu0 %v5356_v56  ;;  %4260 = vmatprep.mubr.bf16.mxu1 %v5525_v58 }
  0xa7   : > { %4484 = vmatprep.mubr.bf16.mxu0 %v5379_v32  ;;  %4513 = vmatpush3.bf16.msra.mxu0 %v4950_v5  ;;  %v4964_v5 = vld [vmem:[%s6284_s1 + $0x208] sm:$0xff]  }
  0xa8   : > { %4514 = vmatprep.subr.bf16.mxu0 %v4952_v19 }
  0xab   : > { %4515 = vmatpush3.bf16.msra.mxu0 %v4952_v19  ;;  %v5101_v19 = vld [vmem:[%s6284_s1 + $0x100] sm:$0xff]  }
  0xac   : > { %4516 = vmatprep.subr.bf16.mxu0 %v4954_v52 }
  0xad   : > { %4261 = vmatmul.mubr.bf16.gmra.mrb[24].mxu1 %v5576_v14 }
  0xae   : > { %4485 = vmatmul.mubr.bf16.gmra.mrb[8].mxu0 %v5383_v35  ;;  %4264 = vmatprep.mubr.bf16.mxu1 %v5586_v4 }
  0xaf   : > { %4488 = vmatprep.mubr.bf16.mxu0 %v5431_v33  ;;  %4517 = vmatpush3.bf16.msra.mxu0 %v4954_v52  ;;  %v5103_v52 = vld [vmem:[%s6284_s1 + $0x110] sm:$0xff]  }
  0xb0   : > { %4518 = vmatprep.subr.bf16.mxu0 %v4956_v48 }
  0xb3   : > { %4519 = vmatpush3.bf16.msra.mxu0 %v4956_v48 }
  0xb4   : > { %4520 = vmatprep.subr.bf16.mxu0 %v4958_v40 }
  0xb5   : > { %4265 = vmatmul.mubr.bf16.gmra.mrb[28].mxu1 %v5615_v42 }
  0xb6   : > { %4489 = vmatmul.mubr.bf16.gmra.mrb[12].mxu0 %v5456_v17  ;;  %4284 = vmatprep.mubr.bf16.mxu1 %v5819_v59 }
  0xb7   : > { %4492 = vmatprep.mubr.bf16.mxu0 %v5467_v26  ;;  %4521 = vmatpush3.bf16.msra.mxu0 %v4958_v40  ;;  %v5104_v40 = vld [vmem:[%s6284_s1 + $0x118] sm:$0xff]  }
  0xb8   : > { %4522 = vmatprep.subr.bf16.mxu0 %v4960_v47 }
  0xbb   : > { %4523 = vmatpush3.bf16.msra.mxu0 %v4960_v47 }
  0xbc   : > { %4556 = vmatprep.subr.bf16.mxu0 %v4962_v22 }
  0xbd   : > { %4285 = vmatmul.mubr.bf16.vlgmr.msra.gmra.mrb[0].mxu1 %v5521_v54  ;;  %v4961_v54 = vld [vmem:[%s6284_s1 + $0xe0] sm:$0xff]  }
  0xbe   : > { %4493 = vmatmul.mubr.bf16.gmra.mrb[16].mxu0 %v5511_v28  ;;  %4317 = vmatpush3.bf16.msra.mxu1 %v4953_v13  ;;  %v4965_v13 = vld [vmem:[%s6284_s1 + $0xf0] sm:$0xff]  }
  0xbf   : > { %4288 = vmatprep.mubr.bf16.mxu1 %v5556_v9  ;;  %4496 = vmatprep.mubr.bf16.mxu0 %v5525_v58 }
  0xc0   : > { %4318 = vmatprep.subr.bf16.mxu1 %v4955_v30 }
  0xc2   : > { %4319 = vmatpush3.bf16.msra.mxu1 %v4955_v30 }
  0xc3   : > { %4320 = vmatprep.subr.bf16.mxu1 %v4957_v62 }
  0xc5   : > { %4289 = vmatmul.mubr.bf16.gmra.mrb[4].mxu1 %v5579_v57 }
  0xc6   : > { %4497 = vmatmul.mubr.bf16.gmra.mrb[20].mxu0 %v5576_v14  ;;  %4292 = vmatprep.mubr.bf16.mxu1 %v5625_v1 }
  0xc7   : > { %4500 = vmatprep.mubr.bf16.mxu0 %v5586_v4  ;;  %4321 = vmatpush3.bf16.msra.mxu1 %v4957_v62 }
  0xc8   : > { %4322 = vmatprep.subr.bf16.mxu1 %v4959_v18 }
  0xcb   : > { %4323 = vmatpush3.bf16.msra.mxu1 %v4959_v18 }
  0xcc   : > { %4324 = vmatprep.subr.bf16.mxu1 %v4961_v54 }
  0xcd   : > { %4293 = vmatmul.mubr.bf16.gmra.mrb[8].mxu1 %v5632_v24 }
  0xce   : > { %4501 = vmatmul.mubr.bf16.gmra.mrb[24].mxu0 %v5615_v42  ;;  %4296 = vmatprep.mubr.bf16.mxu1 %v5655_v6 }
  0xcf   : > { %4504 = vmatprep.mubr.bf16.mxu0 %v5754_v10  ;;  %4325 = vmatpush3.bf16.msra.mxu1 %v4961_v54 }
  0xd0   : > { %4326 = vmatprep.subr.bf16.mxu1 %v4963_v50 }
  0xd3   : > { %4327 = vmatpush3.bf16.msra.mxu1 %v4963_v50 }
  0xd4   : > { %4328 = vmatprep.subr.bf16.mxu1 %v4965_v13 }
  0xd5   : > { %4297 = vmatmul.mubr.bf16.gmra.mrb[12].mxu1 %v5661_v16 }
  0xd6   : > { %4505 = vmatmul.mubr.bf16.gmra.mrb[28].mxu0 %v5232_v21  ;;  %4300 = vmatprep.mubr.bf16.mxu1 %v5681_v61  ;;  %v4966_v21 = vld [vmem:[%s6284_s1 + $0x210] sm:$0xff]  }
  0xd7   : > { %4524 = vmatprep.mubr.bf16.mxu0 %v5370_v27  ;;  %4329 = vmatpush3.bf16.msra.mxu1 %v4965_v13  ;;  %v4968_v27 = vld [vmem:[%s6284_s1 + $0x218] sm:$0xff]  }
  0xd8   : > { %4330 = vmatprep.subr.bf16.mxu1 %v4967_v51 }
  0xdb   : > { %4331 = vmatpush3.bf16.msra.mxu1 %v4967_v51 }
  0xdc   : > { %4604 = vmatprep.subr.bf16.mxu1 %v5101_v19 }
  0xdd   : > { %4301 = vmatmul.mubr.bf16.gmra.mrb[16].mxu1 %v5684_v53 }
  0xde   : > { %4525 = vmatmul.mubr.bf16.vlgmr.msra.gmra.mrb[0].mxu0 %v5388_v38  ;;  %4304 = vmatprep.mubr.bf16.mxu1 %v5703_v7  ;;  %v4969_v38 = vld [vmem:[%s6284_s1 + $0x220] sm:$0xff]  }
  0xdf   : > { %4557 = vmatpush3.bf16.msra.mxu0 %v4962_v22  ;;  %4528 = vmatprep.mubr.bf16.mxu0 %v5414_v55  ;;  %v4970_v55 = vld [vmem:[%s6284_s1 + $0x228] sm:$0xff]   ;;  %v6025_v22 = vld [vmem:[%s6285_s2] ss:$0 sm:$0xff] }
  0xe0   : > { %4558 = vmatprep.subr.bf16.mxu0 %v4964_v5 }
  0xe3   : > { %4559 = vmatpush3.bf16.msra.mxu0 %v4964_v5 }
  0xe4   : > { %4560 = vmatprep.subr.bf16.mxu0 %v4966_v21 }
  0xe5   : > { %4305 = vmatmul.mubr.bf16.gmra.mrb[20].mxu1 %v5706_v63 }
  0xe6   : > { %4529 = vmatmul.mubr.bf16.gmra.mrb[4].mxu0 %v5427_v31  ;;  %4308 = vmatprep.mubr.bf16.mxu1 %v5726_v3  ;;  %v4971_v31 = vld [vmem:[%s6284_s1 + $0x230] sm:$0xff]  }
  0xe7   : > { %4532 = vmatprep.mubr.bf16.mxu0 %v5462_v44  ;;  %4561 = vmatpush3.bf16.msra.mxu0 %v4966_v21  ;;  %v4972_v44 = vld [vmem:[%s6284_s1 + $0x238] sm:$0xff]  }
  0xe8   : > { %4562 = vmatprep.subr.bf16.mxu0 %v4968_v27 }
  0xeb   : > { %4563 = vmatpush3.bf16.msra.mxu0 %v4968_v27 }
  0xec   : > { %4564 = vmatprep.subr.bf16.mxu0 %v4969_v38 }
  0xed   : > { %4309 = vmatmul.mubr.bf16.gmra.mrb[24].mxu1 %v5729_v8 }
  0xee   : > { %4533 = vmatmul.mubr.bf16.gmra.mrb[8].mxu0 %v5474_v43  ;;  %4312 = vmatprep.mubr.bf16.mxu1 %v5747_v11  ;;  %v6341_v43 = vld [vmem:[#allocation22_spill] sm:$0xff] }
  0xef   : > { %4536 = vmatprep.mubr.bf16.mxu0 %v5514_v45  ;;  %4565 = vmatpush3.bf16.msra.mxu0 %v4969_v38  ;;  %v5102_v45 = vld [vmem:[%s6284_s1 + $0x108] sm:$0xff]  }
  0xf0   : > { %4566 = vmatprep.subr.bf16.mxu0 %v4970_v55 }
  0xf3   : > { %4567 = vmatpush3.bf16.msra.mxu0 %v4970_v55 }
  0xf4   : > { %4568 = vmatprep.subr.bf16.mxu0 %v4971_v31 }
  0xf5   : > { %4313 = vmatmul.mubr.bf16.gmra.mrb[28].mxu1 %v5750_v23 }
  0xf6   : > { %4537 = vmatmul.mubr.bf16.gmra.mrb[12].mxu0 %v5566_v25  ;;  %4332 = vmatprep.mubr.bf16.mxu1 %v5252_v34  ;;  %v1836_v34 = vshll.u32 %v5754_v10, 16 }
  0xf7   : > { %4540 = vmatprep.mubr.bf16.mxu0 %v6341_v43  ;;  %4569 = vmatpush3.bf16.msra.mxu0 %v4971_v31 }
  0xf8   : > { %4570 = vmatprep.subr.bf16.mxu0 %v4972_v44  ;;  %v1838_v48 = vrot.slane %v1836_v34, 1 }
  0xfb   : > { %4571 = vmatpush3.bf16.msra.mxu0 %v4972_v44  ;;  %v6038_v44 = vld [vmem:[%s5203_s27 + $0x48] sm:$0xff]  }
  0xfd   : > { %4333 = vmatmul.mubr.bf16.vlgmr.msra.gmra.mrb[0].mxu1 %v5297_v60  ;;  %v1834_v60 = vshrl.u32 %v5754_v10, 16 }
  0xfe   : > { %4541 = vmatmul.mubr.bf16.gmra.mrb[16].mxu0 %v5618_v12  ;;  %4612 = vmatpush3.bf16.msra.mxu1 %v5101_v19 }
  0xff   : > { %4336 = vmatprep.mubr.bf16.mxu1 %v5313_v20  ;;  %4544 = vmatprep.mubr.bf16.mxu0 %v5628_v41  ;;  %v1841_v20 = vshll.u32 %v5758_v37, 16  ;;  %v1839_v29 = vor.u32 %v1838_v48, %v1834_v60  ;;  %v5107_v37 = vld [vmem:[%s6284_s1 + $0x130] sm:$0xff]   ;;  %v6044_v48 = vld [vmem:[%s5203_s27 + $0x40] sm:$0xff]  }
 0x100   : > { %4605 = vmatprep.subr.bf16.mxu1 %v5102_v45 }
 0x101   : > { %v1843_v36 = vrot.slane %v1841_v20, 1 }
 0x102   : > { %4613 = vmatpush3.bf16.msra.mxu1 %v5102_v45 }
 0x103   : > { %4606 = vmatprep.subr.bf16.mxu1 %v5103_v52  ;;  %v1844_v47 = vsel %vm579_vm3, %v1839_v29, %v1843_v36  ;;  %v6344_v29 = vld [vmem:[#allocation6_spill] sm:$0xff] }
 0x104   : > { %v3259_v36 = vunpack.c.l.bf16 %v6344_v29 }
 0x105   : > { %4337 = vmatmul.mubr.bf16.gmra.mrb[4].mxu1 %v5338_v39  ;;  %v5105_v39 = vld [vmem:[%s6284_s1 + $0x120] sm:$0xff]  }
 0x106   : > { %4545 = vmatmul.mubr.bf16.gmra.mrb[20].mxu0 %v5652_v46  ;;  %4340 = vmatprep.mubr.bf16.mxu1 %v5356_v56  ;;  %v5106_v56 = vld [vmem:[%s6284_s1 + $0x128] sm:$0xff]  }
 0x107   : > { %4548 = vmatprep.mubr.bf16.mxu0 %v5658_v49  ;;  %4614 = vmatpush3.bf16.msra.mxu1 %v5103_v52 }
 0x108   : > { %4607 = vmatprep.subr.bf16.mxu1 %v5104_v40 }
 0x10b   : > { %4615 = vmatpush3.bf16.msra.mxu1 %v5104_v40 }
 0x10c   : > { %4608 = vmatprep.subr.bf16.mxu1 %v5105_v39 }
 0x10d   : > { %4341 = vmatmul.mubr.bf16.gmra.mrb[8].mxu1 %v5379_v32  ;;  %v6342_v32 = vld [vmem:[#allocation21_spill] sm:$0xff] }
 0x10e   : > { %4549 = vmatmul.mubr.bf16.gmra.mrb[24].mxu0 %v5678_v2  ;;  %4344 = vmatprep.mubr.bf16.mxu1 %v5383_v35  ;;  %v5108_v35 = vld [vmem:[%s6284_s1 + $0x138] sm:$0xff]  }
 0x10f   : > { %4552 = vmatprep.mubr.bf16.mxu0 %v1844_v47  ;;  %4616 = vmatpush3.bf16.msra.mxu1 %v5105_v39 }
 0x110   : > { %4609 = vmatprep.subr.bf16.mxu1 %v5106_v56 }
 0x113   : > { %4617 = vmatpush3.bf16.msra.mxu1 %v5106_v56 }
 0x114   : > { %4610 = vmatprep.subr.bf16.mxu1 %v5107_v37 }
 0x115   : > { %4345 = vmatmul.mubr.bf16.gmra.mrb[12].mxu1 %v5431_v33 }
 0x116   : > { %4553 = vmatmul.mubr.bf16.gmra.mrb[28].mxu0 %v6342_v32  ;;  %4348 = vmatprep.mubr.bf16.mxu1 %v5456_v17  ;;  %v3915_v32 = vunpack.c.l.bf16 %v6038_v44 }
 0x117   : > { %4572 = vmatprep.mubr.bf16.mxu0 %v5556_v9  ;;  %4618 = vmatpush3.bf16.msra.mxu1 %v5107_v37  ;;  %v3260_v37 = vunpack.c.h.bf16 %v6344_v29 }
 0x118   : > { %4611 = vmatprep.subr.bf16.mxu1 %v5108_v35 }
 0x11b   : > { %4619 = vmatpush3.bf16.msra.mxu1 %v5108_v35 }
 0x11d   : > { %4349 = vmatmul.mubr.bf16.gmra.mrb[16].mxu1 %v5467_v26 }
 0x11e   : > { %4573 = vmatmul.mubr.bf16.vlgmr.msra.gmra.mrb[0].mxu0 %v5579_v57  ;;  %4352 = vmatprep.mubr.bf16.mxu1 %v5511_v28 }
 0x11f   : > { %4576 = vmatprep.mubr.bf16.mxu0 %v5625_v1 }
 0x125   : > { %4353 = vmatmul.mubr.bf16.gmra.mrb[20].mxu1 %v5525_v58 }
 0x126   : > { %4577 = vmatmul.mubr.bf16.gmra.mrb[4].mxu0 %v5632_v24  ;;  %4356 = vmatprep.mubr.bf16.mxu1 %v5576_v14 }
 0x127   : > { %4580 = vmatprep.mubr.bf16.mxu0 %v5655_v6  ;;  %v3941_v6 = vld [vmem:[%s5203_s27 + $0x8] sm:$0xff]  }
 0x12d   : > { %4357 = vmatmul.mubr.bf16.gmra.mrb[24].mxu1 %v5586_v4 }
 0x12e   : > { %4581 = vmatmul.mubr.bf16.gmra.mrb[8].mxu0 %v5661_v16  ;;  %4360 = vmatprep.mubr.bf16.mxu1 %v5615_v42  ;;  %v6004_v16 = vld [vmem:[%s5203_s27 + $0x18] sm:$0xff]  }
 0x12f   : > { %4584 = vmatprep.mubr.bf16.mxu0 %v5681_v61  ;;  %v3883_v61 = vunpack.c.l.bf16 %v3941_v6  ;;  %v3891_v30 = vunpack.c.l.bf16 %v6004_v16  ;;  %v3892_v18 = vunpack.c.h.bf16 %v6004_v16 }
 0x135   : > { %4361 = vmatmul.mubr.bf16.gmra.mrb[28].mxu1 %v5754_v10  ;;  %v6017_v10 = vld [vmem:[%s5203_s27 + $0x38] sm:$0xff]  }
 0x136   : > { %4585 = vmatmul.mubr.bf16.gmra.mrb[12].mxu0 %v5684_v53  ;;  %4396 = vmatprep.mubr.bf16.mxu1 %v5566_v25  ;;  %v6010_v53 = vld [vmem:[%s5203_s27 + $0x28] sm:$0xff]   ;;  %v3907_v55 = vunpack.c.l.bf16 %v6017_v10  ;;  %v3908_v52 = vunpack.c.h.bf16 %v6017_v10 }
 0x137   : > { %4588 = vmatprep.mubr.bf16.mxu0 %v5703_v7  ;;  %v6013_v7 = vld [vmem:[%s5203_s27 + $0x20] sm:$0xff]   ;;  %v3899_v51 = vunpack.c.l.bf16 %v6010_v53  ;;  %v3900_v19 = vunpack.c.h.bf16 %v6010_v53 }
 0x138   : > { %v3895_v5 = vunpack.c.l.bf16 %v6013_v7  ;;  %v3896_v38 = vunpack.c.h.bf16 %v6013_v7 }
 0x13d   : > { %4397 = vmatmul.mubr.bf16.vlgmr.msra.gmra.mrb[16].mxu1 %v6341_v43 }
 0x13e   : > { %4589 = vmatmul.mubr.bf16.gmra.mrb[16].mxu0 %v5706_v63  ;;  %4400 = vmatprep.mubr.bf16.mxu1 %v5618_v12  ;;  %v6343_v63 = vld [vmem:[#allocation7_spill] sm:$0xff] }
 0x13f   : > { %4592 = vmatprep.mubr.bf16.mxu0 %v5726_v3  ;;  %v3261_v3 = vunpack.c.l.bf16 %v6343_v63  ;;  %v3262_v40 = vunpack.c.h.bf16 %v6343_v63 }
 0x145   : > { %4401 = vmatmul.mubr.bf16.gmra.mrb[20].mxu1 %v5628_v41 }
 0x146   : > { %4593 = vmatmul.mubr.bf16.gmra.mrb[20].mxu0 %v5729_v8  ;;  %4404 = vmatprep.mubr.bf16.mxu1 %v5652_v46 }
 0x147   : > { %4596 = vmatprep.mubr.bf16.mxu0 %v5747_v11  ;;  %v3884_v11 = vunpack.c.h.bf16 %v3941_v6  ;;  %v3911_v6 = vunpack.c.l.bf16 %v6044_v48 }
 0x14d   : > { %4405 = vmatmul.mubr.bf16.gmra.mrb[24].mxu1 %v5658_v49  ;;  %v3878_v49 = vld [vmem:[%s5203_s27] sm:$0xff]  }
 0x14e   : > { %4597 = vmatmul.mubr.bf16.gmra.mrb[24].mxu0 %v5750_v23  ;;  %4408 = vmatprep.mubr.bf16.mxu1 %v5678_v2  ;;  %v6007_v2 = vld [vmem:[%s5203_s27 + $0x10] sm:$0xff]   ;;  %v3879_v8 = vunpack.c.l.bf16 %v3878_v49  ;;  %v3880_v23 = vunpack.c.h.bf16 %v3878_v49 }
 0x14f   : > { %4600 = vmatprep.mubr.bf16.mxu0 %v5773_v0  ;;  %v6020_v0 = vld [vmem:[%s5203_s27 + $0x30] sm:$0xff]   ;;  %v3887_v62 = vunpack.c.l.bf16 %v6007_v2  ;;  %v3888_v54 = vunpack.c.h.bf16 %v6007_v2 }
 0x150   : > { %v3903_v31 = vunpack.c.l.bf16 %v6020_v0  ;;  %v3904_v60 = vunpack.c.h.bf16 %v6020_v0 }
 0x155   : > { %4409 = vmatmul.mubr.bf16.gmra.mrb[28].mxu1 %v1844_v47 }
 0x156   : > { %4601 = vmatmul.mubr.bf16.gmra.mrb[28].mxu0 %v5819_v59 }
 0x1d0   : > { %v4334_v1 = vpop.f32.mrb[0].mxu1 }
 0x1d1   : > { %v1674_v14 = vpop.f32.mrb[1].mxu1 }
 0x1d2   : > { %v4335_v41 = vpop.f32.mrb[2].mxu1 }
 0x1d3   : > { %v1677_v33 = vpop.f32.mrb[3].mxu1 }
 0x1d8   : > { %v5977_v17 = vpop.f32.mrb[4].mxu1 }
 0x1d9   : > { %v5979_v26 = vpop.f32.mrb[5].mxu1 }
 0x1da   : > { %v5981_v28 = vpop.f32.mrb[6].mxu1 }
 0x1db   : > { %v5983_v58 = vpop.f32.mrb[7].mxu1 }
 0x1e0   : > { %v5985_v9 = vpop.f32.mrb[8].mxu1 }
 0x1e1   : > { %v5987_v25 = vpop.f32.mrb[9].mxu1 }
 0x1e2   : > { %v5989_v57 = vpop.f32.mrb[10].mxu1 }
 0x1e3   : > { %v5991_v4 = vpop.f32.mrb[11].mxu1 }
 0x1e8   : > { %v5993_v42 = vpop.f32.mrb[12].mxu1 }
 0x1e9   : > { %v5995_v12 = vpop.f32.mrb[13].mxu1 }
 0x1ea   : > { %v5997_v24 = vpop.f32.mrb[14].mxu1 }
 0x1eb   : > { %v5999_v46 = vpop.f32.mrb[15].mxu1 }
 0x1f1   : > { %v4574_v59 = vpop.f32.mrb[0].mxu0 }
 0x1f2   : > { %v4620_v50 = vadd.f32 %v4574_v59, %v4334_v1  ;;  %v2997_v13 = vpop.f32.mrb[1].mxu0 }
 0x1f3   : > { %v4621_v21 = vadd.f32 %v2997_v13, %v1674_v14  ;;  %v4575_v27 = vpop.f32.mrb[2].mxu0  ;;  %v6345_v14 = vld [vmem:[#allocation9_spill] sm:$0xff] }
 0x1f4   : > { %v3165_v43 = vadd.f32 %v4620_v50, %v6025_v22  ;;  %v4622_v45 = vadd.f32 %v4575_v27, %v4335_v41  ;;  %v3000_v34 = vpop.f32.mrb[3].mxu0  ;;  %v3265_v41 = vunpack.c.l.bf16 %v6345_v14  ;;  %v3916_v50 = vunpack.c.h.bf16 %v6038_v44  ;;  %v6346_v27 = vld [vmem:[#allocation8_spill] sm:$0xff] }
 0x1f5   : > { %v3163_v20 = vadd.f32 %v4621_v21, %v6025_v22  ;;  %v4623_v47 = vadd.f32 %v3000_v34, %v1677_v33  ;;  %v3912_v33 = vunpack.c.h.bf16 %v6044_v48 }
 0x1f6   : > { %v3293_v39 = vmul.f32 %v3883_v61, %v3165_v43  ;;  %v3166_v56 = vadd.f32 %v4622_v45, %v6025_v22  ;;  %v6060_v45 = vld [vmem:[%s5203_s27 + $0x58] sm:$0xff]   ;;  %v6067_v43 = vld [vmem:[%s5203_s27 + $0x50] sm:$0xff]  }
 0x1f7   : > { %v3291_v35 = vmul.f32 %v3879_v8, %v3163_v20  ;;  %v3164_v1 = vadd.f32 %v4623_v47, %v6025_v22 }
 0x1f8   : > { %v3840_v49 = vmul.f32 -1.442695, %v3293_v39  ;;  %v3294_v59 = vmul.f32 %v3884_v11, %v3166_v56 }
 0x1f9   : > { %v3838_v61 = vmul.f32 -1.442695, %v3291_v35  ;;  %v3292_v13 = vmul.f32 %v3880_v23, %v3164_v1  ;;  %v4578_v21 = vpop.f32.mrb[4].mxu0  ;;  %v6347_v23 = vld [vmem:[#allocation11_spill] sm:$0xff]  ;;  %v3920_v1 = vunpack.c.h.bf16 %v6067_v43 }
 0x1fa   : > { %4973 = vpow2.f32 %v3840_v49  ;;  %v3841_v34 = vmul.f32 -1.442695, %v3294_v59  ;;  %v4624_v20 = vadd.f32 %v4578_v21, %v5977_v17  ;;  %v3013_v47 = vpop.f32.mrb[5].mxu0  ;;  %v6089_v21 = vld [vmem:[%s5203_s27 + $0x60] sm:$0xff]  }
 0x1fb   : > { %4975 = vpow2.f32 %v3838_v61  ;;  %v3839_v39 = vmul.f32 -1.442695, %v3292_v13  ;;  %v4625_v56 = vadd.f32 %v3013_v47, %v5979_v26  ;;  %v4579_v35 = vpop.f32.mrb[6].mxu0  ;;  %v6348_v13 = vld [vmem:[#allocation10_spill] sm:$0xff]  ;;  %v3927_v16 = vunpack.c.l.bf16 %v6089_v21 }
 0x1fc   : > { %4977 = vpow2.f32 %v3841_v34  ;;  %v3169_v8 = vadd.f32 %v4624_v20, %v6025_v22  ;;  %v4626_v49 = vadd.f32 %v4579_v35, %v5981_v28  ;;  %v3016_v17 = vpop.f32.mrb[7].mxu0  ;;  %v6081_v35 = vld [vmem:[%s5203_s27 + $0x68] sm:$0xff]  }
 0x1fd   : > { %4979 = vpow2.f32 %v3839_v39  ;;  %v3167_v61 = vadd.f32 %v4625_v56, %v6025_v22  ;;  %v4627_v26 = vadd.f32 %v3016_v17, %v5983_v58  ;;  %v3931_v58 = vunpack.c.l.bf16 %v6081_v35 }
 0x1fe   : > { %v3297_v47 = vmul.f32 %v3891_v30, %v3169_v8  ;;  %v3170_v34 = vadd.f32 %v4626_v49, %v6025_v22  ;;  %v6349_v49 = vld [vmem:[#allocation13_spill] sm:$0xff] }
 0x1ff   : > { %v3295_v39 = vmul.f32 %v3887_v62, %v3167_v61  ;;  %v3168_v56 = vadd.f32 %v4627_v26, %v6025_v22  ;;  %v3273_v20 = vunpack.c.l.bf16 %v6349_v49  ;;  %v6350_v26 = vld [vmem:[#allocation12_spill] sm:$0xff] }
 0x200   : > { %v3844_v30 = vmul.f32 -1.442695, %v3297_v47  ;;  %v3298_v8 = vmul.f32 %v3892_v18, %v3170_v34 }
 0x201   : > { %v3842_v28 = vmul.f32 -1.442695, %v3295_v39  ;;  %v3296_v62 = vmul.f32 %v3888_v54, %v3168_v56  ;;  %v4582_v61 = vpop.f32.mrb[8].mxu0 }
 0x202   : > { %4981 = vpow2.f32 %v3844_v30  ;;  %v3845_v17 = vmul.f32 -1.442695, %v3298_v8  ;;  %v4628_v47 = vadd.f32 %v4582_v61, %v5985_v9  ;;  %v3029_v11 = vpop.f32.mrb[9].mxu0  ;;  %v3932_v8 = vunpack.c.h.bf16 %v6081_v35 }
 0x203   : > { %4983 = vpow2.f32 %v3842_v28  ;;  %v3843_v18 = vmul.f32 -1.442695, %v3296_v62  ;;  %v4629_v34 = vadd.f32 %v3029_v11, %v5987_v25  ;;  %v4583_v39 = vpop.f32.mrb[10].mxu0 }
 0x204   : > { %v4974_v54 = vpop.eup %4973  ;;  %4985 = vpow2.f32 %v3845_v17  ;;  %v3173_v56 = vadd.f32 %v4628_v47, %v6025_v22  ;;  %v4630_v59 = vadd.f32 %v4583_v39, %v5989_v57  ;;  %v3032_v30 = vpop.f32.mrb[11].mxu0  ;;  %v3272_v57 = vunpack.c.h.bf16 %v6350_v26 }
 0x205   : > { %v4976_v9 = vpop.eup %4975  ;;  %v3421_v61 = vadd.f32 1.0, %v4974_v54  ;;  %4987 = vpow2.f32 %v3843_v18  ;;  %v3171_v28 = vadd.f32 %v4629_v34, %v6025_v22  ;;  %v4631_v62 = vadd.f32 %v3032_v30, %v5991_v4 }
 0x206   : > { %v4978_v25 = vpop.eup %4977  ;;  %v3419_v11 = vadd.f32 1.0, %v4976_v9  ;;  %v3301_v2 = vmul.f32 %v3899_v51, %v3173_v56  ;;  %v3174_v17 = vadd.f32 %v4630_v59, %v6025_v22  ;;  %v3928_v9 = vunpack.c.h.bf16 %v6089_v21 }
 0x207   : > { %v4980_v47 = vpop.eup %4979  ;;  %4989 = vrcp.f32 %v3421_v61  ;;  %v3422_v39 = vadd.f32 1.0, %v4978_v25  ;;  %v3299_v18 = vmul.f32 %v3895_v5, %v3171_v28  ;;  %v3172_v34 = vadd.f32 %v4631_v62, %v6025_v22  ;;  %v6121_v61 = vld [vmem:[%s5203_s27 + $0x78] sm:$0xff]   ;;  %v6351_v25 = vld [vmem:[#allocation15_spill] sm:$0xff] }
 0x208   : > { %4991 = vrcp.f32 %v3419_v11  ;;  %v3420_v4 = vadd.f32 1.0, %v4980_v47  ;;  %v3848_v54 = vmul.f32 -1.442695, %v3301_v2  ;;  %v3302_v30 = vmul.f32 %v3900_v19, %v3174_v17  ;;  %v6352_v17 = vld [vmem:[#allocation14_spill] sm:$0xff] }
 0x209   : > { %4993 = vrcp.f32 %v3422_v39  ;;  %v3846_v51 = vmul.f32 -1.442695, %v3299_v18  ;;  %v3300_v59 = vmul.f32 %v3896_v38, %v3172_v34  ;;  %v4586_v56 = vpop.f32.mrb[12].mxu0  ;;  %v3277_v2 = vunpack.c.l.bf16 %v6351_v25 }
 0x20a   : > { %4995 = vrcp.f32 %v3420_v4  ;;  %v3849_v5 = vmul.f32 -1.442695, %v3302_v30  ;;  %v4632_v28 = vadd.f32 %v4586_v56, %v5993_v42  ;;  %v3045_v62 = vpop.f32.mrb[13].mxu0  ;;  %v3275_v7 = vunpack.c.l.bf16 %v6352_v17 }
 0x20b   : > { %4997 = vpow2.f32 %v3848_v54  ;;  %v3847_v53 = vmul.f32 -1.442695, %v3300_v59  ;;  %v4633_v19 = vadd.f32 %v3045_v62, %v5995_v12  ;;  %v4587_v11 = vpop.f32.mrb[14].mxu0  ;;  %v3939_v42 = vunpack.c.l.bf16 %v6121_v61 }
 0x20c   : > { %v4982_v38 = vpop.eup %4981  ;;  %4999 = vpow2.f32 %v3846_v51  ;;  %v3177_v47 = vadd.f32 %v4632_v28, %v6025_v22  ;;  %v4634_v39 = vadd.f32 %v4587_v11, %v5997_v24  ;;  %v3048_v18 = vpop.f32.mrb[15].mxu0  ;;  %v6136_v28 = vld [vmem:[%s5203_s27 + $0x70] sm:$0xff]  }
 0x20d   : > { %v4984_v34 = vpop.eup %4983  ;;  %v3425_v4 = vadd.f32 1.0, %v4982_v38  ;;  %5001 = vpow2.f32 %v3849_v5  ;;  %v3175_v54 = vadd.f32 %v4633_v19, %v6025_v22  ;;  %v4635_v12 = vadd.f32 %v3048_v18, %v5999_v46 }
 0x20e   : > { %v4986_v30 = vpop.eup %4985  ;;  %v3423_v59 = vadd.f32 1.0, %v4984_v34  ;;  %5003 = vpow2.f32 %v3847_v53  ;;  %v3305_v51 = vmul.f32 %v3907_v55, %v3177_v47  ;;  %v3178_v56 = vadd.f32 %v4634_v39, %v6025_v22 }
 0x20f   : > { %v4988_v24 = vpop.eup %4987  ;;  %5005 = vrcp.f32 %v3425_v4  ;;  %v3426_v62 = vadd.f32 1.0, %v4986_v30  ;;  %v3303_v5 = vmul.f32 %v3903_v31, %v3175_v54  ;;  %v3176_v19 = vadd.f32 %v4635_v12, %v6025_v22 }
 0x210   : > { %5007 = vrcp.f32 %v3423_v59  ;;  %v3424_v46 = vadd.f32 1.0, %v4988_v24  ;;  %v3852_v11 = vmul.f32 -1.442695, %v3305_v51  ;;  %v3306_v53 = vmul.f32 %v3908_v52, %v3178_v56  ;;  %v4398_v38 = vpop.f32.mrb[16].mxu1 }
 0x211   : > { %v4990_v55 = vpop.eup %4989  ;;  %5009 = vrcp.f32 %v3426_v62  ;;  %v3850_v47 = vmul.f32 -1.442695, %v3303_v5  ;;  %v3304_v39 = vmul.f32 %v3904_v60, %v3176_v19  ;;  %v4590_v18 = vpop.f32.mrb[16].mxu0  ;;  %v3935_v4 = vunpack.c.l.bf16 %v6136_v28 }
 0x212   : > { %v2008_v34 = vpop.f32.mrb[17].mxu1  ;;  %v4992_v31 = vpop.eup %4991  ;;  %v3517_v54 = vadd.f32 1.0, %v4990_v55  ;;  %5011 = vrcp.f32 %v3424_v46  ;;  %v3853_v12 = vmul.f32 -1.442695, %v3306_v53  ;;  %v4636_v30 = vadd.f32 %v4590_v18, %v4398_v38 }
 0x213   : > { %v3061_v59 = vpop.f32.mrb[17].mxu0  ;;  %v4399_v51 = vpop.f32.mrb[18].mxu1  ;;  %v3515_v52 = vadd.f32 1.0, %v4992_v31  ;;  %5013 = vpow2.f32 %v3852_v11  ;;  %v3851_v56 = vmul.f32 -1.442695, %v3304_v39 }
 0x214   : > { %v4994_v10 = vpop.eup %4993  ;;  %v4637_v24 = vadd.f32 %v3061_v59, %v2008_v34  ;;  %v4591_v62 = vpop.f32.mrb[18].mxu0  ;;  %v3549_v5 = vmul.f32 %v3517_v54, %v3261_v3  ;;  %5015 = vpow2.f32 %v3850_v47  ;;  %v3181_v46 = vadd.f32 %v4636_v30, %v6025_v22 }
 0x215   : > { %v2011_v0 = vpop.f32.mrb[19].mxu1  ;;  %v4996_v60 = vpop.eup %4995  ;;  %v3518_v19 = vadd.f32 1.0, %v4994_v10  ;;  %v3547_v55 = vmul.f32 %v3515_v52, %v3259_v36  ;;  %5017 = vpow2.f32 %v3853_v12  ;;  %v4638_v30 = vadd.f32 %v4591_v62, %v4399_v51 }
 0x216   : > { %v3064_v53 = vpop.f32.mrb[19].mxu0  ;;  %v4998_v38 = vpop.eup %4997  ;;  %v3516_v11 = vadd.f32 1.0, %v4996_v60  ;;  %v3179_v39 = vadd.f32 %v4637_v24, %v6025_v22  ;;  %3581 = vst [vmem:[%s5208_s30 + $0x10] sm:$0xff] %v3549_v5  ;;  %5019 = vpow2.f32 %v3851_v56  ;;  %v3309_v47 = vmul.f32 %v3915_v32, %v3181_v46 }
 0x217   : > { %v5000_v18 = vpop.eup %4999  ;;  %v3550_v3 = vmul.f32 %v3518_v19, %v3262_v40  ;;  %v3429_v34 = vadd.f32 1.0, %v4998_v38  ;;  %3579 = vst [vmem:[%s5208_s30] sm:$0xff] %v3547_v55  ;;  %v4639_v10 = vadd.f32 %v3064_v53, %v2011_v0  ;;  %v3182_v29 = vadd.f32 %v4638_v30, %v6025_v22 }
 0x218   : > { %v5002_v31 = vpop.eup %5001  ;;  %v3548_v36 = vmul.f32 %v3516_v11, %v3260_v37  ;;  %v3427_v54 = vadd.f32 1.0, %v5000_v18  ;;  %v3307_v12 = vmul.f32 %v3911_v6, %v3179_v39  ;;  %v3856_v40 = vmul.f32 -1.442695, %v3309_v47  ;;  %v4402_v52 = vpop.f32.mrb[20].mxu1 }
 0x219   : > { %v5004_v59 = vpop.eup %5003  ;;  %3582 = vst [vmem:[%s5208_s30 + $0x18] sm:$0xff] %v3550_v3  ;;  %5021 = vrcp.f32 %v3429_v34  ;;  %v3430_v63 = vadd.f32 1.0, %v5002_v31  ;;  %v4594_v37 = vpop.f32.mrb[20].mxu0  ;;  %v3180_v6 = vadd.f32 %v4639_v10, %v6025_v22  ;;  %v3310_v53 = vmul.f32 %v3916_v50, %v3182_v29 }
 0x21a   : > { %v5006_v56 = vpop.eup %5005  ;;  %3580 = vst [vmem:[%s5208_s30 + $0x8] sm:$0xff] %v3548_v36  ;;  %5023 = vrcp.f32 %v3427_v54  ;;  %v3428_v32 = vadd.f32 1.0, %v5004_v59  ;;  %v3854_v24 = vmul.f32 -1.442695, %v3307_v12  ;;  %v2024_v60 = vpop.f32.mrb[21].mxu1  ;;  %v4640_v51 = vadd.f32 %v4594_v37, %v4402_v52 }
 0x21b   : > { %v5008_v5 = vpop.eup %5007  ;;  %v3521_v19 = vadd.f32 1.0, %v5006_v56  ;;  %5025 = vrcp.f32 %v3430_v63  ;;  %v3077_v62 = vpop.f32.mrb[21].mxu0  ;;  %v3308_v47 = vmul.f32 %v3912_v33, %v3180_v6  ;;  %v6353_v54 = vunpack.c.l.bf16 %v6346_v27 }
 0x21c   : > { %v4403_v46 = vpop.f32.mrb[22].mxu1  ;;  %v5010_v38 = vpop.eup %5009  ;;  %v3519_v0 = vadd.f32 1.0, %v5008_v5  ;;  %5027 = vrcp.f32 %v3428_v32  ;;  %v4641_v55 = vadd.f32 %v3077_v62, %v2024_v60  ;;  %v3857_v12 = vmul.f32 -1.442695, %v3310_v53 }
 0x21d   : > { %v4595_v11 = vpop.f32.mrb[22].mxu0  ;;  %v2027_v39 = vpop.f32.mrb[23].mxu1  ;;  %v3553_v3 = vmul.f32 %v3521_v19, %v3265_v41  ;;  %v3522_v34 = vadd.f32 1.0, %v5010_v38  ;;  %5029 = vpow2.f32 %v3856_v40  ;;  %v6354_v59 = vunpack.c.h.bf16 %v6345_v14 }
 0x21e   : > { %v5012_v18 = vpop.eup %5011  ;;  %v3080_v31 = vpop.f32.mrb[23].mxu0  ;;  %v3551_v44 = vmul.f32 %v3519_v0, %v6353_v54  ;;  %5031 = vpow2.f32 %v3854_v24  ;;  %v3855_v40 = vmul.f32 -1.442695, %v3308_v47  ;;  %v3185_v48 = vadd.f32 %v4640_v51, %v6025_v22 }
 0x21f   : > { %v5014_v36 = vpop.eup %5013  ;;  %v3520_v50 = vadd.f32 1.0, %v5012_v18  ;;  %3585 = vst [vmem:[%s5208_s30 + $0x30] sm:$0xff] %v3553_v3  ;;  %v3554_v41 = vmul.f32 %v3522_v34, %v6354_v59  ;;  %v6355_v10 = vunpack.c.h.bf16 %v6346_v27  ;;  %5033 = vpow2.f32 %v3857_v12 }
 0x220   : > { %v5016_v30 = vpop.eup %5015  ;;  %v3433_v63 = vadd.f32 1.0, %v5014_v36  ;;  %3583 = vst [vmem:[%s5208_s30 + $0x20] sm:$0xff] %v3551_v44  ;;  %v3183_v32 = vadd.f32 %v4641_v55, %v6025_v22  ;;  %v6356_v14 = vunpack.c.l.bf16 %v6060_v45  ;;  %v4642_v60 = vadd.f32 %v4595_v11, %v4403_v46  ;;  %v4406_v5 = vpop.f32.mrb[24].mxu1 }
 0x221   : > { %v5018_v33 = vpop.eup %5017  ;;  %v3552_v52 = vmul.f32 %v3520_v50, %v6355_v10  ;;  %v3431_v56 = vadd.f32 1.0, %v5016_v30  ;;  %3586 = vst [vmem:[%s5208_s30 + $0x38] sm:$0xff] %v3554_v41  ;;  %v6357_v6 = vunpack.c.l.bf16 %v6067_v43  ;;  %v4643_v51 = vadd.f32 %v3080_v31, %v2027_v39  ;;  %v4598_v62 = vpop.f32.mrb[24].mxu0 }
 0x222   : > { %v5020_v24 = vpop.eup %5019  ;;  %5035 = vrcp.f32 %v3433_v63  ;;  %v3434_v29 = vadd.f32 1.0, %v5018_v33  ;;  %v3313_v37 = vmul.f32 %v6356_v14, %v3185_v48  ;;  %v2040_v38 = vpop.f32.mrb[25].mxu1  ;;  %v3186_v55 = vadd.f32 %v4642_v60, %v6025_v22 }
 0x223   : > { %3584 = vst [vmem:[%s5208_s30 + $0x28] sm:$0xff] %v3552_v52  ;;  %5037 = vrcp.f32 %v3431_v56  ;;  %v3432_v19 = vadd.f32 1.0, %v5020_v24  ;;  %v3311_v27 = vmul.f32 %v6357_v6, %v3183_v32  ;;  %v5022_v0 = vpop.eup %5021  ;;  %v4644_v18 = vadd.f32 %v4598_v62, %v4406_v5  ;;  %v3093_v3 = vpop.f32.mrb[25].mxu0 }
 0x224   : > { %5039 = vrcp.f32 %v3434_v29  ;;  %v3860_v53 = vmul.f32 -1.442695, %v3313_v37  ;;  %v4407_v34 = vpop.f32.mrb[26].mxu1  ;;  %v5024_v47 = vpop.eup %5023  ;;  %v3525_v46 = vadd.f32 1.0, %v5022_v0  ;;  %v3184_v36 = vadd.f32 %v4643_v51, %v6025_v22 }
 0x225   : > { %5041 = vrcp.f32 %v3432_v19  ;;  %v3858_v11 = vmul.f32 -1.442695, %v3311_v27  ;;  %v4599_v54 = vpop.f32.mrb[26].mxu0  ;;  %v2043_v44 = vpop.f32.mrb[27].mxu1  ;;  %v3523_v39 = vadd.f32 1.0, %v5024_v47  ;;  %v6358_v31 = vunpack.c.h.bf16 %v6060_v45 }
 0x226   : > { %v5026_v50 = vpop.eup %5025  ;;  %5043 = vpow2.f32 %v3855_v40  ;;  %v3189_v30 = vadd.f32 %v4644_v18, %v6025_v22  ;;  %v3096_v59 = vpop.f32.mrb[27].mxu0  ;;  %v6359_v63 = vunpack.c.l.bf16 %v6347_v23  ;;  %v3312_v10 = vmul.f32 %v3920_v1, %v3184_v36 }
 0x227   : > { %v3314_v12 = vmul.f32 %v6358_v31, %v3186_v55  ;;  %v5028_v41 = vpop.eup %5027  ;;  %v3526_v33 = vadd.f32 1.0, %v5026_v50  ;;  %5045 = vpow2.f32 %v3860_v53  ;;  %v6360_v56 = vunpack.c.l.bf16 %v6348_v13 }
 0x228   : > { %v3557_v48 = vmul.f32 %v3525_v46, %v6359_v63  ;;  %v5030_v52 = vpop.eup %5029  ;;  %v3524_v32 = vadd.f32 1.0, %v5028_v41  ;;  %5047 = vpow2.f32 %v3858_v11  ;;  %v6361_v29 = vunpack.c.h.bf16 %v6347_v23  ;;  %v4410_v27 = vpop.f32.mrb[28].mxu1 }
 0x229   : > { %v3555_v40 = vmul.f32 %v3523_v39, %v6360_v56  ;;  %v3861_v45 = vmul.f32 -1.442695, %v3314_v12  ;;  %v5032_v24 = vpop.eup %5031  ;;  %v3437_v37 = vadd.f32 1.0, %v5030_v52  ;;  %v3859_v60 = vmul.f32 -1.442695, %v3312_v10  ;;  %v4602_v53 = vpop.f32.mrb[28].mxu0 }
 0x22a   : > { %3589 = vst [vmem:[%s5208_s30 + $0x50] sm:$0xff] %v3557_v48  ;;  %v3558_v14 = vmul.f32 %v3526_v33, %v6361_v29  ;;  %v3317_v5 = vmul.f32 %v3931_v58, %v3189_v30  ;;  %v6362_v43 = vunpack.c.h.bf16 %v6348_v13  ;;  %v3435_v19 = vadd.f32 1.0, %v5032_v24  ;;  %v5034_v51 = vpop.eup %5033  ;;  %v2056_v55 = vpop.f32.mrb[29].mxu1 }
 0x22b   : > { %3587 = vst [vmem:[%s5208_s30 + $0x40] sm:$0xff] %v3555_v40  ;;  %5049 = vpow2.f32 %v3861_v45  ;;  %v4645_v6 = vadd.f32 %v3093_v3, %v2040_v38  ;;  %v4646_v23 = vadd.f32 %v4599_v54, %v4407_v34  ;;  %v4647_v0 = vadd.f32 %v3096_v59, %v2043_v44  ;;  %v3109_v46 = vpop.f32.mrb[29].mxu0  ;;  %v4411_v11 = vpop.f32.mrb[30].mxu1 }
 0x22c   : > { %v3556_v1 = vmul.f32 %v3524_v32, %v6362_v43  ;;  %3590 = vst [vmem:[%s5208_s30 + $0x58] sm:$0xff] %v3558_v14  ;;  %5051 = vrcp.f32 %v3437_v37  ;;  %v3864_v62 = vmul.f32 -1.442695, %v3317_v5  ;;  %v5036_v18 = vpop.eup %5035  ;;  %v3438_v58 = vadd.f32 1.0, %v5034_v51  ;;  %v4603_v34 = vpop.f32.mrb[30].mxu0 }
 0x22d   : > { %5053 = vrcp.f32 %v3435_v19  ;;  %v3187_v47 = vadd.f32 %v4645_v6, %v6025_v22  ;;  %v4648_v13 = vadd.f32 %v4602_v53, %v4410_v27  ;;  %v5038_v36 = vpop.eup %5037  ;;  %v3529_v38 = vadd.f32 1.0, %v5036_v18  ;;  %v2059_v54 = vpop.f32.mrb[31].mxu1 }
 0x22e   : > { %3588 = vst [vmem:[%s5208_s30 + $0x48] sm:$0xff] %v3556_v1  ;;  %5055 = vpow2.f32 %v3859_v60  ;;  %v3190_v3 = vadd.f32 %v4646_v23, %v6025_v22  ;;  %v3188_v50 = vadd.f32 %v4647_v0, %v6025_v22  ;;  %v5040_v44 = vpop.eup %5039  ;;  %v3527_v39 = vadd.f32 1.0, %v5038_v36  ;;  %v3112_v30 = vpop.f32.mrb[31].mxu0 }
 0x22f   : > { %5057 = vrcp.f32 %v3438_v58  ;;  %v3315_v31 = vmul.f32 %v3927_v16, %v3187_v47  ;;  %v3193_v12 = vadd.f32 %v4648_v13, %v6025_v22  ;;  %v5042_v59 = vpop.eup %5041  ;;  %v3561_v41 = vmul.f32 %v3529_v38, %v3273_v20 }
 0x230   : > { %v3530_v63 = vadd.f32 1.0, %v5040_v44  ;;  %5059 = vpow2.f32 %v3864_v62  ;;  %v3318_v48 = vmul.f32 %v3932_v8, %v3190_v3  ;;  %v5044_v33 = vpop.eup %5043  ;;  %v6363_v10 = vunpack.c.l.bf16 %v6350_v26 }
 0x231   : > { %v3528_v56 = vadd.f32 1.0, %v5042_v59  ;;  %v3862_v16 = vmul.f32 -1.442695, %v3315_v31  ;;  %v3316_v40 = vmul.f32 %v3928_v9, %v3188_v50  ;;  %v5046_v32 = vpop.eup %5045  ;;  %3593 = vst [vmem:[%s5208_s30 + $0x70] sm:$0xff] %v3561_v41  ;;  %v6364_v20 = vunpack.c.h.bf16 %v6349_v49 }
 0x232   : > { %v3559_v52 = vmul.f32 %v3527_v39, %v6363_v10  ;;  %v3436_v24 = vadd.f32 1.0, %v5044_v33  ;;  %v3321_v35 = vmul.f32 %v3939_v42, %v3193_v12  ;;  %v3940_v8 = vunpack.c.h.bf16 %v6121_v61  ;;  %v5048_v29 = vpop.eup %5047  ;;  %v6366_v12 = vld [vmem:[#allocation16_spill] sm:$0xff] }
 0x233   : > { %v3562_v45 = vmul.f32 %v3530_v63, %v6364_v20  ;;  %v3560_v14 = vmul.f32 %v3528_v56, %v3272_v57  ;;  %v3441_v37 = vadd.f32 1.0, %v5046_v32  ;;  %5061 = vpow2.f32 %v3862_v16 }
 0x234   : > { %3591 = vst [vmem:[%s5208_s30 + $0x60] sm:$0xff] %v3559_v52  ;;  %v3865_v21 = vmul.f32 -1.442695, %v3318_v48  ;;  %5063 = vrcp.f32 %v3436_v24  ;;  %v3439_v9 = vadd.f32 1.0, %v5048_v29  ;;  %v4649_v49 = vadd.f32 %v3109_v46, %v2056_v55 }
 0x235   : > { %3594 = vst [vmem:[%s5208_s30 + $0x78] sm:$0xff] %v3562_v45  ;;  %v3936_v60 = vunpack.c.h.bf16 %v6136_v28  ;;  %v5050_v5 = vpop.eup %5049  ;;  %3592 = vst [vmem:[%s5208_s30 + $0x68] sm:$0xff] %v3560_v14  ;;  %5065 = vrcp.f32 %v3441_v37  ;;  %v3863_v42 = vmul.f32 -1.442695, %v3316_v40  ;;  %v4650_v43 = vadd.f32 %v4603_v34, %v4411_v11 }
 0x236   : > { %v4651_v61 = vadd.f32 %v3112_v30, %v2059_v54  ;;  %v5052_v1 = vpop.eup %5051  ;;  %5067 = vrcp.f32 %v3439_v9  ;;  %v3442_v19 = vadd.f32 1.0, %v5050_v5  ;;  %v3868_v26 = vmul.f32 -1.442695, %v3321_v35 }
 0x237   : > { %v3191_v57 = vadd.f32 %v4649_v49, %v6025_v22  ;;  %v5054_v6 = vpop.eup %5053  ;;  %v3533_v27 = vadd.f32 1.0, %v5052_v1  ;;  %5069 = vpow2.f32 %v3865_v21  ;;  %v3194_v51 = vadd.f32 %v4650_v43, %v6025_v22  ;;  %v6367_v21 = vld [vmem:[#allocation19_spill] sm:$0xff]  ;;  %v6368_v1 = vld [vmem:[#allocation18_spill] sm:$0xff] }
 0x238   : > { %v3192_v62 = vadd.f32 %v4651_v61, %v6025_v22  ;;  %v5056_v23 = vpop.eup %5055  ;;  %v3531_v0 = vadd.f32 1.0, %v5054_v6  ;;  %v3278_v53 = vunpack.c.h.bf16 %v6351_v25  ;;  %5071 = vrcp.f32 %v3442_v19 }
 0x239   : > { %v3319_v55 = vmul.f32 %v3935_v4, %v3191_v57  ;;  %v5058_v18 = vpop.eup %5057  ;;  %v3565_v58 = vmul.f32 %v3533_v27, %v3277_v2  ;;  %v3440_v47 = vadd.f32 1.0, %v5056_v23  ;;  %5073 = vpow2.f32 %v3863_v42 }
 0x23a   : > { %v3322_v13 = vmul.f32 %v3940_v8, %v3194_v51  ;;  %v5060_v46 = vpop.eup %5059  ;;  %v3563_v22 = vmul.f32 %v3531_v0, %v3275_v7  ;;  %v3534_v11 = vadd.f32 1.0, %v5058_v18  ;;  %5075 = vpow2.f32 %v3868_v26  ;;  %v6365_v7 = vld [vmem:[#allocation17_spill] sm:$0xff] }
 0x23b   : > { %v3866_v36 = vmul.f32 -1.442695, %v3319_v55  ;;  %3597 = vst [vmem:[%s5208_s30 + $0x90] sm:$0xff] %v3565_v58  ;;  %5077 = vrcp.f32 %v3440_v47  ;;  %v3445_v28 = vadd.f32 1.0, %v5060_v46  ;;  %v3320_v38 = vmul.f32 %v3936_v60, %v3192_v62 }
 0x23c   : > { %v3869_v4 = vmul.f32 -1.442695, %v3322_v13  ;;  %3595 = vst [vmem:[%s5208_s30 + $0x80] sm:$0xff] %v3563_v22  ;;  %v3566_v3 = vmul.f32 %v3534_v11, %v3278_v53  ;;  %v3276_v2 = vunpack.c.h.bf16 %v6352_v17  ;;  %v3281_v54 = vunpack.c.l.bf16 %v6365_v7  ;;  %v6369_v11 = vld [vmem:[#allocation20_spill] sm:$0xff] }
 0x23d   : > { %5079 = vpow2.f32 %v3866_v36  ;;  %v5062_v25 = vpop.eup %5061  ;;  %v3867_v50 = vmul.f32 -1.442695, %v3320_v38  ;;  %v3279_v30 = vunpack.c.l.bf16 %v6366_v12  ;;  %v3282_v33 = vunpack.c.h.bf16 %v6365_v7 }
 0x23e   : > { %5081 = vrcp.f32 %v3445_v28  ;;  %v5064_v34 = vpop.eup %5063  ;;  %3598 = vst [vmem:[%s5208_s30 + $0x98] sm:$0xff] %v3566_v3  ;;  %v3443_v44 = vadd.f32 1.0, %v5062_v25  ;;  %v3280_v45 = vunpack.c.h.bf16 %v6366_v12  ;;  %v3285_v9 = vunpack.c.l.bf16 %v6367_v21 }
 0x23f   : > { %5083 = vpow2.f32 %v3869_v4  ;;  %v5066_v39 = vpop.eup %5065  ;;  %v3532_v31 = vadd.f32 1.0, %v5064_v34  ;;  %v3283_v19 = vunpack.c.l.bf16 %v6368_v1  ;;  %v3286_v23 = vunpack.c.h.bf16 %v6367_v21 }
 0x240   : > { %5085 = vpow2.f32 %v3867_v50  ;;  %v5068_v59 = vpop.eup %5067  ;;  %v3537_v41 = vadd.f32 1.0, %v5066_v39  ;;  %v3284_v55 = vunpack.c.h.bf16 %v6368_v1  ;;  %v3289_v58 = vunpack.c.l.bf16 %v5222_v15 }
 0x241   : > { %5087 = vrcp.f32 %v3443_v44  ;;  %v5070_v63 = vpop.eup %5069  ;;  %v3564_v17 = vmul.f32 %v3532_v31, %v3276_v2  ;;  %v3535_v48 = vadd.f32 1.0, %v5068_v59  ;;  %v3287_v36 = vunpack.c.l.bf16 %v6369_v11 }
 0x242   : > { %v5072_v10 = vpop.eup %5071  ;;  %v3569_v52 = vmul.f32 %v3537_v41, %v3281_v54  ;;  %v3446_v56 = vadd.f32 1.0, %v5070_v63  ;;  %v3290_v25 = vunpack.c.h.bf16 %v5222_v15  ;;  %v3288_v50 = vunpack.c.h.bf16 %v6369_v11 }
 0x243   : > { %v5074_v16 = vpop.eup %5073  ;;  %3596 = vst [vmem:[%s5208_s30 + $0x88] sm:$0xff] %v3564_v17  ;;  %v3567_v40 = vmul.f32 %v3535_v48, %v3279_v30  ;;  %v3538_v32 = vadd.f32 1.0, %v5072_v10 }
 0x244   : > { %v5076_v20 = vpop.eup %5075  ;;  %3601 = vst [vmem:[%s5208_s30 + $0xb0] sm:$0xff] %v3569_v52  ;;  %5089 = vrcp.f32 %v3446_v56  ;;  %v3444_v24 = vadd.f32 1.0, %v5074_v16 }
 0x245   : > { %v5078_v35 = vpop.eup %5077  ;;  %3599 = vst [vmem:[%s5208_s30 + $0xa0] sm:$0xff] %v3567_v40  ;;  %v3570_v8 = vmul.f32 %v3538_v32, %v3282_v33  ;;  %v3449_v29 = vadd.f32 1.0, %v5076_v20 }
 0x246   : > { %v3536_v37 = vadd.f32 1.0, %v5078_v35  ;;  %5091 = vrcp.f32 %v3444_v24 }
 0x247   : > { %v5080_v14 = vpop.eup %5079  ;;  %3602 = vst [vmem:[%s5208_s30 + $0xb8] sm:$0xff] %v3570_v8  ;;  %5093 = vrcp.f32 %v3449_v29 }
 0x248   : > { %v5082_v49 = vpop.eup %5081  ;;  %v3447_v60 = vadd.f32 1.0, %v5080_v14  ;;  %v3568_v42 = vmul.f32 %v3536_v37, %v3280_v45 }
 0x249   : > { %v5084_v5 = vpop.eup %5083  ;;  %v3541_v43 = vadd.f32 1.0, %v5082_v49 }
 0x24a   : > { %v5086_v61 = vpop.eup %5085  ;;  %5095 = vrcp.f32 %v3447_v60  ;;  %v3450_v26 = vadd.f32 1.0, %v5084_v5  ;;  %3600 = vst [vmem:[%s5208_s30 + $0xa8] sm:$0xff] %v3568_v42 }
 0x24b   : > { %v5088_v57 = vpop.eup %5087  ;;  %v3573_v6 = vmul.f32 %v3541_v43, %v3285_v9  ;;  %v3448_v27 = vadd.f32 1.0, %v5086_v61 }
 0x24c   : > { %v3539_v51 = vadd.f32 1.0, %v5088_v57  ;;  %5097 = vrcp.f32 %v3450_v26 }
 0x24d   : > { %3605 = vst [vmem:[%s5208_s30 + $0xd0] sm:$0xff] %v3573_v6  ;;  %5099 = vrcp.f32 %v3448_v27 }
 0x24e   : > { %v3571_v62 = vmul.f32 %v3539_v51, %v3283_v19  ;;  %v5090_v0 = vpop.eup %5089 }
 0x24f   : > { %v3542_v53 = vadd.f32 1.0, %v5090_v0 }
 0x250   : > { %3603 = vst [vmem:[%s5208_s30 + $0xc0] sm:$0xff] %v3571_v62  ;;  %v5092_v18 = vpop.eup %5091 }
 0x251   : > { %v5094_v47 = vpop.eup %5093  ;;  %v3574_v13 = vmul.f32 %v3542_v53, %v3286_v23  ;;  %v3540_v46 = vadd.f32 1.0, %v5092_v18 }
 0x252   : > { %v3545_v22 = vadd.f32 1.0, %v5094_v47 }
 0x253   : > { %3606 = vst [vmem:[%s5208_s30 + $0xd8] sm:$0xff] %v3574_v13  ;;  %v3572_v4 = vmul.f32 %v3540_v46, %v3284_v55 }
 0x254   : > { %v5096_v28 = vpop.eup %5095  ;;  %v3577_v38 = vmul.f32 %v3545_v22, %v3289_v58 }
 0x255   : > { %v3543_v3 = vadd.f32 1.0, %v5096_v28  ;;  %3604 = vst [vmem:[%s5208_s30 + $0xc8] sm:$0xff] %v3572_v4 }
 0x256   : > { %v5098_v2 = vpop.eup %5097  ;;  %3609 = vst [vmem:[%s5208_s30 + $0xf0] sm:$0xff] %v3577_v38 }
 0x257   : > { %v5100_v34 = vpop.eup %5099  ;;  %v3575_v7 = vmul.f32 %v3543_v3, %v3287_v36  ;;  %v3546_v54 = vadd.f32 1.0, %v5098_v2 }
 0x258   : > { %v3544_v44 = vadd.f32 1.0, %v5100_v34 }
 0x259   : > { %3607 = vst [vmem:[%s5208_s30 + $0xe0] sm:$0xff] %v3575_v7  ;;  %v3578_v39 = vmul.f32 %v3546_v54, %v3290_v25 }
 0x25a   : > { %v3576_v31 = vmul.f32 %v3544_v44, %v3288_v50 }
 0x25b   : > { %3610 = vst [vmem:[%s5208_s30 + $0xf8] sm:$0xff] %v3578_v39 }
 0x25c   : > { %3608 = vst [vmem:[%s5208_s30 + $0xe8] sm:$0xff] %v3576_v31 }
 0x25d PF: > { %s14_s17 = sadd.s32 1, %s5133_s17   ;;  %s6370_s15 = smov %s5129_s16 }
 0x25e   : > { %p11_p5 = scmp.ge.s32.totalorder %s14_s17, 4   ;;  %s6371_s16 = smov %s6373_s18 }
 0x260   :  { %13 = sbr.rel (!%p11_p5) target bundleno = 2 (0x2), region = 113 }
 0x267   :  { %3643 = vsyncmov [#allocation3] }
 0x26a   :  { %s3644_s27 = vpop.sfrf %3643 }
 0x26b   :  { %p3872_p6 = scmp.ne.s32.totalorder %s3644_s27, 0 }
 0x26d   :  { %3648 = shalt.err (%p3872_p6)  }
 0x26e   :  { %3650 = vsyncmov [#allocation3 + $0x1] }
 0x271   :  { %s3651_s23 = vpop.sfrf %3650 }
 0x272   :  { %p3873_p7 = scmp.ne.s32.totalorder %s3651_s23, 0 }
 0x274   :  { %3655 = shalt.err (%p3873_p7)  }

</bundles_post_ra>
